<compile_context>
chip_gen: v7x
topology: tpu7x:2x2x1
jax: 0.10.0
libtpu: 0.0.40
codegen_flags: <defaults>
</compile_context>

<pallas_src>
import functools

import jax
import jax.numpy as jnp
from jax.experimental import pallas as pl
from jax.experimental.pallas import tpu as pltpu

K_BINS = 3                     # K in the PyTorch module
B_BOUND = 8.0                  # B in the PyTorch module (tail bound)
N_PLANES = 3 * K_BINS - 1      # 3 width logits + 3 height logits + 2 derivs
_EPS = 1e-6                    # numerical floor on selected bin width/height


def _round_up(x, m):
    return (x + m - 1) // m * m


def _softplus(x):
    return jnp.maximum(x, 0.0) + jnp.log1p(jnp.exp(-jnp.abs(x)))


# --------------------------------------------------------------------------
# Rational-quadratic spline (elementwise, runs on the VPU/EUP inside the
# kernel).  Width path is computed fully before the height / derivative path
# to limit the number of simultaneously-live f32 planes.
# --------------------------------------------------------------------------
def _rqs_forward(x, planes):
    """x : [TN, Pp] f32, planes : 8 x [TN, Pp] f32 -> (y, log_det)."""
    w0, w1, w2, h0, h1, h2, d0, d1 = planes
    negB = -B_BOUND

    def softmax_times_2b(a0, a1, a2):
        m = jnp.maximum(jnp.maximum(a0, a1), a2)
        e0 = jnp.exp(a0 - m)
        e1 = jnp.exp(a1 - m)
        e2 = jnp.exp(a2 - m)
        inv = (2.0 * B_BOUND) * pl.reciprocal(e0 + e1 + e2, approx=True)
        return e0 * inv, e1 * inv, e2 * inv

    # ---- width path ----
    W0, W1, W2 = softmax_times_2b(w0, w1, w2)       # bin widths, sum = 2B
    cw1 = negB + W0
    cw2 = cw1 + W1

    inside = (x >= negB) & (x <= B_BOUND)
    xc = jnp.clip(x, negB, B_BOUND)
    in0 = xc < cw1
    in1 = jnp.logical_and(jnp.logical_not(in0), xc < cw2)

    def sel(a0, a1, a2):
        return jnp.where(in0, a0, jnp.where(in1, a1, a2))

    sw = jnp.maximum(sel(W0, W1, W2), _EPS)         # selected bin width
    scw = sel(negB, cw1, cw2)                       # left knot x
    inv_sw = pl.reciprocal(sw, approx=True)
    th = jnp.clip((xc - scw) * inv_sw, 0.0, 1.0)
    om = 1.0 - th
    thom = th * om

    # ---- height path ----
    H0, H1, H2 = softmax_times_2b(h0, h1, h2)       # bin heights, sum = 2B
    ch1 = negB + H0
    ch2 = ch1 + H1
    sh = jnp.maximum(sel(H0, H1, H2), _EPS)         # selected bin height
    sch = sel(negB, ch1, ch2)                       # left knot y
    s = sh * inv_sw

    # ---- derivative path ----
    D1 = _softplus(d0)                              # interior knot derivative 1
    D2 = _softplus(d1)                              # interior knot derivative 2
    sd = sel(1.0, D1, D2)                           # derivative at left knot
    sdp = sel(D1, D2, 1.0)                          # derivative at right knot

    num = sh * (s * th * th + sd * thom)
    den = s + (sdp + sd - 2.0 * s) * thom
    inv_den = pl.reciprocal(den, approx=True)
    y_spline = sch + num * inv_den
    deriv = s * s * (sdp * th * th + 2.0 * s * thom + sd * om * om) * (inv_den * inv_den)
    # Floor guards log() against softplus-derived derivatives underflowing to 0.
    ld_spline = jnp.log(jnp.maximum(deriv, 1e-12))

    y = jnp.where(inside, y_spline, x)              # identity tail outside [-B, B]
    ld = jnp.where(inside, ld_spline, 0.0)
    return y, ld


# --------------------------------------------------------------------------
# Fused kernel: mask split + conditioner (pass 1) + spline + conditioner
# (pass 2) + spline + log_det accumulation, all for one batch tile.
# --------------------------------------------------------------------------
def _coupling_fused_kernel(z_ref, ldin_ref, mask_ref, w1_ref, b1_ref, w2_ref,
                           b2_ref, znew_ref, ldout_ref):
    """z/ldin/znew/ldout : [TN, Pp] f32 ; mask : [1, Pp] f32
    w1 : [Pp, HID] bf16 ; b1 : [1, HID] f32 ; w2 : [HID, 8*Pp] bf16 ; b2 : [1, 8*Pp] f32
    """
    z = z_ref[...]
    m = mask_ref[...]                       # [1, Pp], broadcasts over rows
    z_in = z * m                            # z * mask
    z_out = z * (m + 1.0)                   # z * -~mask.bool().int()

    def conditioner(x_f32):
        h = jnp.dot(x_f32.astype(jnp.bfloat16), w1_ref[...],
                    preferred_element_type=jnp.float32)
        h = jnp.maximum(h + b1_ref[...], 0.0)                      # [TN, HID]
        t = jnp.dot(h.astype(jnp.bfloat16), w2_ref[...],
                    preferred_element_type=jnp.float32)
        t = t + b2_ref[...]                                        # [TN, 8*Pp]
        pp = t.shape[1] // N_PLANES
        # Pp is a multiple of 128 -> each plane slice is a lane-aligned view.
        return [t[:, j * pp:(j + 1) * pp] for j in range(N_PLANES)]

    # pass 1: theta(z_in) parameterizes the spline applied to z_out
    y_out, ld1 = _rqs_forward(z_out, conditioner(z_in))

    # pass 2: theta(transformed z_out) parameterizes the spline on z_in.
    # Padded lanes of y_out multiply zeroed rows of w1, so no lane mask needed.
    y_in, ld2 = _rqs_forward(z_in, conditioner(y_out))

    znew_ref[...] = y_in + y_out
    ldout_ref[...] = ldin_ref[...] + ld1 + ld2


# --------------------------------------------------------------------------
# Tiling / VMEM helpers
# --------------------------------------------------------------------------
def _num_tensorcores():
    try:
        kind = jax.devices()[0].device_kind.lower()
    except Exception:
        kind = ""
    return 2 if "v7" in kind else 1


def _pick_tile_n(n_pad):
    """Batch tile size.

    Prefer TN=128 (fills the MXU rows, amortizes per-step overhead).  On
    2-TensorCore parts (v7x) shrink just enough to give every core >= 2
    pipelined grid steps so the input-tile DMA hides behind spline compute.
    """
    cands = [t for t in (128, 64, 32, 16, 8) if t <= n_pad and n_pad % t == 0]
    if not cands:
        return n_pad
    n_tc = _num_tensorcores()
    if n_tc > 1:
        for t in cands:
            if n_pad // t >= 2 * n_tc:
                return t
        for t in cands:
            if n_pad // t >= n_tc:
                return t
    return cands[0]


@functools.lru_cache(maxsize=None)
def _supports_single_buffering():
    """Probe (once) whether pipeline_mode=pl.Buffered(1) lowers on this
    jax/Mosaic build.  Single-buffering the constant weight blocks halves
    their resident VMEM (matters on v7x's 64 MiB VMEM)."""
    if not hasattr(pl, "Buffered"):
        return False

    def _probe(x_ref, o_ref):
        o_ref[...] = x_ref[...] + 1.0

    try:
        f = pl.pallas_call(
            _probe,
            out_shape=jax.ShapeDtypeStruct((16, 128), jnp.float32),
            grid=(2,),
            in_specs=[pl.BlockSpec((8, 128), lambda i: (0, 0),
                                   pipeline_mode=pl.Buffered(1))],
            out_specs=pl.BlockSpec((8, 128), lambda i: (i, 0)),
        )
        jax.block_until_ready(f(jnp.zeros((8, 128), jnp.float32)))
        return True
    except Exception:
        return False


def _vmem_bytes_estimate(tn, p_pad, hid, wbuf):
    bf16, f32 = 2, 4
    weights = wbuf * (p_pad * hid * bf16 + hid * N_PLANES * p_pad * bf16
                      + (hid + N_PLANES * p_pad + p_pad) * f32)
    io = 4 * 2 * tn * p_pad * f32            # z, log_det in; z_new, ld out (x2 bufs)
    theta = tn * N_PLANES * p_pad * f32      # conditioner output slab (one pass live)
    hidden = tn * hid * (f32 + bf16)
    epilogue = 24 * tn * p_pad * f32         # live f32 planes inside the spline math
    return weights + io + theta + hidden + epilogue


def _coupling_fused(z, log_det, mask_row, w1, b1, w2, b2):
    n_pad, p_pad = z.shape
    hid = w1.shape[1]
    tn = _pick_tile_n(n_pad)
    grid = (n_pad // tn,)

    single_buf = _supports_single_buffering()

    row_spec = pl.BlockSpec((tn, p_pad), lambda i: (i, 0))

    def const_spec(shape):
        if single_buf:
            return pl.BlockSpec(shape, lambda i: (0, 0),
                                pipeline_mode=pl.Buffered(1))
        return pl.BlockSpec(shape, lambda i: (0, 0))

    vmem_est = _vmem_bytes_estimate(tn, p_pad, hid, 1 if single_buf else 2)
    # Footprint-derived limit with headroom; keep below v7x's 64 MiB physical.
    vmem_limit = int(min(max(int(vmem_est * 1.25) + (8 << 20), 32 << 20), 56 << 20))

    return pl.pallas_call(
        _coupling_fused_kernel,
        out_shape=(jax.ShapeDtypeStruct((n_pad, p_pad), jnp.float32),
                   jax.ShapeDtypeStruct((n_pad, p_pad), jnp.float32)),
        grid=grid,
        in_specs=[
            row_spec,                                  # z tile
            row_spec,                                  # log_det tile
            const_spec((1, p_pad)),                    # mask (resident)
            const_spec((p_pad, hid)),                  # w1 (resident)
            const_spec((1, hid)),                      # b1
            const_spec((hid, N_PLANES * p_pad)),       # w2 (resident)
            const_spec((1, N_PLANES * p_pad)),         # b2
        ],
        out_specs=(row_spec, row_spec),
        compiler_params=pltpu.CompilerParams(
            dimension_semantics=("parallel",),
            vmem_limit_bytes=vmem_limit),
    )(z, log_det, mask_row, w1, b1, w2, b2)


# --------------------------------------------------------------------------
# Parameters + forward wrapper
# --------------------------------------------------------------------------
def init_params(key, p, hid):
    """Deterministic synthetic conditioner-network parameters.

    Weights are built at the 128-padded pixel count in bf16 (MXU inputs),
    biases in f32.  Padded input rows of w1 are zeroed so padded lanes of the
    pass-1 spline output are transparent to the conditioner (no in-kernel
    lane mask needed)."""
    p_pad = _round_up(p, 128)
    k1, k2 = jax.random.split(key)
    w1 = jax.random.normal(k1, (p_pad, hid), dtype=jnp.float32) / jnp.sqrt(float(p))
    row = jnp.arange(p_pad)[:, None]
    w1 = jnp.where(row < p, w1, 0.0).astype(jnp.bfloat16)
    b1 = jnp.zeros((1, hid), dtype=jnp.float32)
    w2 = (jax.random.normal(k2, (hid, N_PLANES * p_pad), dtype=jnp.float32)
          / jnp.sqrt(float(hid))).astype(jnp.bfloat16)
    b2 = jnp.zeros((1, N_PLANES * p_pad), dtype=jnp.float32)
    return w1, b1, w2, b2


def coupling_layer_forward(z, log_det, mask, params):
    """Forward pass of CouplingLayer (reverse=False).

    z       : [N, 1, S, S] f32
    log_det : [N, S*S]     f32 (per-element log-det carry)
    mask    : [1, 1, S, S] binary (0/1)
    returns : (z_new [N, S*S], log_det [N, S*S])
    """
    w1, b1, w2, b2 = params
    n = z.shape[0]
    p = z.shape[1] * z.shape[2] * z.shape[3]
    p_pad = w1.shape[0]

    z2 = z.reshape(n, p)
    ld2 = log_det.reshape(n, p)
    mask_row = mask.astype(jnp.float32).reshape(1, p)

    n_pad = _round_up(max(n, 8), 8)
    need_pad = (n_pad != n) or (p_pad != p)
    if need_pad:
        # Only reached when the pixel count is not already a multiple of 128.
        z2 = jnp.pad(z2, ((0, n_pad - n), (0, p_pad - p)))
        ld2 = jnp.pad(ld2, ((0, n_pad - n), (0, p_pad - p)))
        mask_row = jnp.pad(mask_row, ((0, 0), (0, p_pad - p)))

    z_new, ld_new = _coupling_fused(z2, ld2, mask_row, w1, b1, w2, b2)

    if need_pad:
        return z_new[:n, :p], ld_new[:n, :p]
    return z_new, ld_new


if __name__ == "__main__":
    # Small shapes consistent with the module: batch, 1 channel, SxS image.
    N, C, S = 16, 1, 16
    P = S * S                 # 256 (already a multiple of 128 -> no pad/slice)
    HID = 32

    key = jax.random.PRNGKey(0)
    kz, kld, kp = jax.random.split(key, 3)

    z = jax.random.uniform(kz, (N, C, S, S), dtype=jnp.float32)
    log_det = jax.random.uniform(kld, (N, P), dtype=jnp.float32)

    # checkerboard binary mask [1, 1, S, S]
    ii = jnp.arange(S)[:, None]
    jj = jnp.arange(S)[None, :]
    mask = ((ii + jj) % 2).astype(jnp.float32)[None, None, :, :]

    params = init_params(kp, P, HID)

    _supports_single_buffering()       # warm the probe outside jit

    fwd = jax.jit(coupling_layer_forward)
    z_new, log_det_new = fwd(z, log_det, mask, params)
    jax.block_until_ready((z_new, log_det_new))

    assert z_new.shape == (N, P) and log_det_new.shape == (N, P)
    assert bool(jnp.all(jnp.isfinite(z_new)))
    assert bool(jnp.all(jnp.isfinite(log_det_new)))
    print("KERNEL_OK")
</pallas_src>

<mosaic_0001>
module attributes {stable_mosaic.version = 11 : i64} {
  func.func @_probe(%arg0: i32, %arg1: memref<8x128xf32, #tpu.memory_space<vmem>>, %arg2: memref<8x128xf32, #tpu.memory_space<vmem>>) attributes {dimension_semantics = [#tpu.dimension_semantics<arbitrary>], iteration_bounds = array<i64: 2>, scalar_prefetch = 0 : i64, scratch_operands = 0 : i64, tpu.core_type = #tpu.core_type<tc>, window_params = [{pipeline_mode = #tpu.pipeline_mode<synchronous>, transform_indices = @transform_0, window_bounds = array<i64: 8, 128>}, {transform_indices = @transform_1, window_bounds = array<i64: 8, 128>}]} {
    %c0 = arith.constant 0 : index
    %c0_0 = arith.constant 0 : index
    %0 = vector.load %arg1[%c0, %c0_0] : memref<8x128xf32, #tpu.memory_space<vmem>>, vector<8x128xf32>
    %cst = arith.constant 1.000000e+00 : f32
    %1 = vector.broadcast %cst : f32 to vector<8x128xf32>
    %2 = arith.addf %0, %1 : vector<8x128xf32>
    %c0_1 = arith.constant 0 : index
    %c0_2 = arith.constant 0 : index
    %3 = vector.load %arg2[%c0_1, %c0_2] : memref<8x128xf32, #tpu.memory_space<vmem>>, vector<8x128xf32>
    tpu.vector_store %arg2[%c0_1, %c0_2], %2 {strides = array<i32>} : memref<8x128xf32, #tpu.memory_space<vmem>>, vector<8x128xf32>,
    return
  }
  func.func @transform_0(%arg0: i32) -> (i32, i32) {
    %c0_i32 = arith.constant 0 : i32
    %c0_i32_0 = arith.constant 0 : i32
    %c0_i32_1 = arith.constant 0 : i32
    return %c0_i32, %c0_i32_0 : i32, i32
  }
  func.func @transform_1(%arg0: i32) -> (i32, i32) {
    %c0_i32 = arith.constant 0 : i32
    %c0_i32_0 = arith.constant 0 : i32
    return %arg0, %c0_i32 : i32, i32
  }
}

module attributes {stable_mosaic.version = 11 : i64} {
  func.func @_coupling_fused_kernel(%arg0: i32, %arg1: memref<16x256xf32, #tpu.memory_space<vmem>>, %arg2: memref<16x256xf32, #tpu.memory_space<vmem>>, %arg3: memref<1x256xf32, #tpu.memory_space<vmem>>, %arg4: memref<256x32xbf16, #tpu.memory_space<vmem>>, %arg5: memref<1x32xf32, #tpu.memory_space<vmem>>, %arg6: memref<32x2048xbf16, #tpu.memory_space<vmem>>, %arg7: memref<1x2048xf32, #tpu.memory_space<vmem>>, %arg8: memref<16x256xf32, #tpu.memory_space<vmem>>, %arg9: memref<16x256xf32, #tpu.memory_space<vmem>>) attributes {dimension_semantics = [#tpu.dimension_semantics<parallel>], iteration_bounds = array<i64: 1>, scalar_prefetch = 0 : i64, scratch_operands = 0 : i64, tpu.core_type = #tpu.core_type<tc>, window_params = [{transform_indices = @transform_0, window_bounds = array<i64: 16, 256>}, {transform_indices = @transform_1, window_bounds = array<i64: 16, 256>}, {pipeline_mode = #tpu.pipeline_mode<synchronous>, transform_indices = @transform_2, window_bounds = array<i64: 1, 256>}, {pipeline_mode = #tpu.pipeline_mode<synchronous>, transform_indices = @transform_3, window_bounds = array<i64: 256, 32>}, {pipeline_mode = #tpu.pipeline_mode<synchronous>, transform_indices = @transform_4, window_bounds = array<i64: 1, 32>}, {pipeline_mode = #tpu.pipeline_mode<synchronous>, transform_indices = @transform_5, window_bounds = array<i64: 32, 2048>}, {pipeline_mode = #tpu.pipeline_mode<synchronous>, transform_indices = @transform_6, window_bounds = array<i64: 1, 2048>}, {transform_indices = @transform_7, window_bounds = array<i64: 16, 256>}, {transform_indices = @transform_8, window_bounds = array<i64: 16, 256>}]} {
    %c0 = arith.constant 0 : index
    %c0_0 = arith.constant 0 : index
    %0 = vector.load %arg1[%c0, %c0_0] : memref<16x256xf32, #tpu.memory_space<vmem>>, vector<16x256xf32>
    %c0_1 = arith.constant 0 : index
    %c0_2 = arith.constant 0 : index
    %1 = vector.load %arg3[%c0_1, %c0_2] : memref<1x256xf32, #tpu.memory_space<vmem>>, vector<1x256xf32>
    %2 = vector.broadcast %1 : vector<1x256xf32> to vector<16x256xf32>
    %3 = arith.mulf %0, %2 : vector<16x256xf32>
    %cst = arith.constant 1.000000e+00 : f32
    %4 = vector.broadcast %cst : f32 to vector<1x256xf32>
    %5 = arith.addf %1, %4 : vector<1x256xf32>
    %6 = vector.broadcast %5 : vector<1x256xf32> to vector<16x256xf32>
    %7 = arith.mulf %0, %6 : vector<16x256xf32>
    %8 = arith.truncf %3 : vector<16x256xf32> to vector<16x256xbf16>
    %c0_3 = arith.constant 0 : index
    %c0_4 = arith.constant 0 : index
    %9 = vector.load %arg4[%c0_3, %c0_4] : memref<256x32xbf16, #tpu.memory_space<vmem>>, vector<256x32xbf16>
    %cst_5 = arith.constant dense<0.000000e+00> : vector<16x32xf32>
    %10 = tpu.matmul %8, %9, %cst_5 {dimension_numbers = #tpu.dot_dimension_numbers<[1], [0], [0], [1], [0, 0, 1, 1], [], []>} : vector<16x256xbf16>, vector<256x32xbf16>, vector<16x32xf32> -> vector<16x32xf32>
    %c0_6 = arith.constant 0 : index
    %c0_7 = arith.constant 0 : index
    %11 = vector.load %arg5[%c0_6, %c0_7] : memref<1x32xf32, #tpu.memory_space<vmem>>, vector<1x32xf32>
    %12 = vector.broadcast %11 : vector<1x32xf32> to vector<16x32xf32>
    %13 = arith.addf %10, %12 : vector<16x32xf32>
    %cst_8 = arith.constant 0.000000e+00 : f32
    %14 = vector.broadcast %cst_8 : f32 to vector<16x32xf32>
    %15 = arith.maximumf %13, %14 : vector<16x32xf32>
    %16 = arith.truncf %15 : vector<16x32xf32> to vector<16x32xbf16>
    %c0_9 = arith.constant 0 : index
    %c0_10 = arith.constant 0 : index
    %17 = vector.load %arg6[%c0_9, %c0_10] : memref<32x2048xbf16, #tpu.memory_space<vmem>>, vector<32x2048xbf16>
    %cst_11 = arith.constant dense<0.000000e+00> : vector<16x2048xf32>
    %18 = tpu.matmul %16, %17, %cst_11 {dimension_numbers = #tpu.dot_dimension_numbers<[1], [0], [0], [1], [0, 0, 1, 1], [], []>} : vector<16x32xbf16>, vector<32x2048xbf16>, vector<16x2048xf32> -> vector<16x2048xf32>
    %c0_12 = arith.constant 0 : index
    %c0_13 = arith.constant 0 : index
    %19 = vector.load %arg7[%c0_12, %c0_13] : memref<1x2048xf32, #tpu.memory_space<vmem>>, vector<1x2048xf32>
    %20 = vector.broadcast %19 : vector<1x2048xf32> to vector<16x2048xf32>
    %21 = arith.addf %18, %20 : vector<16x2048xf32>
    %22 = vector.extract_strided_slice %21 {offsets = [0, 0], sizes = [16, 256], strides = [1, 1]} : vector<16x2048xf32> to vector<16x256xf32>
    %23 = vector.extract_strided_slice %21 {offsets = [0, 256], sizes = [16, 256], strides = [1, 1]} : vector<16x2048xf32> to vector<16x256xf32>
    %24 = vector.extract_strided_slice %21 {offsets = [0, 512], sizes = [16, 256], strides = [1, 1]} : vector<16x2048xf32> to vector<16x256xf32>
    %25 = vector.extract_strided_slice %21 {offsets = [0, 768], sizes = [16, 256], strides = [1, 1]} : vector<16x2048xf32> to vector<16x256xf32>
    %26 = vector.extract_strided_slice %21 {offsets = [0, 1024], sizes = [16, 256], strides = [1, 1]} : vector<16x2048xf32> to vector<16x256xf32>
    %27 = vector.extract_strided_slice %21 {offsets = [0, 1280], sizes = [16, 256], strides = [1, 1]} : vector<16x2048xf32> to vector<16x256xf32>
    %28 = vector.extract_strided_slice %21 {offsets = [0, 1536], sizes = [16, 256], strides = [1, 1]} : vector<16x2048xf32> to vector<16x256xf32>
    %29 = vector.extract_strided_slice %21 {offsets = [0, 1792], sizes = [16, 256], strides = [1, 1]} : vector<16x2048xf32> to vector<16x256xf32>
    %30 = arith.maximumf %22, %23 : vector<16x256xf32>
    %31 = arith.maximumf %30, %24 : vector<16x256xf32>
    %32 = arith.subf %22, %31 : vector<16x256xf32>
    %33 = math.exp %32 : vector<16x256xf32>
    %34 = arith.subf %23, %31 : vector<16x256xf32>
    %35 = math.exp %34 : vector<16x256xf32>
    %36 = arith.subf %24, %31 : vector<16x256xf32>
    %37 = math.exp %36 : vector<16x256xf32>
    %38 = arith.addf %33, %35 : vector<16x256xf32>
    %39 = arith.addf %38, %37 : vector<16x256xf32>
    %40 = tpu.reciprocal %39 {approx = true} : vector<16x256xf32> -> vector<16x256xf32>
    %cst_14 = arith.constant 1.600000e+01 : f32
    %41 = vector.broadcast %cst_14 : f32 to vector<16x256xf32>
    %42 = arith.mulf %41, %40 : vector<16x256xf32>
    %43 = arith.mulf %33, %42 : vector<16x256xf32>
    %44 = arith.mulf %35, %42 : vector<16x256xf32>
    %45 = arith.mulf %37, %42 : vector<16x256xf32>
    %cst_15 = arith.constant -8.000000e+00 : f32
    %46 = vector.broadcast %cst_15 : f32 to vector<16x256xf32>
    %47 = arith.addf %46, %43 : vector<16x256xf32>
    %48 = arith.addf %47, %44 : vector<16x256xf32>
    %cst_16 = arith.constant -8.000000e+00 : f32
    %49 = vector.broadcast %cst_16 : f32 to vector<16x256xf32>
    %50 = arith.cmpf oge, %7, %49 : vector<16x256xf32>
    %cst_17 = arith.constant 8.000000e+00 : f32
    %51 = vector.broadcast %cst_17 : f32 to vector<16x256xf32>
    %52 = arith.cmpf ole, %7, %51 : vector<16x256xf32>
    %53 = arith.andi %50, %52 : vector<16x256xi1>
    %cst_18 = arith.constant -8.000000e+00 : f32
    %cst_19 = arith.constant 8.000000e+00 : f32
    %54 = vector.broadcast %cst_18 : f32 to vector<16x256xf32>
    %55 = arith.maximumf %54, %7 : vector<16x256xf32>
    %56 = vector.broadcast %cst_19 : f32 to vector<16x256xf32>
    %57 = arith.minimumf %56, %55 : vector<16x256xf32>
    %58 = arith.cmpf olt, %57, %47 : vector<16x256xf32>
    %cst_20 = arith.constant dense<true> : vector<16x256xi1>
    %59 = arith.xori %58, %cst_20 : vector<16x256xi1>
    %60 = arith.cmpf olt, %57, %48 : vector<16x256xf32>
    %61 = arith.andi %59, %60 : vector<16x256xi1>
    %62 = arith.select %61, %44, %45 : vector<16x256xi1>, vector<16x256xf32>
    %63 = arith.select %58, %43, %62 : vector<16x256xi1>, vector<16x256xf32>
    %cst_21 = arith.constant 9.99999997E-7 : f32
    %64 = vector.broadcast %cst_21 : f32 to vector<16x256xf32>
    %65 = arith.maximumf %63, %64 : vector<16x256xf32>
    %66 = arith.select %61, %47, %48 : vector<16x256xi1>, vector<16x256xf32>
    %cst_22 = arith.constant -8.000000e+00 : f32
    %67 = vector.broadcast %cst_22 : f32 to vector<16x256xf32>
    %68 = arith.select %58, %67, %66 : vector<16x256xi1>, vector<16x256xf32>
    %69 = tpu.reciprocal %65 {approx = true} : vector<16x256xf32> -> vector<16x256xf32>
    %70 = arith.subf %57, %68 : vector<16x256xf32>
    %71 = arith.mulf %70, %69 : vector<16x256xf32>
    %cst_23 = arith.constant 0.000000e+00 : f32
    %cst_24 = arith.constant 1.000000e+00 : f32
    %72 = vector.broadcast %cst_23 : f32 to vector<16x256xf32>
    %73 = arith.maximumf %72, %71 : vector<16x256xf32>
    %74 = vector.broadcast %cst_24 : f32 to vector<16x256xf32>
    %75 = arith.minimumf %74, %73 : vector<16x256xf32>
    %cst_25 = arith.constant 1.000000e+00 : f32
    %76 = vector.broadcast %cst_25 : f32 to vector<16x256xf32>
    %77 = arith.subf %76, %75 : vector<16x256xf32>
    %78 = arith.mulf %75, %77 : vector<16x256xf32>
    %79 = arith.maximumf %25, %26 : vector<16x256xf32>
    %80 = arith.maximumf %79, %27 : vector<16x256xf32>
    %81 = arith.subf %25, %80 : vector<16x256xf32>
    %82 = math.exp %81 : vector<16x256xf32>
    %83 = arith.subf %26, %80 : vector<16x256xf32>
    %84 = math.exp %83 : vector<16x256xf32>
    %85 = arith.subf %27, %80 : vector<16x256xf32>
    %86 = math.exp %85 : vector<16x256xf32>
    %87 = arith.addf %82, %84 : vector<16x256xf32>
    %88 = arith.addf %87, %86 : vector<16x256xf32>
    %89 = tpu.reciprocal %88 {approx = true} : vector<16x256xf32> -> vector<16x256xf32>
    %cst_26 = arith.constant 1.600000e+01 : f32
    %90 = vector.broadcast %cst_26 : f32 to vector<16x256xf32>
    %91 = arith.mulf %90, %89 : vector<16x256xf32>
    %92 = arith.mulf %82, %91 : vector<16x256xf32>
    %93 = arith.mulf %84, %91 : vector<16x256xf32>
    %94 = arith.mulf %86, %91 : vector<16x256xf32>
    %cst_27 = arith.constant -8.000000e+00 : f32
    %95 = vector.broadcast %cst_27 : f32 to vector<16x256xf32>
    %96 = arith.addf %95, %92 : vector<16x256xf32>
    %97 = arith.addf %96, %93 : vector<16x256xf32>
    %98 = arith.select %61, %93, %94 : vector<16x256xi1>, vector<16x256xf32>
    %99 = arith.select %58, %92, %98 : vector<16x256xi1>, vector<16x256xf32>
    %cst_28 = arith.constant 9.99999997E-7 : f32
    %100 = vector.broadcast %cst_28 : f32 to vector<16x256xf32>
    %101 = arith.maximumf %99, %100 : vector<16x256xf32>
    %102 = arith.select %61, %96, %97 : vector<16x256xi1>, vector<16x256xf32>
    %cst_29 = arith.constant -8.000000e+00 : f32
    %103 = vector.broadcast %cst_29 : f32 to vector<16x256xf32>
    %104 = arith.select %58, %103, %102 : vector<16x256xi1>, vector<16x256xf32>
    %105 = arith.mulf %101, %69 : vector<16x256xf32>
    %cst_30 = arith.constant 0.000000e+00 : f32
    %106 = vector.broadcast %cst_30 : f32 to vector<16x256xf32>
    %107 = arith.maximumf %28, %106 : vector<16x256xf32>
    %108 = math.absf %28 : vector<16x256xf32>
    %cst_31 = arith.constant 0.000000e+00 : f32
    %109 = vector.broadcast %cst_31 : f32 to vector<16x256xf32>
    %110 = arith.subf %109, %108 : vector<16x256xf32>
    %111 = math.exp %110 : vector<16x256xf32>
    %112 = math.log1p %111 : vector<16x256xf32>
    %113 = arith.addf %107, %112 : vector<16x256xf32>
    %cst_32 = arith.constant 0.000000e+00 : f32
    %114 = vector.broadcast %cst_32 : f32 to vector<16x256xf32>
    %115 = arith.maximumf %29, %114 : vector<16x256xf32>
    %116 = math.absf %29 : vector<16x256xf32>
    %cst_33 = arith.constant 0.000000e+00 : f32
    %117 = vector.broadcast %cst_33 : f32 to vector<16x256xf32>
    %118 = arith.subf %117, %116 : vector<16x256xf32>
    %119 = math.exp %118 : vector<16x256xf32>
    %120 = math.log1p %119 : vector<16x256xf32>
    %121 = arith.addf %115, %120 : vector<16x256xf32>
    %122 = arith.select %61, %113, %121 : vector<16x256xi1>, vector<16x256xf32>
    %cst_34 = arith.constant 1.000000e+00 : f32
    %123 = vector.broadcast %cst_34 : f32 to vector<16x256xf32>
    %124 = arith.select %58, %123, %122 : vector<16x256xi1>, vector<16x256xf32>
    %cst_35 = arith.constant 1.000000e+00 : f32
    %125 = vector.broadcast %cst_35 : f32 to vector<16x256xf32>
    %126 = arith.select %61, %121, %125 : vector<16x256xi1>, vector<16x256xf32>
    %127 = arith.select %58, %113, %126 : vector<16x256xi1>, vector<16x256xf32>
    %128 = arith.mulf %105, %75 : vector<16x256xf32>
    %129 = arith.mulf %128, %75 : vector<16x256xf32>
    %130 = arith.mulf %124, %78 : vector<16x256xf32>
    %131 = arith.addf %129, %130 : vector<16x256xf32>
    %132 = arith.mulf %101, %131 : vector<16x256xf32>
    %133 = arith.addf %127, %124 : vector<16x256xf32>
    %cst_36 = arith.constant 2.000000e+00 : f32
    %134 = vector.broadcast %cst_36 : f32 to vector<16x256xf32>
    %135 = arith.mulf %134, %105 : vector<16x256xf32>
    %136 = arith.subf %133, %135 : vector<16x256xf32>
    %137 = arith.mulf %136, %78 : vector<16x256xf32>
    %138 = arith.addf %105, %137 : vector<16x256xf32>
    %139 = tpu.reciprocal %138 {approx = true} : vector<16x256xf32> -> vector<16x256xf32>
    %140 = arith.mulf %132, %139 : vector<16x256xf32>
    %141 = arith.addf %104, %140 : vector<16x256xf32>
    %142 = arith.mulf %105, %105 : vector<16x256xf32>
    %143 = arith.mulf %127, %75 : vector<16x256xf32>
    %144 = arith.mulf %143, %75 : vector<16x256xf32>
    %cst_37 = arith.constant 2.000000e+00 : f32
    %145 = vector.broadcast %cst_37 : f32 to vector<16x256xf32>
    %146 = arith.mulf %145, %105 : vector<16x256xf32>
    %147 = arith.mulf %146, %78 : vector<16x256xf32>
    %148 = arith.addf %144, %147 : vector<16x256xf32>
    %149 = arith.mulf %124, %77 : vector<16x256xf32>
    %150 = arith.mulf %149, %77 : vector<16x256xf32>
    %151 = arith.addf %148, %150 : vector<16x256xf32>
    %152 = arith.mulf %142, %151 : vector<16x256xf32>
    %153 = arith.mulf %139, %139 : vector<16x256xf32>
    %154 = arith.mulf %152, %153 : vector<16x256xf32>
    %cst_38 = arith.constant 9.99999996E-13 : f32
    %155 = vector.broadcast %cst_38 : f32 to vector<16x256xf32>
    %156 = arith.maximumf %154, %155 : vector<16x256xf32>
    %157 = math.log %156 : vector<16x256xf32>
    %158 = arith.select %53, %141, %7 : vector<16x256xi1>, vector<16x256xf32>
    %cst_39 = arith.constant 0.000000e+00 : f32
    %159 = vector.broadcast %cst_39 : f32 to vector<16x256xf32>
    %160 = arith.select %53, %157, %159 : vector<16x256xi1>, vector<16x256xf32>
    %161 = arith.truncf %158 : vector<16x256xf32> to vector<16x256xbf16>
    %c0_40 = arith.constant 0 : index
    %c0_41 = arith.constant 0 : index
    %162 = vector.load %arg4[%c0_40, %c0_41] : memref<256x32xbf16, #tpu.memory_space<vmem>>, vector<256x32xbf16>
    %cst_42 = arith.constant dense<0.000000e+00> : vector<16x32xf32>
    %163 = tpu.matmul %161, %162, %cst_42 {dimension_numbers = #tpu.dot_dimension_numbers<[1], [0], [0], [1], [0, 0, 1, 1], [], []>} : vector<16x256xbf16>, vector<256x32xbf16>, vector<16x32xf32> -> vector<16x32xf32>
    %c0_43 = arith.constant 0 : index
    %c0_44 = arith.constant 0 : index
    %164 = vector.load %arg5[%c0_43, %c0_44] : memref<1x32xf32, #tpu.memory_space<vmem>>, vector<1x32xf32>
    %165 = vector.broadcast %164 : vector<1x32xf32> to vector<16x32xf32>
    %166 = arith.addf %163, %165 : vector<16x32xf32>
    %cst_45 = arith.constant 0.000000e+00 : f32
    %167 = vector.broadcast %cst_45 : f32 to vector<16x32xf32>
    %168 = arith.maximumf %166, %167 : vector<16x32xf32>
    %169 = arith.truncf %168 : vector<16x32xf32> to vector<16x32xbf16>
    %c0_46 = arith.constant 0 : index
    %c0_47 = arith.constant 0 : index
    %170 = vector.load %arg6[%c0_46, %c0_47] : memref<32x2048xbf16, #tpu.memory_space<vmem>>, vector<32x2048xbf16>
    %cst_48 = arith.constant dense<0.000000e+00> : vector<16x2048xf32>
    %171 = tpu.matmul %169, %170, %cst_48 {dimension_numbers = #tpu.dot_dimension_numbers<[1], [0], [0], [1], [0, 0, 1, 1], [], []>} : vector<16x32xbf16>, vector<32x2048xbf16>, vector<16x2048xf32> -> vector<16x2048xf32>
    %c0_49 = arith.constant 0 : index
    %c0_50 = arith.constant 0 : index
    %172 = vector.load %arg7[%c0_49, %c0_50] : memref<1x2048xf32, #tpu.memory_space<vmem>>, vector<1x2048xf32>
    %173 = vector.broadcast %172 : vector<1x2048xf32> to vector<16x2048xf32>
    %174 = arith.addf %171, %173 : vector<16x2048xf32>
    %175 = vector.extract_strided_slice %174 {offsets = [0, 0], sizes = [16, 256], strides = [1, 1]} : vector<16x2048xf32> to vector<16x256xf32>
    %176 = vector.extract_strided_slice %174 {offsets = [0, 256], sizes = [16, 256], strides = [1, 1]} : vector<16x2048xf32> to vector<16x256xf32>
    %177 = vector.extract_strided_slice %174 {offsets = [0, 512], sizes = [16, 256], strides = [1, 1]} : vector<16x2048xf32> to vector<16x256xf32>
    %178 = vector.extract_strided_slice %174 {offsets = [0, 768], sizes = [16, 256], strides = [1, 1]} : vector<16x2048xf32> to vector<16x256xf32>
    %179 = vector.extract_strided_slice %174 {offsets = [0, 1024], sizes = [16, 256], strides = [1, 1]} : vector<16x2048xf32> to vector<16x256xf32>
    %180 = vector.extract_strided_slice %174 {offsets = [0, 1280], sizes = [16, 256], strides = [1, 1]} : vector<16x2048xf32> to vector<16x256xf32>
    %181 = vector.extract_strided_slice %174 {offsets = [0, 1536], sizes = [16, 256], strides = [1, 1]} : vector<16x2048xf32> to vector<16x256xf32>
    %182 = vector.extract_strided_slice %174 {offsets = [0, 1792], sizes = [16, 256], strides = [1, 1]} : vector<16x2048xf32> to vector<16x256xf32>
    %183 = arith.maximumf %175, %176 : vector<16x256xf32>
    %184 = arith.maximumf %183, %177 : vector<16x256xf32>
    %185 = arith.subf %175, %184 : vector<16x256xf32>
    %186 = math.exp %185 : vector<16x256xf32>
    %187 = arith.subf %176, %184 : vector<16x256xf32>
    %188 = math.exp %187 : vector<16x256xf32>
    %189 = arith.subf %177, %184 : vector<16x256xf32>
    %190 = math.exp %189 : vector<16x256xf32>
    %191 = arith.addf %186, %188 : vector<16x256xf32>
    %192 = arith.addf %191, %190 : vector<16x256xf32>
    %193 = tpu.reciprocal %192 {approx = true} : vector<16x256xf32> -> vector<16x256xf32>
    %cst_51 = arith.constant 1.600000e+01 : f32
    %194 = vector.broadcast %cst_51 : f32 to vector<16x256xf32>
    %195 = arith.mulf %194, %193 : vector<16x256xf32>
    %196 = arith.mulf %186, %195 : vector<16x256xf32>
    %197 = arith.mulf %188, %195 : vector<16x256xf32>
    %198 = arith.mulf %190, %195 : vector<16x256xf32>
    %cst_52 = arith.constant -8.000000e+00 : f32
    %199 = vector.broadcast %cst_52 : f32 to vector<16x256xf32>
    %200 = arith.addf %199, %196 : vector<16x256xf32>
    %201 = arith.addf %200, %197 : vector<16x256xf32>
    %cst_53 = arith.constant -8.000000e+00 : f32
    %202 = vector.broadcast %cst_53 : f32 to vector<16x256xf32>
    %203 = arith.cmpf oge, %3, %202 : vector<16x256xf32>
    %cst_54 = arith.constant 8.000000e+00 : f32
    %204 = vector.broadcast %cst_54 : f32 to vector<16x256xf32>
    %205 = arith.cmpf ole, %3, %204 : vector<16x256xf32>
    %206 = arith.andi %203, %205 : vector<16x256xi1>
    %cst_55 = arith.constant -8.000000e+00 : f32
    %cst_56 = arith.constant 8.000000e+00 : f32
    %207 = vector.broadcast %cst_55 : f32 to vector<16x256xf32>
    %208 = arith.maximumf %207, %3 : vector<16x256xf32>
    %209 = vector.broadcast %cst_56 : f32 to vector<16x256xf32>
    %210 = arith.minimumf %209, %208 : vector<16x256xf32>
    %211 = arith.cmpf olt, %210, %200 : vector<16x256xf32>
    %cst_57 = arith.constant dense<true> : vector<16x256xi1>
    %212 = arith.xori %211, %cst_57 : vector<16x256xi1>
    %213 = arith.cmpf olt, %210, %201 : vector<16x256xf32>
    %214 = arith.andi %212, %213 : vector<16x256xi1>
    %215 = arith.select %214, %197, %198 : vector<16x256xi1>, vector<16x256xf32>
    %216 = arith.select %211, %196, %215 : vector<16x256xi1>, vector<16x256xf32>
    %cst_58 = arith.constant 9.99999997E-7 : f32
    %217 = vector.broadcast %cst_58 : f32 to vector<16x256xf32>
    %218 = arith.maximumf %216, %217 : vector<16x256xf32>
    %219 = arith.select %214, %200, %201 : vector<16x256xi1>, vector<16x256xf32>
    %cst_59 = arith.constant -8.000000e+00 : f32
    %220 = vector.broadcast %cst_59 : f32 to vector<16x256xf32>
    %221 = arith.select %211, %220, %219 : vector<16x256xi1>, vector<16x256xf32>
    %222 = tpu.reciprocal %218 {approx = true} : vector<16x256xf32> -> vector<16x256xf32>
    %223 = arith.subf %210, %221 : vector<16x256xf32>
    %224 = arith.mulf %223, %222 : vector<16x256xf32>
    %cst_60 = arith.constant 0.000000e+00 : f32
    %cst_61 = arith.constant 1.000000e+00 : f32
    %225 = vector.broadcast %cst_60 : f32 to vector<16x256xf32>
    %226 = arith.maximumf %225, %224 : vector<16x256xf32>
    %227 = vector.broadcast %cst_61 : f32 to vector<16x256xf32>
    %228 = arith.minimumf %227, %226 : vector<16x256xf32>
    %cst_62 = arith.constant 1.000000e+00 : f32
    %229 = vector.broadcast %cst_62 : f32 to vector<16x256xf32>
    %230 = arith.subf %229, %228 : vector<16x256xf32>
    %231 = arith.mulf %228, %230 : vector<16x256xf32>
    %232 = arith.maximumf %178, %179 : vector<16x256xf32>
    %233 = arith.maximumf %232, %180 : vector<16x256xf32>
    %234 = arith.subf %178, %233 : vector<16x256xf32>
    %235 = math.exp %234 : vector<16x256xf32>
    %236 = arith.subf %179, %233 : vector<16x256xf32>
    %237 = math.exp %236 : vector<16x256xf32>
    %238 = arith.subf %180, %233 : vector<16x256xf32>
    %239 = math.exp %238 : vector<16x256xf32>
    %240 = arith.addf %235, %237 : vector<16x256xf32>
    %241 = arith.addf %240, %239 : vector<16x256xf32>
    %242 = tpu.reciprocal %241 {approx = true} : vector<16x256xf32> -> vector<16x256xf32>
    %cst_63 = arith.constant 1.600000e+01 : f32
    %243 = vector.broadcast %cst_63 : f32 to vector<16x256xf32>
    %244 = arith.mulf %243, %242 : vector<16x256xf32>
    %245 = arith.mulf %235, %244 : vector<16x256xf32>
    %246 = arith.mulf %237, %244 : vector<16x256xf32>
    %247 = arith.mulf %239, %244 : vector<16x256xf32>
    %cst_64 = arith.constant -8.000000e+00 : f32
    %248 = vector.broadcast %cst_64 : f32 to vector<16x256xf32>
    %249 = arith.addf %248, %245 : vector<16x256xf32>
    %250 = arith.addf %249, %246 : vector<16x256xf32>
    %251 = arith.select %214, %246, %247 : vector<16x256xi1>, vector<16x256xf32>
    %252 = arith.select %211, %245, %251 : vector<16x256xi1>, vector<16x256xf32>
    %cst_65 = arith.constant 9.99999997E-7 : f32
    %253 = vector.broadcast %cst_65 : f32 to vector<16x256xf32>
    %254 = arith.maximumf %252, %253 : vector<16x256xf32>
    %255 = arith.select %214, %249, %250 : vector<16x256xi1>, vector<16x256xf32>
    %cst_66 = arith.constant -8.000000e+00 : f32
    %256 = vector.broadcast %cst_66 : f32 to vector<16x256xf32>
    %257 = arith.select %211, %256, %255 : vector<16x256xi1>, vector<16x256xf32>
    %258 = arith.mulf %254, %222 : vector<16x256xf32>
    %cst_67 = arith.constant 0.000000e+00 : f32
    %259 = vector.broadcast %cst_67 : f32 to vector<16x256xf32>
    %260 = arith.maximumf %181, %259 : vector<16x256xf32>
    %261 = math.absf %181 : vector<16x256xf32>
    %cst_68 = arith.constant 0.000000e+00 : f32
    %262 = vector.broadcast %cst_68 : f32 to vector<16x256xf32>
    %263 = arith.subf %262, %261 : vector<16x256xf32>
    %264 = math.exp %263 : vector<16x256xf32>
    %265 = math.log1p %264 : vector<16x256xf32>
    %266 = arith.addf %260, %265 : vector<16x256xf32>
    %cst_69 = arith.constant 0.000000e+00 : f32
    %267 = vector.broadcast %cst_69 : f32 to vector<16x256xf32>
    %268 = arith.maximumf %182, %267 : vector<16x256xf32>
    %269 = math.absf %182 : vector<16x256xf32>
    %cst_70 = arith.constant 0.000000e+00 : f32
    %270 = vector.broadcast %cst_70 : f32 to vector<16x256xf32>
    %271 = arith.subf %270, %269 : vector<16x256xf32>
    %272 = math.exp %271 : vector<16x256xf32>
    %273 = math.log1p %272 : vector<16x256xf32>
    %274 = arith.addf %268, %273 : vector<16x256xf32>
    %275 = arith.select %214, %266, %274 : vector<16x256xi1>, vector<16x256xf32>
    %cst_71 = arith.constant 1.000000e+00 : f32
    %276 = vector.broadcast %cst_71 : f32 to vector<16x256xf32>
    %277 = arith.select %211, %276, %275 : vector<16x256xi1>, vector<16x256xf32>
    %cst_72 = arith.constant 1.000000e+00 : f32
    %278 = vector.broadcast %cst_72 : f32 to vector<16x256xf32>
    %279 = arith.select %214, %274, %278 : vector<16x256xi1>, vector<16x256xf32>
    %280 = arith.select %211, %266, %279 : vector<16x256xi1>, vector<16x256xf32>
    %281 = arith.mulf %258, %228 : vector<16x256xf32>
    %282 = arith.mulf %281, %228 : vector<16x256xf32>
    %283 = arith.mulf %277, %231 : vector<16x256xf32>
    %284 = arith.addf %282, %283 : vector<16x256xf32>
    %285 = arith.mulf %254, %284 : vector<16x256xf32>
    %286 = arith.addf %280, %277 : vector<16x256xf32>
    %cst_73 = arith.constant 2.000000e+00 : f32
    %287 = vector.broadcast %cst_73 : f32 to vector<16x256xf32>
    %288 = arith.mulf %287, %258 : vector<16x256xf32>
    %289 = arith.subf %286, %288 : vector<16x256xf32>
    %290 = arith.mulf %289, %231 : vector<16x256xf32>
    %291 = arith.addf %258, %290 : vector<16x256xf32>
    %292 = tpu.reciprocal %291 {approx = true} : vector<16x256xf32> -> vector<16x256xf32>
    %293 = arith.mulf %285, %292 : vector<16x256xf32>
    %294 = arith.addf %257, %293 : vector<16x256xf32>
    %295 = arith.mulf %258, %258 : vector<16x256xf32>
    %296 = arith.mulf %280, %228 : vector<16x256xf32>
    %297 = arith.mulf %296, %228 : vector<16x256xf32>
    %cst_74 = arith.constant 2.000000e+00 : f32
    %298 = vector.broadcast %cst_74 : f32 to vector<16x256xf32>
    %299 = arith.mulf %298, %258 : vector<16x256xf32>
    %300 = arith.mulf %299, %231 : vector<16x256xf32>
    %301 = arith.addf %297, %300 : vector<16x256xf32>
    %302 = arith.mulf %277, %230 : vector<16x256xf32>
    %303 = arith.mulf %302, %230 : vector<16x256xf32>
    %304 = arith.addf %301, %303 : vector<16x256xf32>
    %305 = arith.mulf %295, %304 : vector<16x256xf32>
    %306 = arith.mulf %292, %292 : vector<16x256xf32>
    %307 = arith.mulf %305, %306 : vector<16x256xf32>
    %cst_75 = arith.constant 9.99999996E-13 : f32
    %308 = vector.broadcast %cst_75 : f32 to vector<16x256xf32>
    %309 = arith.maximumf %307, %308 : vector<16x256xf32>
    %310 = math.log %309 : vector<16x256xf32>
    %311 = arith.select %206, %294, %3 : vector<16x256xi1>, vector<16x256xf32>
    %cst_76 = arith.constant 0.000000e+00 : f32
    %312 = vector.broadcast %cst_76 : f32 to vector<16x256xf32>
    %313 = arith.select %206, %310, %312 : vector<16x256xi1>, vector<16x256xf32>
    %314 = arith.addf %311, %158 : vector<16x256xf32>
    %c0_77 = arith.constant 0 : index
    %c0_78 = arith.constant 0 : index
    %315 = vector.load %arg8[%c0_77, %c0_78] : memref<16x256xf32, #tpu.memory_space<vmem>>, vector<16x256xf32>
    tpu.vector_store %arg8[%c0_77, %c0_78], %314 {strides = array<i32>} : memref<16x256xf32, #tpu.memory_space<vmem>>, vector<16x256xf32>,
    %c0_79 = arith.constant 0 : index
    %c0_80 = arith.constant 0 : index
    %316 = vector.load %arg2[%c0_79, %c0_80] : memref<16x256xf32, #tpu.memory_space<vmem>>, vector<16x256xf32>
    %317 = arith.addf %316, %160 : vector<16x256xf32>
    %318 = arith.addf %317, %313 : vector<16x256xf32>
    %c0_81 = arith.constant 0 : index
    %c0_82 = arith.constant 0 : index
    %319 = vector.load %arg9[%c0_81, %c0_82] : memref<16x256xf32, #tpu.memory_space<vmem>>, vector<16x256xf32>
    tpu.vector_store %arg9[%c0_81, %c0_82], %318 {strides = array<i32>} : memref<16x256xf32, #tpu.memory_space<vmem>>, vector<16x256xf32>,
    return
  }
  func.func @transform_0(%arg0: i32) -> (i32, i32) {
    %c0_i32 = arith.constant 0 : i32
    %c0_i32_0 = arith.constant 0 : i32
    return %arg0, %c0_i32 : i32, i32
  }
  func.func @transform_1(%arg0: i32) -> (i32, i32) {
    %c0_i32 = arith.constant 0 : i32
    %c0_i32_0 = arith.constant 0 : i32
    return %arg0, %c0_i32 : i32, i32
  }
  func.func @transform_2(%arg0: i32) -> (i32, i32) {
    %c0_i32 = arith.constant 0 : i32
    %c0_i32_0 = arith.constant 0 : i32
    %c0_i32_1 = arith.constant 0 : i32
    return %c0_i32, %c0_i32_0 : i32, i32
  }
  func.func @transform_3(%arg0: i32) -> (i32, i32) {
    %c0_i32 = arith.constant 0 : i32
    %c0_i32_0 = arith.constant 0 : i32
    %c0_i32_1 = arith.constant 0 : i32
    return %c0_i32, %c0_i32_0 : i32, i32
  }
  func.func @transform_4(%arg0: i32) -> (i32, i32) {
    %c0_i32 = arith.constant 0 : i32
    %c0_i32_0 = arith.constant 0 : i32
    %c0_i32_1 = arith.constant 0 : i32
    return %c0_i32, %c0_i32_0 : i32, i32
  }
  func.func @transform_5(%arg0: i32) -> (i32, i32) {
    %c0_i32 = arith.constant 0 : i32
    %c0_i32_0 = arith.constant 0 : i32
    %c0_i32_1 = arith.constant 0 : i32
    return %c0_i32, %c0_i32_0 : i32, i32
  }
  func.func @transform_6(%arg0: i32) -> (i32, i32) {
    %c0_i32 = arith.constant 0 : i32
    %c0_i32_0 = arith.constant 0 : i32
    %c0_i32_1 = arith.constant 0 : i32
    return %c0_i32, %c0_i32_0 : i32, i32
  }
  func.func @transform_7(%arg0: i32) -> (i32, i32) {
    %c0_i32 = arith.constant 0 : i32
    %c0_i32_0 = arith.constant 0 : i32
    return %arg0, %c0_i32 : i32, i32
  }
  func.func @transform_8(%arg0: i32) -> (i32, i32) {
    %c0_i32 = arith.constant 0 : i32
    %c0_i32_0 = arith.constant 0 : i32
    return %arg0, %c0_i32 : i32, i32
  }
}

</mosaic_0001>

<bundles_post_ra>
// kernel: tpu_custom_call.1
= control target key start
LH: loop header
LB: loop body
LE: loop exit
PB: predicated region body
PF: predicated region fallthrough
CT: control target
= control target key end

     0   :  { %6 = vsyncpa [#allocation3], 0  ;;  %s482_s0 = inlined_call_operand.hbm [shape: f32[8,128], index: 0, kind: input, shape index: {}]   ;;  %s483_s1 = inlined_call_operand.hbm [shape: f32[16,128], index: 1, kind: output, shape index: {}]  }
   0x1   :  { %7 = vsyncpa [#allocation4], 0 }
   0x2   :  { %9 = vsyncpa [#allocation4 + $0x1], 0  ;;  %s352_s6 = smov 0   ;;  %s354_s7 = smov 0  }
   0x3   :  { %s356_s8 = smov 0   ;;  %s358_s9 = smov 0  }
   0x4 LB: > { %s373_s10 = sadd.s32 4294967295, %s338_s9   ;;  %s184_s11 = sadd.s32 4294967294, %s338_s9   ;;  %s338_s9 = sphi %s358_s9, %s499_s9   ;;  %s334_s8 = sphi %s356_s8, %s498_s8   ;;  %s330_s7 = sphi %s354_s7, %s497_s7   ;;  %s326_s6 = sphi %s352_s6, %s496_s6  }
   0x5   : > { %s377_s12 = sadd.s32 1, %s338_s9   ;;  %s43_s13 = sadd.s32 1, %s334_s8 }
   0x6   : > { %s40_s14 = ssub.s32 %s338_s9, %s377_s12  ;;  %p53_p0 = scmp.ne.s32.totalorder %s334_s8, %s330_s7 }
   0x7   : > { %p41_p1 = scmp.eq.s32.totalorder %s40_s14, 0  ;;  %p54_p2 = scmp.eq.s32.totalorder %s373_s10, 1 }
   0x8   : > { %p59_p3 = scmp.ne.s32.totalorder %s330_s7, %s326_s6  ;;  %p60_p4 = scmp.eq.s32.totalorder %s184_s11, 1 }
   0x9   : > { %s388_s15 = scalar_select %p41_p1, %s334_s8, %s43_s13  }
   0xa   : > { %p390_p5 = por %p54_p2, %p53_p0  ;;  %p394_p6 = por %p60_p4, %p59_p3 }
   0xb   : > { %p185_p7 = scmp.ge.s32.totalorder %s338_s9, 1  ;;  %p67_p8 = scmp.lt.s32.totalorder %s338_s9, 3 }
   0xc   : > { %s487_s16 = scalar_select %p390_p5, 1, 0 }
   0xd   : > { %s488_s17 = scalar_select %p394_p6, 1, 0 }
   0xe   : > { %p484_p9 = scmp.eq.s32.totalorder %s373_s10, 0  ;;  %p401_p10 = pnand %p185_p7, %p67_p8 }
   0xf   : > { %s340_s19 = smov [#allocation2]   ;;  %s244_s24 = scalar_lea.hbm %s482_s0, 128 }
  0x10   : > { %s489_s18 = scalar_select %p401_p10, 1, 0 }
  0x11   : > { %s80_s20 = sshll.u32 %s340_s19, 4  ;;  %p200_p11 = pneg %p401_p10  ;;  %s81_s20 = int_to_ptr.vmem [resolvable:$true] %s80_s20 }
  0x12   : > { %p245_p13 = scmp.ne.s32.totalorder %s482_s0, %s244_s24  ;;  %p251_p3 = scmp.lt.u32.totalorder %s244_s24, %s482_s0 }
  0x13   : > { %p409_p12 = pnand %p484_p9, %p200_p11 }
  0x15   : > { %p246_p0 = pneg %p409_p12 }
  0x17   : > { %p247_p1 = pnand %p246_p0, %p245_p13 }
  0x19   : > { %p248_p2 = pneg %p247_p1 }
  0x1b   : > { %p253_p4 = pnand %p251_p3, %p248_p2 }
  0x1d   : > { %256 = shalt.err (!%p253_p4)
}
  0x1e   : > { %s257_s29 = scalar_lea.vmem %s81_s20, 128  ;;  %p265_p9 = scmp.lt.s32.totalorder %s81_s20, %s81_s20 }
  0x1f   : > { %p258_p7 = scmp.ne.s32.totalorder %s81_s20, %s257_s29  ;;  %p266_p6 = scmp.lt.s32.totalorder %s257_s29, %s257_s29 }
  0x21   : > { %p260_p8 = pnand %p258_p7, %p246_p0  ;;  %p267_p5 = por %p266_p6, %p265_p9 }
  0x23   : > { %p261_p11 = pneg %p260_p8 }
  0x25   : > { %p268_p10 = pnand %p267_p5, %p261_p11 }
  0x27   : > { %271 = shalt.err (!%p268_p10)
}
  0x28   : > { %203 = dma.hbm_to_vmem [thread:$0]  (!%p409_p12), %s482_s0, 128, %s81_s20, [#allocation3]  }
  0x29   : > { %p491_p13 = scmp.ne.s32.totalorder %s489_s18, 0 }
  0x2a   : > { %p492_p1 = scmp.eq.s32.totalorder (!%p491_p13), %s373_s10, 0 }
  0x2b   : > { %93 = sbr.rel (%p491_p13) target bundleno = 77 (0x4d), region = 24 }
  0x32   : > { %317 = dma.done.wait (%p492_p1), [#allocation3], 128   ;;  %p493_p0 = pmov %p492_p1 }
  0x33   : > { %s105_s3 = sand.u32 1, %s330_s7   ;;  %s191_s13 = sshll.u32 %s373_s10, 7  ;;  %v108_v0 = vld [vmem:[#allocation2] sm:$0xff] }
  0x34   : > { %319 = vsyncadd (%p493_p0), [#allocation3], 4294967168  ;;  %s189_s4 = sshll.u32 %s105_s3, 3  ;;  %v109_v1 = vadd.f32 1.0, %v108_v0  ;;  %s442_s19 = scalar_lea.hbm %s483_s1, %s191_s13 }
  0x35   : > { %s107_s5 = scalar_lea.vmem [#allocation5], %s189_s4  ;;  %s112_s20 = scalar_lea.sflag [#allocation4], %s105_s3 }
  0x36   : > { %s125_s11 = sshll.u32 %s107_s5, 4  ;;  %110 = vst [vmem:[%s107_s5] sm:$0xff] %v109_v1  ;;  %p494_p6 = scmp.ne.s32.totalorder %s487_s16, 0  ;;  %s437_s11 = int_to_ptr.vmem [resolvable:$true] %s125_s11 }
  0x37   : > { %s272_s21 = scalar_lea.vmem %s437_s11, 128  ;;  %s341_s10 = smov [#allocation5]  }
  0x38   : > { %p273_p5 = scmp.ne.s32.totalorder %s437_s11, %s272_s21  ;;  %s276_s22 = sshll.u32 %s341_s10, 4  ;;  %s277_s22 = int_to_ptr.vmem [resolvable:$false] %s276_s22 }
  0x39   : > { %s278_s23 = scalar_lea.vmem %s277_s22, 256  ;;  %p279_p12 = scmp.lt.s32.totalorder %s437_s11, %s277_s22 }
  0x3a   : > { %p274_p9 = pnand %p273_p5, %p494_p6  ;;  %p280_p2 = scmp.lt.s32.totalorder %s278_s23, %s272_s21 }
  0x3c   : > { %p275_p10 = pneg %p274_p9  ;;  %p281_p3 = por %p280_p2, %p279_p12 }
  0x3e   : > { %p282_p4 = pnand %p281_p3, %p275_p10 }
  0x40   : > { %285 = shalt.err (!%p282_p4)
}
  0x41   : > { %s286_s24 = scalar_lea.hbm %s442_s19, 128  ;;  %s290_s27 = scalar_lea.hbm %s483_s1, 256 }
  0x42   : > { %p287_p7 = scmp.ne.s32.totalorder %s442_s19, %s286_s24  ;;  %p291_p13 = scmp.lt.u32.totalorder %s442_s19, %s483_s1 }
  0x43   : > { %p292_p1 = scmp.lt.u32.totalorder %s290_s27, %s286_s24  ;;  %p294_p5 = scmp.lt.u32.totalorder %s286_s24, %s442_s19 }
  0x44   : > { %p288_p8 = pnand %p287_p7, %p494_p6 }
  0x45   : > { %p293_p0 = por %p292_p1, %p291_p13 }
  0x46   : > { %p289_p11 = pneg %p288_p8 }
  0x47   : > { %p295_p9 = por %p294_p5, %p293_p0 }
  0x49   : > { %p296_p10 = pnand %p295_p9, %p289_p11 }
  0x4b   : > { %299 = shalt.err (!%p296_p10)
}
  0x4c   : > { %198 = dma.vmem_to_hbm [thread:$0]  (%p494_p6), %s437_s11, 128, %s442_s19, %s112_s20  }
  0x4d PF: > { %p210_p12 = scmp.ge.s32.totalorder %s338_s9, 2  ;;  %s137_s30 = sand.u32 1, %s326_s6  }
  0x4e   : > { %p495_p2 = scmp.ne.s32.totalorder %s488_s17, 0  ;;  %s138_s2 = scalar_lea.sflag [#allocation4], %s137_s30 }
  0x50   : > { %p205_p3 = pnand %p210_p12, %p495_p2 }
  0x52   : > { %321 = dma.done.wait (!%p205_p3), %s138_s2, 128  }
  0x53   : > { %323 = vsyncadd (!%p205_p3), %s138_s2, 4294967168  ;;  %p12_p4 = scmp.ge.s32.totalorder %s377_s12, 4   ;;  %s496_s6 = smov %s330_s7 }
  0x54   : > { %s497_s7 = smov %s334_s8  ;;  %s498_s8 = smov %s388_s15 }
  0x55   : > { %s499_s9 = smov %s377_s12  ;;  %14 = sbr.rel (!%p12_p4) target bundleno = 4 (0x4), region = 61 }
  0x5c   :  { %143 = vsyncpa [#allocation3], 1 }
  0x5d   :  { %145 = vsyncpa [#allocation3 + $0x1], 1 }
  0x5e   :  { %146 = vsyncpa [#allocation4], 1 }
  0x5f   :  { %148 = vsyncpa [#allocation4 + $0x1], 1 }

// kernel: coupling_layer_forward.1
= control target key start
LH: loop header
LB: loop body
LE: loop exit
PB: predicated region body
PF: predicated region fallthrough
CT: control target
= control target key end

     0   :  { %14 = vsyncpa [#allocation3], 0  ;;  %v37_v5 = vlaneseq  ;;  %s4956_s0 = inlined_call_operand.vmem [shape: f32[16,256], index: 0, kind: input, shape index: {}]   ;;  %s4957_s1 = inlined_call_operand.vmem [shape: f32[16,256], index: 1, kind: input, shape index: {}]   ;;  %s4958_s2 = inlined_call_operand.vmem [shape: f32[1,256], index: 2, kind: input, shape index: {}]   ;;  %s4959_s3 = inlined_call_operand.vmem [shape: bf16[256,32], index: 3, kind: input, shape index: {}]   ;;  %s4960_s4 = inlined_call_operand.vmem [shape: f32[1,32], index: 4, kind: input, shape index: {}]   ;;  %s4961_s5 = inlined_call_operand.vmem [shape: bf16[32,2048], index: 5, kind: input, shape index: {}]   ;;  %s4962_s6 = inlined_call_operand.vmem [shape: f32[1,2048], index: 6, kind: input, shape index: {}]   ;;  %s4963_s7 = inlined_call_operand.hbm [shape: f32[16,256], index: 7, kind: output, shape index: {0}]   ;;  %s4964_s8 = inlined_call_operand.hbm [shape: f32[16,256], index: 8, kind: output, shape index: {1}]  }
   0x1   :  { %v2843_v0 = vld [vmem:[%s4959_s3 + $0x40] sm:$0xff]   ;;  %v2854_v2 = vld [vmem:[%s4959_s3 + $0x48] sm:$0xff]   ;;  %v2866_v4 = vld [vmem:[%s4959_s3 + $0x50] sm:$0xff]  }
   0x2   :  { %v2848_v1 = vld [vmem:[%s4959_s3] sm:$0xff]   ;;  %2434 = vmatprep.subr.bf16.mxu0 %v2843_v0  ;;  %v2860_v3 = vld [vmem:[%s4959_s3 + $0x8] sm:$0xff]   ;;  %v2872_v6 = vld [vmem:[%s4959_s3 + $0x10] sm:$0xff]   ;;  %v2880_v8 = vshrl.u32 %v37_v5, 7 }
   0x3   :  { %2435 = vmatpush3.bf16.msra.mxu0 %v2848_v1  ;;  %v2878_v7 = vld [vmem:[%s4959_s3 + $0x58] sm:$0xff]   ;;  %v2892_v10 = vld [vmem:[%s4959_s3 + $0x60] sm:$0xff]   ;;  %v2906_v13 = vld [vmem:[%s4959_s3 + $0x68] sm:$0xff]  }
   0x4   :  { %2436 = vmatprep.subr.bf16.mxu0 %v2854_v2  ;;  %v2886_v9 = vld [vmem:[%s4959_s3 + $0x18] sm:$0xff]   ;;  %v2895_v11 = vsub.s32 1, %v2880_v8  ;;  %v2900_v12 = vld [vmem:[%s4959_s3 + $0x20] sm:$0xff]   ;;  %v2912_v14 = vld [vmem:[%s4956_s0 + $0x8] sm:$0xff] }
   0x5   :  { %v2917_v15 = vld [vmem:[%s4956_s0 + $0x18] sm:$0xff]  ;;  %v2922_v16 = vld [vmem:[%s4958_s2] sm:$0x3] }
   0x6   :  { %v44_v17 = vrot.slane %v2922_v16, %v2895_v11 }
   0x7   :  { %2437 = vmatpush3.bf16.msra.mxu0 %v2860_v3 }
   0x8   :  { %2438 = vmatprep.subr.bf16.mxu0 %v2866_v4 }
   0xb   :  { %2439 = vmatpush3.bf16.msra.mxu0 %v2872_v6 }
   0xc   :  { %2440 = vmatprep.subr.bf16.mxu0 %v2878_v7 }
   0xf   :  { %2441 = vmatpush3.bf16.msra.mxu0 %v2886_v9 }
  0x10   :  { %2442 = vmatprep.subr.bf16.mxu0 %v2892_v10 }
  0x11   :  { %15 = vsyncpa [#allocation5], 0  ;;  %v2927_v18 = vsub.s32 0, %v2880_v8  ;;  %v2933_v19 = vld [vmem:[%s4959_s3 + $0x28] sm:$0xff]   ;;  %v2936_v20 = vmul.f32 %v44_v17, %v2912_v14  ;;  %v2939_v21 = vmul.f32 %v44_v17, %v2917_v15  ;;  %v2945_v22 = vld [vmem:[%s4959_s3 + $0x70] sm:$0xff]   ;;  %v4965_v55 = vmov 0  }
  0x12   :  { %v2955_v25 = vld [vmem:[%s4959_s3 + $0x30] sm:$0xff]   ;;  %v2960_v26 = vld [vmem:[%s4956_s0] sm:$0xff]  ;;  %v2971_v28 = vld [vmem:[%s4959_s3 + $0x78] sm:$0xff]   ;;  %560 = vmatprep.mubr.bf16.mxu1 %v4965_v55  ;;  %vm524_vm0 = vcmask 261120   ;;  %vm2790_vm4 = vmmov 1  }
  0x13   :  { %2443 = vmatpush3.bf16.msra.mxu0 %v2900_v12  ;;  %5070 = vst [vmem:[#allocation8_spill] sm:$0xff] %v2936_v20  ;;  %5071 = vst [vmem:[#allocation9_spill] sm:$0xff] %v2939_v21  ;;  %v68_v23 = vpack.c.bf16 %v2939_v21, %v2936_v20  ;;  %v40_v24 = vrot.slane %v2922_v16, %v2927_v18  ;;  %v2965_v27 = vld [vmem:[%s4956_s0 + $0x10] sm:$0xff]  ;;  %v2983_v31 = vld [vmem:[%s4959_s3 + $0x38] sm:$0xff]   ;;  %s2791_s0 = smov [#allocation2]  }
  0x14   :  { %2444 = vmatprep.subr.bf16.mxu0 %v2906_v13  ;;  %v248_v33 = vld [vmem:[%s4961_s5] sm:$0xff]  ;;  %v249_v49 = vld [vmem:[%s4961_s5 + $0x8] sm:$0xff]  ;;  %v254_v51 = vld [vmem:[%s4961_s5 + $0x30] sm:$0xff]  ;;  %s2334_s24 = sshll.u32 %s2791_s0, 4  ;;  %s2335_s24 = int_to_ptr.vmem [resolvable:$true] %s2334_s24 }
  0x15   :  { %236 = vmatprep.mubr.bf16.mxu0 %v68_v23  ;;  %v2974_v29 = vmul.f32 %v40_v24, %v2960_v26  ;;  %v2977_v30 = vmul.f32 %v40_v24, %v2965_v27  ;;  %v256_v34 = vld [vmem:[%s4961_s5 + $0x40] sm:$0xff]  ;;  %v257_v50 = vld [vmem:[%s4961_s5 + $0x48] sm:$0xff]  ;;  %v262_v54 = vld [vmem:[%s4961_s5 + $0x70] sm:$0xff]  ;;  %s2741_s25 = scalar_lea.vmem %s2335_s24, 512  ;;  %p2746_p1 = scmp.lt.s32.totalorder %s2335_s24, %s2335_s24 }
  0x16   :  { %v252_v35 = vld [vmem:[%s4961_s5 + $0x20] sm:$0xff]  ;;  %v2998_v36 = vcombine.high %v248_v33, %v256_v34  ;;  %v3003_v38 = vcombine.low %v248_v33, %v256_v34  ;;  %v3046_v52 = vcombine.low %v249_v49, %v257_v50  ;;  %v3048_v53 = vcombine.high %v249_v49, %v257_v50  ;;  %v265_v24 = vld [vmem:[%s4961_s5 + $0x88] sm:$0xff]  ;;  %v270_v33 = vld [vmem:[%s4961_s5 + $0xb0] sm:$0xff]  ;;  %p2742_p0 = scmp.ne.s32.totalorder %s2335_s24, %s2741_s25  ;;  %p2747_p2 = scmp.lt.s32.totalorder %s2741_s25, %s2741_s25 }
  0x17   :  { %2445 = vmatpush3.bf16.msra.mxu0 %v2933_v19  ;;  %5072 = vst [vmem:[#allocation10_spill] sm:$0xff] %v2974_v29  ;;  %5073 = vst [vmem:[#allocation11_spill] sm:$0xff] %v2977_v30  ;;  %v67_v32 = vpack.c.bf16 %v2977_v30, %v2974_v29  ;;  %v260_v37 = vld [vmem:[%s4961_s5 + $0x60] sm:$0xff]  ;;  %v3055_v56 = vcombine.low %v254_v51, %v262_v54  ;;  %v3057_v57 = vcombine.high %v254_v51, %v262_v54  ;;  %v278_v34 = vld [vmem:[%s4961_s5 + $0xf0] sm:$0xff] }
  0x18   :  { %2446 = vmatprep.subr.bf16.mxu0 %v2945_v22  ;;  %v3005_v39 = vcombine.low %v252_v35, %v260_v37  ;;  %v3007_v40 = vcombine.high %v252_v35, %v260_v37  ;;  %528 = vmatprep.subr.bf16.mxu1 %v2998_v36  ;;  %v264_v41 = vld [vmem:[%s4961_s5 + $0x80] sm:$0xff]  ;;  %5077 = vst [vmem:[#allocation15_spill] sm:$0xff] %v3046_v52  ;;  %v258_v49 = vld [vmem:[%s4961_s5 + $0x50] sm:$0xff]  ;;  %p2748_p3 = por %p2747_p2, %p2746_p1 }
  0x19   :  { %529 = vmatpush1.bf16.msra.mxu1 %v3003_v38  ;;  %v272_v42 = vld [vmem:[%s4961_s5 + $0xc0] sm:$0xff]  ;;  %5078 = vst [vmem:[#allocation16_spill] sm:$0xff] %v3055_v56  ;;  %5079 = vst [vmem:[#allocation17_spill] sm:$0xff] %v3057_v57  ;;  %v3096_v51 = vcombine.low %v270_v33, %v278_v34 }
  0x1a   :  { %5074 = vst [vmem:[#allocation12_spill] sm:$0xff] %v3005_v39  ;;  %v268_v43 = vld [vmem:[%s4961_s5 + $0xa0] sm:$0xff]  ;;  %v3022_v44 = vcombine.high %v264_v41, %v272_v42  ;;  %v3027_v46 = vcombine.low %v264_v41, %v272_v42  ;;  %p2749_p4 = pnand %p2748_p3, %p2742_p0 }
  0x1b   :  { %2447 = vmatpush3.bf16.msra.mxu0 %v2955_v25  ;;  %v276_v45 = vld [vmem:[%s4961_s5 + $0xe0] sm:$0xff]  ;;  %5083 = vst [vmem:[#allocation21_spill] sm:$0xff] %v3096_v51 }
  0x1c   :  { %2448 = vmatprep.subr.bf16.mxu0 %v2971_v28  ;;  %v3029_v47 = vcombine.low %v268_v43, %v276_v45  ;;  %v3031_v48 = vcombine.high %v268_v43, %v276_v45  ;;  %530 = vmatprep.subr.bf16.mxu1 %v3022_v44  ;;  %v2361_v59 = vld [vmem:[%s4960_s4] ss:$0 sm:$0xff]  ;;  %v3080_v43 = vcombine.high %v270_v33, %v278_v34  ;;  %v250_v45 = vld [vmem:[%s4961_s5 + $0x10] sm:$0xff]  ;;  %v261_v33 = vld [vmem:[%s4961_s5 + $0x68] sm:$0xff] }
  0x1d   :  { %531 = vmatpush1.bf16.msra.mxu1 %v3027_v46  ;;  %v3100_v54 = vcombine.high %v250_v45, %v258_v49  ;;  %v269_v34 = vld [vmem:[%s4961_s5 + $0xa8] sm:$0xff] }
  0x1e   :  { %5075 = vst [vmem:[#allocation13_spill] sm:$0xff] %v3029_v47  ;;  %5076 = vst [vmem:[#allocation14_spill] sm:$0xff] %v3031_v48  ;;  %571 = vmatprep.subr.bf16.mxu1 %v3048_v53 }
  0x1f   :  { %2449 = vmatpush3.bf16.msra.mxu0 %v2983_v31  ;;  %5081 = vst [vmem:[#allocation19_spill] sm:$0xff] %v3080_v43  ;;  %5084 = vst [vmem:[#allocation22_spill] sm:$0xff] %v3100_v54 }
  0x20   :  { %700 = vmatprep.subr.bf16.mxu0 %v3007_v40 }
  0x22   :  { %237 = vmatmul.mubr.bf16.vlgmr.msra.gmra.mrb[0].mxu0 %v67_v32  ;;  %v273_v32 = vld [vmem:[%s4961_s5 + $0xc8] sm:$0xff] }
  0x23   :  { %701 = vmatpush1.bf16.msra.mxu0 %v3005_v39  ;;  %732 = vmatprep.mubr.bf16.mxu0 %v4965_v55  ;;  %v3078_v42 = vcombine.high %v265_v24, %v273_v32  ;;  %v3094_v50 = vcombine.low %v265_v24, %v273_v32 }
  0x24   :  { %702 = vmatprep.subr.bf16.mxu0 %v3031_v48 }
  0x25   :  { %5080 = vst [vmem:[#allocation18_spill] sm:$0xff] %v3078_v42  ;;  %5082 = vst [vmem:[#allocation20_spill] sm:$0xff] %v3094_v50 }
  0x27   :  { %703 = vmatpush1.bf16.msra.mxu0 %v3029_v47 }
  0x28   :  { %786 = vmatprep.subr.bf16.mxu0 %v3057_v57 }
  0xf5   :  { %v2450_v58 = vpop.f32.mrb[0].mxu0 }
  0xf6   :  { %v2451_v60 = vpop.f32.mrb[1].mxu0 }
  0xf7   :  { %v2452_v61 = vadd.f32 %v2451_v60, %v2450_v58  ;;  %v2453_v62 = vpop.f32.mrb[2].mxu0  ;;  %v266_v58 = vld [vmem:[%s4961_s5 + $0x90] sm:$0xff]  ;;  %v3112_v60 = vcombine.low %v250_v45, %v258_v49  ;;  %v263_v45 = vld [vmem:[%s4961_s5 + $0x78] sm:$0xff] }
  0xf8   :  { %v2454_v63 = vpop.f32.mrb[3].mxu0  ;;  %v271_v49 = vld [vmem:[%s4961_s5 + $0xb8] sm:$0xff] }
  0xf9   :  { %v239_v5 = vadd.f32 %v2452_v61, %v2361_v59  ;;  %v2455_v17 = vadd.f32 %v2454_v63, %v2453_v62  ;;  %5085 = vst [vmem:[#allocation23_spill] sm:$0xff] %v3112_v60  ;;  %v251_v62 = vld [vmem:[%s4961_s5 + $0x18] sm:$0xff] }
  0xfa   :  { %v259_v63 = vld [vmem:[%s4961_s5 + $0x58] sm:$0xff] }
  0xfb   :  { %v242_v23 = vadd.f32 %v2455_v17, %v2361_v59  ;;  %v245_v35 = vmax.f32 %v239_v5, 0.0  ;;  %v274_v59 = vld [vmem:[%s4961_s5 + $0xd0] sm:$0xff]  ;;  %v267_v17 = vld [vmem:[%s4961_s5 + $0x98] sm:$0xff]  ;;  %v3144_v24 = vcombine.low %v251_v62, %v259_v63 }
  0xfc   :  { %v3115_v61 = vcombine.high %v266_v58, %v274_v59  ;;  %v3129_v5 = vcombine.low %v266_v58, %v274_v59 }
  0xfd   :  { %v246_v37 = vmax.f32 %v242_v23, 0.0  ;;  %v275_v23 = vld [vmem:[%s4961_s5 + $0xd8] sm:$0xff]  ;;  %5089 = vst [vmem:[#allocation27_spill] sm:$0xff] %v3144_v24 }
  0xfe   :  { %5086 = vst [vmem:[#allocation24_spill] sm:$0xff] %v3115_v61  ;;  %5087 = vst [vmem:[#allocation25_spill] sm:$0xff] %v3129_v5  ;;  %v3147_v32 = vcombine.high %v267_v17, %v275_v23 }
  0xff   :  { %v3076_v41 = vpack.c.bf16 %v246_v37, %v245_v35 }
 0x100   :  { %5090 = vst [vmem:[#allocation28_spill] sm:$0xff] %v3147_v32 }
 0x101   :  { %2410 = vmatmul.mubr.msk.bf16.vlgmr.msra.gmra.mrb[0].mxu1 %vm524_vm0, %v3076_v41  ;;  %2414 = vmatmul.mubr.msk.bf16.vlgmr.msra.gmra.mrb[4].mxu0 %vm524_vm0, %v3076_v41 }
 0x102   :  { %572 = vmatpush1.bf16.msra.mxu1 %v3046_v52  ;;  %787 = vmatpush1.bf16.msra.mxu0 %v3055_v56 }
 0x103   :  { %573 = vmatprep.subr.bf16.mxu1 %v3078_v42  ;;  %788 = vmatprep.subr.bf16.mxu0 %v3080_v43 }
 0x104   :  { %603 = vmatprep.mubr.bf16.mxu1 %v4965_v55  ;;  %818 = vmatprep.mubr.bf16.mxu0 %v4965_v55 }
 0x106   :  { %574 = vmatpush1.bf16.msra.mxu1 %v3094_v50  ;;  %789 = vmatpush1.bf16.msra.mxu0 %v3096_v51 }
 0x107   :  { %614 = vmatprep.subr.bf16.mxu1 %v3100_v54  ;;  %2456 = vmatprep.subr.bf16.mxu0 %v2843_v0  ;;  %v3133_v0 = vcombine.high %v251_v62, %v259_v63  ;;  %v3253_v62 = vld [vmem:[%s4962_s6 + $0x8] sm:$0xff] }
 0x109   :  { %2411 = vmatmul.mubr.msk.bf16.vlgmr.msra.gmra.mrb[4].mxu1 %vm524_vm0, %v3076_v41  ;;  %2416 = vmatmul.mubr.msk.bf16.vlgmr.msra.gmra.mrb[8].mxu0 %vm524_vm0, %v3076_v41  ;;  %5088 = vst [vmem:[#allocation26_spill] sm:$0xff] %v3133_v0 }
 0x10a   :  { %615 = vmatpush1.bf16.msra.mxu1 %v3112_v60  ;;  %646 = vmatprep.mubr.bf16.mxu1 %v4965_v55 }
 0x10b   :  { %616 = vmatprep.subr.bf16.mxu1 %v3115_v61  ;;  %2457 = vmatpush3.bf16.msra.mxu0 %v2848_v1  ;;  %v253_v1 = vld [vmem:[%s4961_s5 + $0x28] sm:$0xff] }
 0x10c   :  { %2458 = vmatprep.subr.bf16.mxu0 %v2854_v2  ;;  %v3160_v2 = vcombine.low %v267_v17, %v275_v23  ;;  %v3175_v35 = vcombine.low %v253_v1, %v261_v33 }
 0x10e   :  { %617 = vmatpush1.bf16.msra.mxu1 %v3129_v5  ;;  %5091 = vst [vmem:[#allocation29_spill] sm:$0xff] %v3160_v2  ;;  %5093 = vst [vmem:[#allocation31_spill] sm:$0xff] %v3175_v35 }
 0x10f   :  { %657 = vmatprep.subr.bf16.mxu1 %v3133_v0  ;;  %2459 = vmatpush3.bf16.msra.mxu0 %v2860_v3  ;;  %v3164_v3 = vcombine.high %v253_v1, %v261_v33 }
 0x110   :  { %2460 = vmatprep.subr.bf16.mxu0 %v2866_v4  ;;  %v277_v4 = vld [vmem:[%s4961_s5 + $0xe8] sm:$0xff] }
 0x111   :  { %2412 = vmatmul.mubr.msk.bf16.vlgmr.msra.gmra.mrb[8].mxu1 %vm524_vm0, %v3076_v41  ;;  %5092 = vst [vmem:[#allocation30_spill] sm:$0xff] %v3164_v3  ;;  %v3178_v37 = vcombine.high %v269_v34, %v277_v4 }
 0x112   :  { %658 = vmatpush1.bf16.msra.mxu1 %v3144_v24  ;;  %689 = vmatprep.mubr.bf16.mxu1 %v4965_v55  ;;  %v314_v24 = vsub.s32 7, %v2880_v8 }
 0x113   :  { %659 = vmatprep.subr.bf16.mxu1 %v3147_v32  ;;  %2461 = vmatpush3.bf16.msra.mxu0 %v2872_v6  ;;  %5094 = vst [vmem:[#allocation32_spill] sm:$0xff] %v3178_v37  ;;  %v255_v6 = vld [vmem:[%s4961_s5 + $0x38] sm:$0xff] }
 0x114   :  { %2462 = vmatprep.subr.bf16.mxu0 %v2878_v7  ;;  %v3191_v7 = vcombine.low %v269_v34, %v277_v4  ;;  %v3206_v58 = vcombine.low %v255_v6, %v263_v45 }
 0x116   :  { %660 = vmatpush1.bf16.msra.mxu1 %v3160_v2  ;;  %5095 = vst [vmem:[#allocation33_spill] sm:$0xff] %v3191_v7  ;;  %5097 = vst [vmem:[#allocation35_spill] sm:$0xff] %v3206_v58  ;;  %v310_v2 = vsub.s32 6, %v2880_v8 }
 0x117   :  { %743 = vmatprep.subr.bf16.mxu1 %v3164_v3  ;;  %2463 = vmatpush3.bf16.msra.mxu0 %v2886_v9  ;;  %v3195_v9 = vcombine.high %v255_v6, %v263_v45  ;;  %v51_v45 = vadd.f32 1.0, %v2922_v16 }
 0x118   :  { %2464 = vmatprep.subr.bf16.mxu0 %v2892_v10  ;;  %v279_v10 = vld [vmem:[%s4961_s5 + $0xf8] sm:$0xff] }
 0x119   :  { %2413 = vmatmul.mubr.msk.bf16.vlgmr.msra.gmra.mrb[12].mxu1 %vm524_vm0, %v3076_v41  ;;  %5096 = vst [vmem:[#allocation34_spill] sm:$0xff] %v3195_v9  ;;  %v3209_v59 = vcombine.high %v271_v49, %v279_v10 }
 0x11a   :  { %744 = vmatpush1.bf16.msra.mxu1 %v3175_v35  ;;  %775 = vmatprep.mubr.bf16.mxu1 %v4965_v55 }
 0x11b   :  { %745 = vmatprep.subr.bf16.mxu1 %v3178_v37  ;;  %2465 = vmatpush3.bf16.msra.mxu0 %v2900_v12  ;;  %5098 = vst [vmem:[#allocation36_spill] sm:$0xff] %v3209_v59  ;;  %v3216_v12 = vcombine.low %v271_v49, %v279_v10 }
 0x11c   :  { %2466 = vmatprep.subr.bf16.mxu0 %v2906_v13 }
 0x11d   :  { %5099 = vst [vmem:[#allocation37_spill] sm:$0xff] %v3216_v12 }
 0x11e   :  { %746 = vmatpush1.bf16.msra.mxu1 %v3191_v7 }
 0x11f   :  { %829 = vmatprep.subr.bf16.mxu1 %v3195_v9  ;;  %2467 = vmatpush3.bf16.msra.mxu0 %v2933_v19 }
 0x120   :  { %2468 = vmatprep.subr.bf16.mxu0 %v2945_v22 }
 0x121   :  { %2415 = vmatmul.mubr.msk.bf16.vlgmr.msra.gmra.mrb[16].mxu1 %vm524_vm0, %v3076_v41 }
 0x122   :  { %830 = vmatpush1.bf16.msra.mxu1 %v3206_v58  ;;  %861 = vmatprep.mubr.bf16.mxu1 %v4965_v55 }
 0x123   :  { %831 = vmatprep.subr.bf16.mxu1 %v3209_v59  ;;  %2469 = vmatpush3.bf16.msra.mxu0 %v2955_v25 }
 0x124   :  { %2470 = vmatprep.subr.bf16.mxu0 %v2971_v28  ;;  %v4967_v28 = vsub.s32 2, %v2880_v8 }
 0x126   :  { %832 = vmatpush1.bf16.msra.mxu1 %v3216_v12 }
 0x127   :  { %2471 = vmatpush3.bf16.msra.mxu0 %v2983_v31  ;;  %1441 = vmatprep.subr.bf16.mxu1 %v2998_v36  ;;  %v302_v31 = vsub.s32 4, %v2880_v8  ;;  %v3242_v36 = vld [vmem:[%s4962_s6] sm:$0xff] }
 0x128   :  { %1613 = vmatprep.subr.bf16.mxu0 %v3007_v40  ;;  %v3257_v63 = vrot.slane %v3242_v36, %v2927_v18  ;;  %v3262_v17 = vrot.slane %v3242_v36, %v4967_v28  ;;  %v3269_v1 = vrot.slane %v3242_v36, %v2895_v11 }
 0x129   :  { %2417 = vmatmul.mubr.msk.bf16.vlgmr.msra.gmra.mrb[20].mxu1 %vm524_vm0, %v3076_v41  ;;  %v3265_v23 = vrot.slane %v3253_v62, %v302_v31  ;;  %v3299_v29 = vrot.slane %v3242_v36, %v302_v31 }
 0x12a   :  { %1442 = vmatpush1.bf16.msra.mxu1 %v3003_v38  ;;  %1473 = vmatprep.mubr.bf16.mxu1 %v4965_v55  ;;  %5100 = vst [vmem:[#allocation38_spill] sm:$0xff] %v3257_v63  ;;  %5101 = vst [vmem:[#allocation39_spill] sm:$0xff] %v3262_v17 }
 0x12b   :  { %1443 = vmatprep.subr.bf16.mxu1 %v3022_v44  ;;  %v4970_v44 = vsub.s32 3, %v2880_v8  ;;  %5102 = vst [vmem:[#allocation40_spill] sm:$0xff] %v3265_v23  ;;  %5103 = vst [vmem:[#allocation41_spill] sm:$0xff] %v3269_v1 }
 0x12c   :  { %5106 = vst [vmem:[#allocation44_spill] sm:$0xff] %v3299_v29 }
 0x12d   :  { %v3274_v33 = vrot.slane %v3242_v36, %v4970_v44 }
 0x12e   :  { %1444 = vmatpush1.bf16.msra.mxu1 %v3027_v46  ;;  %v306_v46 = vsub.s32 5, %v2880_v8 }
 0x12f   :  { %1484 = vmatprep.subr.bf16.mxu1 %v3048_v53  ;;  %5104 = vst [vmem:[#allocation42_spill] sm:$0xff] %v3274_v33 }
 0x130   :  { %v3277_v34 = vrot.slane %v3253_v62, %v306_v46  ;;  %v3330_v37 = vrot.slane %v3242_v36, %v306_v46 }
 0x132   :  { %5105 = vst [vmem:[#allocation43_spill] sm:$0xff] %v3277_v34  ;;  %5108 = vst [vmem:[#allocation46_spill] sm:$0xff] %v3330_v37 }
 0x1d4   :  { %v562_v13 = vpop.f32.mrb[0].mxu1  ;;  %v3233_v19 = vpop.f32.mrb[4].mxu0 }
 0x1d5   :  { %v564_v22 = vpop.f32.mrb[1].mxu1  ;;  %v3235_v25 = vpop.f32.mrb[5].mxu0  ;;  %v3281_v49 = vadd.f32 %v562_v13, %v3257_v63 }
 0x1d6   :  { %v566_v38 = vpop.f32.mrb[2].mxu1  ;;  %v3244_v40 = vpop.f32.mrb[6].mxu0  ;;  %v3290_v44 = vadd.f32 %v564_v22, %v3269_v1 }
 0x1d7   :  { %v568_v53 = vpop.f32.mrb[3].mxu1  ;;  %v3248_v41 = vpop.f32.mrb[7].mxu0 }
 0x1dc   :  { %v605_v4 = vpop.f32.mrb[4].mxu1  ;;  %v820_v6 = vpop.f32.mrb[8].mxu0 }
 0x1dd   :  { %v3284_v10 = vadd.f32 %v605_v4, %v3262_v17  ;;  %v3287_v55 = vadd.f32 %v820_v6, %v3265_v23  ;;  %v607_v28 = vpop.f32.mrb[5].mxu1  ;;  %v822_v21 = vpop.f32.mrb[9].mxu0  ;;  %v3302_v4 = vadd.f32 %v566_v38, %v3257_v63 }
 0x1de   :  { %v3293_v30 = vadd.f32 %v607_v28, %v3274_v33  ;;  %v3296_v20 = vadd.f32 %v822_v21, %v3277_v34  ;;  %v609_v16 = vpop.f32.mrb[6].mxu1  ;;  %v824_v13 = vpop.f32.mrb[10].mxu0  ;;  %v3311_v21 = vadd.f32 %v568_v53, %v3269_v1  ;;  %v56_v53 = vrot.slane %v51_v45, %v2927_v18 }
 0x1df   :  { %v872_v6 = vmax.f32 %v3281_v49, %v3284_v10  ;;  %v1144_v22 = vand.u32 2147483647, %v3287_v55  ;;  %v3308_v12 = vadd.f32 %v609_v16, %v3262_v17  ;;  %v611_v28 = vpop.f32.mrb[7].mxu1  ;;  %v826_v59 = vpop.f32.mrb[11].mxu0  ;;  %v3317_v38 = vadd.f32 %v824_v13, %v3265_v23 }
 0x1e0   :  { %v873_v31 = vmax.f32 %v3290_v44, %v3293_v30  ;;  %v1145_v58 = vand.u32 2147483647, %v3296_v20  ;;  %v3322_v16 = vadd.f32 %v611_v28, %v3274_v33  ;;  %v3325_v17 = vadd.f32 %v826_v59, %v3277_v34 }
 0x1e1   :  { %v1148_v63 = vsub.f32 0.0, %v1144_v22  ;;  %v874_v9 = vmax.f32 %v3302_v4, %v3308_v12  ;;  %v1146_v7 = vand.u32 2147483647, %v3317_v38  ;;  %v60_v28 = vrot.slane %v51_v45, %v2895_v11 }
 0x1e2   :  { %5107 = vst [vmem:[#allocation45_spill] sm:$0xff] %v3325_v17  ;;  %v1149_v1 = vsub.f32 0.0, %v1145_v58  ;;  %v875_v22 = vmax.f32 %v3311_v21, %v3322_v16  ;;  %v1147_v23 = vand.u32 2147483647, %v3325_v17  ;;  %v3338_v59 = vrot.slane %v3253_v62, %v2927_v18 }
 0x1e3   :  { %v1152_v13 = vmul.f32 1.442695, %v1148_v63  ;;  %v3342_v58 = vrot.slane %v3253_v62, %v2895_v11  ;;  %v1150_v33 = vsub.f32 0.0, %v1146_v7 }
 0x1e4   :  { %5109 = vst [vmem:[#allocation47_spill] sm:$0xff] %v3338_v59  ;;  %v1154_v34 = vmul.f32 1.442695, %v1149_v1  ;;  %v648_v46 = vpop.f32.mrb[8].mxu1  ;;  %v1151_v63 = vsub.f32 0.0, %v1147_v23  ;;  %v3352_v1 = vmul.f32 %v56_v53, %v2960_v26  ;;  %v3355_v23 = vmul.f32 %v60_v28, %v2912_v14 }
 0x1e5   :  { %5110 = vst [vmem:[#allocation48_spill] sm:$0xff] %v3342_v58  ;;  %2500 = vpow2.f32 %v1152_v13  ;;  %v649_v35 = vadd.f32 %v648_v46, %v3299_v29  ;;  %v650_v3 = vpop.f32.mrb[9].mxu1  ;;  %v1156_v45 = vmul.f32 1.442695, %v1150_v33 }
 0x1e6   :  { %2502 = vpow2.f32 %v1154_v34  ;;  %v651_v32 = vadd.f32 %v650_v3, %v3330_v37  ;;  %v652_v18 = vpop.f32.mrb[10].mxu1  ;;  %5111 = vst [vmem:[#allocation49_spill] sm:$0xff] %v3352_v1  ;;  %v1158_v13 = vmul.f32 1.442695, %v1151_v63  ;;  %v3361_v3 = vmul.f32 %v56_v53, %v2965_v27 }
 0x1e7   :  { %v876_v0 = vmax.f32 %v872_v6, %v649_v35  ;;  %v3349_v11 = vadd.f32 %v652_v18, %v3299_v29  ;;  %v654_v7 = vpop.f32.mrb[11].mxu1  ;;  %2504 = vpow2.f32 %v1156_v45  ;;  %v3404_v45 = vrot.slane %v3253_v62, %v310_v2 }
 0x1e8   :  { %v877_v46 = vmax.f32 %v873_v31, %v651_v32  ;;  %v3358_v33 = vadd.f32 %v654_v7, %v3330_v37  ;;  %5112 = vst [vmem:[#allocation50_spill] sm:$0xff] %v3361_v3  ;;  %2506 = vpow2.f32 %v1158_v13 }
 0x1e9   :  { %v880_v34 = vsub.f32 %v3281_v49, %v876_v0  ;;  %v892_v6 = vsub.f32 %v3284_v10, %v876_v0  ;;  %v904_v18 = vsub.f32 %v649_v35, %v876_v0  ;;  %v878_v63 = vmax.f32 %v874_v9, %v3349_v11  ;;  %5120 = vst [vmem:[#allocation56_spill] sm:$0xff] %v3404_v45 }
 0x1ea   :  { %v881_v26 = vsub.f32 %v3290_v44, %v877_v46  ;;  %v893_v29 = vsub.f32 %v3293_v30, %v877_v46  ;;  %v905_v14 = vsub.f32 %v651_v32, %v877_v46  ;;  %v3369_v37 = vmax.f32 %v875_v22, %v3358_v33 }
 0x1eb   :  { %v884_v31 = vmul.f32 1.442695, %v880_v34  ;;  %v896_v5 = vmul.f32 1.442695, %v892_v6  ;;  %v908_v7 = vmul.f32 1.442695, %v904_v18  ;;  %v882_v49 = vsub.f32 %v3302_v4, %v878_v63 }
 0x1ec   :  { %v886_v27 = vmul.f32 1.442695, %v881_v26  ;;  %v898_v53 = vmul.f32 1.442695, %v893_v29  ;;  %v894_v0 = vsub.f32 %v3308_v12, %v878_v63  ;;  %v906_v35 = vsub.f32 %v3349_v11, %v878_v63  ;;  %v691_v32 = vpop.f32.mrb[12].mxu1 }
 0x1ed   :  { %2508 = vpow2.f32 %v884_v31  ;;  %v883_v30 = vsub.f32 %v3311_v21, %v3369_v37  ;;  %v895_v9 = vsub.f32 %v3322_v16, %v3369_v37  ;;  %v907_v44 = vsub.f32 %v3358_v33, %v3369_v37  ;;  %v693_v10 = vpop.f32.mrb[13].mxu1 }
 0x1ee   :  { %2510 = vpow2.f32 %v896_v5  ;;  %v3381_v29 = vmul.f32 %v60_v28, %v2917_v15  ;;  %v3386_v12 = vrot.slane %v3242_v36, %v310_v2  ;;  %v3389_v21 = vrot.slane %v3242_v36, %v314_v24  ;;  %v695_v37 = vpop.f32.mrb[14].mxu1 }
 0x1ef   :  { %v3383_v4 = vpop.eup %2500  ;;  %2512 = vpow2.f32 %v908_v7  ;;  %v5116_v5 = vsub.s32 2, %v2880_v8  ;;  %v5118_v15 = vsub.s32 3, %v2880_v8  ;;  %v3407_v36 = vrot.slane %v3253_v62, %v314_v24  ;;  %v697_v13 = vpop.f32.mrb[15].mxu1 }
 0x1f0   :  { %5113 = vst [vmem:[#allocation51_spill] sm:$0xff] %v3381_v29  ;;  %5114 = vst [vmem:[#allocation52_spill] sm:$0xff] %v3386_v12  ;;  %v3396_v22 = vpop.eup %2502  ;;  %2514 = vpow2.f32 %v886_v27  ;;  %v1160_v11 = vadd.f32 1.0, %v3383_v4  ;;  %v3411_v46 = vclamps-f32 %v3352_v1, 8.0  ;;  %v3414_v33 = vclamps-f32 %v3355_v23, 8.0 }
 0x1f1   :  { %5115 = vst [vmem:[#allocation53_spill] sm:$0xff] %v3389_v21  ;;  %v3394_v16 = vrot.slane %v3253_v62, %v5116_v5  ;;  %v3401_v28 = vrot.slane %v3253_v62, %v5118_v15  ;;  %2516 = vpow2.f32 %v898_v53  ;;  %v1163_v8 = vmul.f32 -0.5, %v3383_v4  ;;  %v3424_v62 = vpop.eup %2504 }
 0x1f2   :  { %v1169_v34 = vadd.f32 1.0, %v3396_v22  ;;  %v3419_v2 = vclamps-f32 %v3361_v3, 8.0  ;;  %v3422_v24 = vclamps-f32 %v3381_v29, 8.0  ;;  %v3428_v6 = vadd.f32 %v3233_v19, %v3338_v59 }
 0x1f3   :  { %5117 = vst [vmem:[#allocation54_spill] sm:$0xff] %v3394_v16  ;;  %5119 = vst [vmem:[#allocation55_spill] sm:$0xff] %v3401_v28  ;;  %v3432_v18 = vadd.f32 %v3235_v25, %v3342_v58  ;;  %v1172_v26 = vmul.f32 -0.5, %v3396_v22  ;;  %v910_v63 = vmul.f32 1.442695, %v905_v14  ;;  %v3437_v31 = vadd.f32 %v3244_v40, %v3338_v59  ;;  %v3446_v14 = vpop.eup %2506 }
 0x1f4   :  { %v3441_v7 = vadd.f32 %v3248_v41, %v3342_v58  ;;  %v888_v53 = vmul.f32 1.442695, %v882_v49  ;;  %v777_v19 = vpop.f32.mrb[16].mxu1  ;;  %2518 = vlog2.f32 %v1160_v11  ;;  %v900_v15 = vmul.f32 1.442695, %v894_v0  ;;  %5121 = vst [vmem:[#allocation57_spill] sm:$0xff] %v3446_v14 }
 0x1f5   :  { %v779_v61 = vpop.f32.mrb[17].mxu1  ;;  %v1164_v60 = vadd.f32 1.0, %v1163_v8  ;;  %2520 = vlog2.f32 %v1169_v34  ;;  %v912_v40 = vmul.f32 1.442695, %v906_v35  ;;  %v890_v59 = vmul.f32 1.442695, %v883_v30 }
 0x1f6   :  { %v781_v54 = vpop.f32.mrb[18].mxu1  ;;  %v1173_v58 = vadd.f32 1.0, %v1172_v26  ;;  %2522 = vpow2.f32 %v910_v63  ;;  %v902_v49 = vmul.f32 1.442695, %v895_v9  ;;  %v692_v11 = vadd.f32 %v691_v32, %v3386_v12 }
 0x1f7   :  { %v3448_v41 = vpop.eup %2508  ;;  %v3451_v27 = vpop.f32.mrb[19].mxu1  ;;  %v1178_v0 = vadd.f32 1.0, %v3424_v62  ;;  %2524 = vpow2.f32 %v888_v53  ;;  %v694_v8 = vadd.f32 %v693_v10, %v3389_v21  ;;  %v3458_v35 = vadd.f32 %v695_v37, %v3386_v12 }
 0x1f8   :  { %v3453_v5 = vpop.eup %2510  ;;  %2526 = vpow2.f32 %v900_v15  ;;  %v914_v9 = vmul.f32 1.442695, %v907_v44  ;;  %v1036_v32 = vmax.f32 %v692_v11, %v3428_v6  ;;  %v3471_v37 = vadd.f32 %v697_v13, %v3389_v21 }
 0x1f9   :  { %v3460_v30 = vpop.eup %2512  ;;  %v916_v34 = vadd.f32 %v3453_v5, %v3448_v41  ;;  %2528 = vpow2.f32 %v912_v40  ;;  %v1037_v63 = vmax.f32 %v694_v8, %v3432_v18  ;;  %v1038_v10 = vmax.f32 %v3458_v35, %v3437_v31 }
 0x1fa   :  { %v3465_v26 = vpop.eup %2514  ;;  %2530 = vpow2.f32 %v890_v59  ;;  %v778_v44 = vadd.f32 %v777_v19, %v3394_v16  ;;  %v780_v15 = vadd.f32 %v779_v61, %v3401_v28  ;;  %v782_v51 = vadd.f32 %v781_v54, %v3394_v16 }
 0x1fb   :  { %v3473_v53 = vpop.eup %2516  ;;  %v920_v25 = vadd.f32 %v3460_v30, %v916_v34  ;;  %2532 = vpow2.f32 %v902_v49  ;;  %v1181_v21 = vmul.f32 -0.5, %v3424_v62  ;;  %v1166_v19 = vand.u32 2147483647, %v3383_v4 }
 0x1fc   :  { %v917_v40 = vadd.f32 %v3473_v53, %v3465_v26  ;;  %v3483_v13 = vpop.f32.mrb[20].mxu1  ;;  %v1040_v34 = vmax.f32 %v1036_v32, %v778_v44  ;;  %v1041_v59 = vmax.f32 %v1037_v63, %v780_v15  ;;  %v1187_v61 = vadd.f32 1.0, %v3446_v14 }
 0x1fd   :  { %2534 = vrcp.f32 %v920_v25  ;;  %v865_v50 = vpop.f32.mrb[21].mxu1  ;;  %v1042_v43 = vmax.f32 %v1038_v10, %v782_v51  ;;  %v3495_v32 = vmul.f32 %v3383_v4, %v1164_v60  ;;  %v3498_v63 = vmul.f32 %v3396_v22, %v1173_v58 }
 0x1fe   :  { %2536 = vpow2.f32 %v914_v9  ;;  %v3488_v49 = vpop.f32.mrb[22].mxu1  ;;  %v2519_v42 = vpop.eup %2518  ;;  %v1044_v54 = vsub.f32 %v692_v11, %v1040_v34  ;;  %v1056_v16 = vsub.f32 %v3428_v6, %v1040_v34  ;;  %v1068_v56 = vsub.f32 %v778_v44, %v1040_v34 }
 0x1ff   :  { %v3492_v52 = vpop.f32.mrb[23].mxu1  ;;  %v2521_v25 = vpop.eup %2520  ;;  %v1045_v10 = vsub.f32 %v694_v8, %v1041_v59  ;;  %2538 = vlog2.f32 %v1178_v0  ;;  %v3503_v12 = vadd.f32 1.0, %v1181_v21  ;;  %v3507_v34 = vmul.f32 0.6931472, %v2519_v42 }
 0x200   :  { %v3501_v57 = vpop.eup %2522  ;;  %v1048_v11 = vmul.f32 1.442695, %v1044_v54  ;;  %v1060_v6 = vmul.f32 1.442695, %v1056_v16  ;;  %2540 = vlog2.f32 %v1187_v61  ;;  %v1072_v4 = vmul.f32 1.442695, %v1068_v56 }
 0x201   :  { %v3505_v44 = vpop.eup %2524  ;;  %v921_v60 = vadd.f32 %v3501_v57, %v917_v40  ;;  %vm3512_vm1 = vcmp.lt.f32.partialorder %v1166_v19, 0.0004427343  ;;  %v3516_v8 = vmul.f32 0.6931472, %v2521_v25  ;;  %v1050_v21 = vmul.f32 1.442695, %v1045_v10 }
 0x202   :  { %v3510_v58 = vpop.eup %2526  ;;  %2542 = vpow2.f32 %v1048_v11  ;;  %v1057_v16 = vsub.f32 %v3432_v18, %v1041_v59  ;;  %v1069_v40 = vsub.f32 %v780_v15, %v1041_v59  ;;  %v784_v56 = vadd.f32 %v3451_v27, %v3401_v28 }
 0x203   :  { %v3519_v0 = vpop.eup %2528  ;;  %2544 = vrcp.f32 %v921_v60  ;;  %v918_v42 = vadd.f32 %v3510_v58, %v3505_v44  ;;  %v1046_v54 = vsub.f32 %v3458_v35, %v1042_v43  ;;  %v1058_v25 = vsub.f32 %v3437_v31, %v1042_v43 }
 0x204   :  { %v3525_v19 = vpop.eup %2530  ;;  %2546 = vpow2.f32 %v1060_v6  ;;  %v1062_v61 = vmul.f32 1.442695, %v1057_v16  ;;  %v1074_v11 = vmul.f32 1.442695, %v1069_v40  ;;  %v1070_v60 = vsub.f32 %v782_v51, %v1042_v43 }
 0x205   :  { %v3529_v10 = vpop.eup %2532  ;;  %v922_v18 = vadd.f32 %v3519_v0, %v918_v42  ;;  %2548 = vpow2.f32 %v1072_v4  ;;  %v1052_v27 = vmul.f32 1.442695, %v1046_v54  ;;  %v1064_v59 = vmul.f32 1.442695, %v1058_v25 }
 0x206   :  { %v919_v15 = vadd.f32 %v3529_v10, %v3525_v19  ;;  %2550 = vpow2.f32 %v1050_v21  ;;  %v1076_v35 = vmul.f32 1.442695, %v1070_v60  ;;  %v5124_v31 = vmax.f32 %v3471_v37, %v3441_v7 }
 0x207   :  { %v2535_v47 = vpop.eup %2534  ;;  %2552 = vrcp.f32 %v922_v18  ;;  %v3542_v43 = vadd.f32 %v3483_v13, %v3404_v45  ;;  %v3545_v51 = vadd.f32 %v865_v50, %v3407_v36  ;;  %v1168_v50 = vsel %vm3512_vm1, %v3495_v32, %v3507_v34 }
 0x208   :  { %v3534_v6 = vpop.eup %2536  ;;  %v928_v16 = vmul.f32 16.0, %v2535_v47  ;;  %v1043_v28 = vmax.f32 %v5124_v31, %v784_v56  ;;  %2554 = vpow2.f32 %v1062_v61  ;;  %v5129_v32 = vmov 0 }
 0x209   :  { %v923_v4 = vadd.f32 %v3534_v6, %v919_v15  ;;  %2556 = vpow2.f32 %v1074_v11  ;;  %v3550_v40 = vpop.eup %2538  ;;  %v5132_v15 = vmax.f32 %v3287_v55, 0.0 }
 0x20a   :  { %v932_v21 = vmul.f32 %v3448_v41, %v928_v16  ;;  %v936_v47 = vmul.f32 %v3453_v5, %v928_v16  ;;  %v940_v42 = vmul.f32 %v3460_v30, %v928_v16  ;;  %v1047_v54 = vsub.f32 %v3471_v37, %v1043_v28  ;;  %v3554_v13 = vpop.eup %2540 }
 0x20b   :  { %2558 = vrcp.f32 %v923_v4  ;;  %v1059_v61 = vsub.f32 %v3441_v7, %v1043_v28  ;;  %v1071_v25 = vsub.f32 %v784_v56, %v1043_v28  ;;  %5125 = vst [vmem:[#allocation58_spill] sm:$0xff] %v3554_v13  ;;  %v1204_v5 = vand.u32 2147483647, %v3542_v43 }
 0x20c   :  { %v944_v41 = vadd.f32 -8.0, %v932_v21  ;;  %2560 = vpow2.f32 %v1052_v27  ;;  %v3561_v30 = vpop.eup %2542  ;;  %v1054_v18 = vmul.f32 1.442695, %v1047_v54  ;;  %v5126_v28 = vand.u32 2147483647, %v3396_v22 }
 0x20d   :  { %2562 = vpow2.f32 %v1064_v59  ;;  %v1066_v11 = vmul.f32 1.442695, %v1059_v61  ;;  %v1078_v37 = vmul.f32 1.442695, %v1071_v25  ;;  %v2545_v60 = vpop.eup %2544  ;;  %v1208_v34 = vsub.f32 0.0, %v1204_v5 }
 0x20e   :  { %vm3565_vm2 = vcmp.lt.f32.partialorder %v5126_v28, 0.0004427343  ;;  %2564 = vpow2.f32 %v1076_v35  ;;  %v948_v9 = vadd.f32 %v944_v41, %v936_v47  ;;  %vm3570_vm3 = vcmp.lt.f32.partialorder %v3411_v46, %v944_v41  ;;  %v3574_v56 = vpop.eup %2546 }
 0x20f   :  { %v5130_v32 = vsel %vm3570_vm3, 4294967295, %v5129_v32  ;;  %v3578_v27 = vadd.f32 %v1168_v50, %v5132_v15  ;;  %v929_v59 = vmul.f32 16.0, %v2545_v60  ;;  %2566 = vpow2.f32 %v1054_v18  ;;  %vm976_vm5 = vmxor %vm3570_vm3, %vm2790_vm4  ;;  %v3584_v16 = vpop.eup %2548 }
 0x210   :  { %5131 = vst [vmem:[#allocation59_spill] sm:$0xff] %v5130_v32  ;;  %v1205_v22 = vand.u32 2147483647, %v3545_v51  ;;  %v1080_v35 = vadd.f32 %v3574_v56, %v3561_v30  ;;  %2568 = vpow2.f32 %v1066_v11  ;;  %vm980_vm6 = vcmp.lt.f32.partialorder %v3411_v46, %v948_v9  ;;  %v3589_v31 = vpop.eup %2550 }
 0x211   :  { %v1212_v55 = vmul.f32 1.442695, %v1208_v34  ;;  %v933_v4 = vmul.f32 %v3465_v26, %v929_v59  ;;  %v937_v54 = vmul.f32 %v3473_v53, %v929_v59  ;;  %v941_v61 = vmul.f32 %v3501_v57, %v929_v59  ;;  %vm3594_vm7 = vmand %vm976_vm5, %vm980_vm6  ;;  %v2553_v50 = vpop.eup %2552 }
 0x212   :  { %2570 = vpow2.f32 %v1078_v37  ;;  %v5133_v25 = vmov 0  ;;  %v1084_v5 = vadd.f32 %v3584_v16, %v1080_v35  ;;  %v988_v18 = vsel %vm3594_vm7, %v936_v47, %v940_v42  ;;  %v3603_v26 = vpop.eup %2554 }
 0x213   :  { %v5134_v25 = vsel %vm3594_vm7, 4294967295, %v5133_v25  ;;  %v1000_v11 = vsel %vm3594_vm7, %v944_v41, %v948_v9  ;;  %2572 = vpow2.f32 %v1212_v55  ;;  %v945_v53 = vadd.f32 -8.0, %v933_v4  ;;  %v3611_v28 = vpop.eup %2556 }
 0x214   :  { %5135 = vst [vmem:[#allocation60_spill] sm:$0xff] %v5134_v25  ;;  %v930_v60 = vmul.f32 16.0, %v2553_v50  ;;  %v992_v57 = vsel %vm3570_vm3, %v932_v21, %v988_v18  ;;  %v3609_v37 = vsel %vm3570_vm3, -8.0, %v1000_v11  ;;  %2574 = vrcp.f32 %v1084_v5 }
 0x215   :  { %v1081_v47 = vadd.f32 %v3603_v26, %v3589_v31  ;;  %v996_v42 = vmax.f32 %v992_v57, 1e-06  ;;  %v2559_v9 = vpop.eup %2558  ;;  %v949_v59 = vadd.f32 %v945_v53, %v937_v54  ;;  %vm3624_vm8 = vcmp.lt.f32.partialorder %v3414_v33, %v945_v53 }
 0x216   :  { %v934_v34 = vmul.f32 %v3505_v44, %v930_v60  ;;  %v938_v15 = vmul.f32 %v3510_v58, %v930_v60  ;;  %v942_v21 = vmul.f32 %v3519_v0, %v930_v60  ;;  %v3620_v35 = vpop.eup %2560  ;;  %v931_v55 = vmul.f32 16.0, %v2559_v9  ;;  %vm977_vm9 = vmxor %vm3624_vm8, %vm2790_vm4 }
 0x217   :  { %v1085_v50 = vadd.f32 %v3611_v28, %v1081_v47  ;;  %2576 = vrcp.f32 %v996_v42  ;;  %v3628_v18 = vpop.eup %2562  ;;  %v1177_v44 = vsel %vm3565_vm2, %v3498_v63, %v3516_v8  ;;  %vm981_vm10 = vcmp.lt.f32.partialorder %v3414_v33, %v949_v59 }
 0x218   :  { %v946_v58 = vadd.f32 -8.0, %v934_v34  ;;  %v1209_v0 = vsub.f32 0.0, %v1205_v22  ;;  %v3638_v11 = vpop.eup %2564  ;;  %v3641_v60 = vmul.f32 %v3525_v19, %v931_v55  ;;  %v3644_v57 = vmul.f32 %v3529_v10, %v931_v55  ;;  %vm3649_vm11 = vmand %vm977_vm9, %vm981_vm10 }
 0x219   :  { %v3647_v47 = vmul.f32 %v3534_v6, %v931_v55  ;;  %2578 = vrcp.f32 %v1085_v50  ;;  %v3653_v8 = vpop.eup %2566  ;;  %v1082_v7 = vadd.f32 %v3628_v18, %v3620_v35  ;;  %v989_v19 = vsel %vm3649_vm11, %v937_v54, %v941_v61 }
 0x21a   :  { %v1001_v10 = vsel %vm3649_vm11, %v945_v53, %v949_v59  ;;  %v1214_v22 = vmul.f32 1.442695, %v1209_v0  ;;  %v3661_v42 = vpop.eup %2568  ;;  %v993_v6 = vsel %vm3624_vm8, %v933_v4, %v989_v19  ;;  %v3671_v55 = vadd.f32 %v3488_v49, %v3404_v45 }
 0x21b   :  { %v3667_v9 = vsel %vm3624_vm8, -8.0, %v1001_v10  ;;  %v950_v50 = vadd.f32 %v946_v58, %v938_v15  ;;  %v1086_v54 = vadd.f32 %v3638_v11, %v1082_v7  ;;  %v1083_v61 = vadd.f32 %v3661_v42, %v3653_v8 }
 0x21c   :  { %v3673_v41 = vpop.eup %2570  ;;  %v997_v53 = vmax.f32 %v993_v6, 1e-06  ;;  %v5140_v0 = vmax.f32 %v3296_v20, 0.0  ;;  %2580 = vpow2.f32 %v1214_v22  ;;  %vm3687_vm12 = vcmp.lt.f32.partialorder %v3419_v2, %v946_v58 }
 0x21d   :  { %v3680_v59 = vpop.eup %2572  ;;  %vm982_vm13 = vcmp.lt.f32.partialorder %v3419_v2, %v950_v50  ;;  %2582 = vrcp.f32 %v1086_v54  ;;  %v1087_v7 = vadd.f32 %v3673_v41, %v1083_v61  ;;  %vm978_vm14 = vmxor %vm3687_vm12, %vm2790_vm4  ;;  %v1206_v54 = vand.u32 2147483647, %v3671_v55 }
 0x21e   :  { %v3684_v19 = vadd.f32 %v1177_v44, %v5140_v0  ;;  %v1220_v6 = vadd.f32 1.0, %v3680_v59  ;;  %v2575_v20 = vpop.eup %2574  ;;  %v1223_v44 = vmul.f32 -0.5, %v3680_v59  ;;  %2584 = vrcp.f32 %v997_v53  ;;  %vm3700_vm15 = vmand %vm978_vm14, %vm982_vm13 }
 0x21f   :  { %v3706_v61 = vadd.f32 -8.0, %v3641_v60  ;;  %v1092_v10 = vmul.f32 16.0, %v2575_v20  ;;  %2586 = vrcp.f32 %v1087_v7  ;;  %v990_v4 = vsel %vm3700_vm15, %v938_v15, %v942_v21 }
 0x220   :  { %2588 = vlog2.f32 %v1220_v6  ;;  %v1226_v53 = vand.u32 2147483647, %v3680_v59  ;;  %v994_v22 = vsel %vm3687_vm12, %v934_v34, %v990_v4  ;;  %v1002_v48 = vsel %vm3700_vm15, %v946_v58, %v950_v50 }
 0x221   :  { %v2577_v45 = vpop.eup %2576  ;;  %v3716_v39 = vmul.f32 %v3561_v30, %v1092_v10  ;;  %v3719_v29 = vmul.f32 %v3574_v56, %v1092_v10  ;;  %v1104_v7 = vmul.f32 %v3584_v16, %v1092_v10  ;;  %v5147_v15 = vsub.f32 %v3411_v46, %v3609_v37 }
 0x222   :  { %v1224_v20 = vadd.f32 1.0, %v1223_v44  ;;  %v998_v17 = vmax.f32 %v994_v22, 1e-06  ;;  %v1006_v34 = vsel %vm3687_vm12, -8.0, %v1002_v48  ;;  %v1210_v4 = vsub.f32 0.0, %v1206_v54 }
 0x223   :  { %5145 = vst [vmem:[#allocation61_spill] sm:$0xff] %v3716_v39  ;;  %5146 = vst [vmem:[#allocation62_spill] sm:$0xff] %v3719_v29  ;;  %v1016_v21 = vmul.f32 %v2577_v45, %v5147_v15  ;;  %v2579_v6 = vpop.eup %2578  ;;  %v1116_v30 = vsel %vm3594_vm7, %v3719_v29, %v1104_v7  ;;  %v1014_v56 = vsub.f32 %v3419_v2, %v1006_v34  ;;  %vm3736_vm1 = vcmp.lt.f32.partialorder %v1226_v53, 0.0004427343 }
 0x224   :  { %v1093_v58 = vmul.f32 16.0, %v2579_v6  ;;  %v3734_v46 = vsel %vm3570_vm3, %v3716_v39, %v1116_v30  ;;  %2590 = vrcp.f32 %v998_v17  ;;  %v1216_v48 = vmul.f32 1.442695, %v1210_v4 }
 0x225   :  { %v1020_v50 = vmax.f32 %v1016_v21, 0.0  ;;  %v3742_v37 = vadd.f32 %v3706_v61, %v3644_v57  ;;  %v5036_v53 = vmax.f32 %v3734_v46, 1e-06  ;;  %vm3756_vm2 = vcmp.lt.f32.partialorder %v3422_v24, %v3706_v61 }
 0x226   :  { %v3745_v10 = vmul.f32 %v3589_v31, %v1093_v58  ;;  %v3748_v2 = vmul.f32 %v3603_v26, %v1093_v58  ;;  %v1105_v44 = vmul.f32 %v3611_v28, %v1093_v58  ;;  %v2581_v54 = vpop.eup %2580  ;;  %2592 = vpow2.f32 %v1216_v48  ;;  %vm979_vm6 = vmxor %vm3756_vm2, %vm2790_vm4 }
 0x227   :  { %v3751_v22 = vmin.f32 %v1020_v50, 1.0  ;;  %vm983_vm5 = vcmp.lt.f32.partialorder %v3422_v24, %v3742_v37  ;;  %v2583_v31 = vpop.eup %2582  ;;  %v1229_v7 = vadd.f32 1.0, %v2581_v54  ;;  %v1232_v15 = vmul.f32 -0.5, %v2581_v54 }
 0x228   :  { %v1117_v28 = vsel %vm3649_vm11, %v3748_v2, %v1105_v44  ;;  %v2585_v21 = vpop.eup %2584  ;;  %v1094_v6 = vmul.f32 16.0, %v2583_v31  ;;  %v3773_v34 = vmul.f32 %v2577_v45, %v5036_v53  ;;  %v1235_v58 = vand.u32 2147483647, %v2581_v54  ;;  %vm3780_vm9 = vmand %vm979_vm6, %vm983_vm5 }
 0x229   :  { %v3763_v26 = vsub.f32 1.0, %v3751_v22  ;;  %v3778_v4 = vsel %vm3624_vm8, %v3745_v10, %v1117_v28  ;;  %v2587_v30 = vpop.eup %2586  ;;  %v5154_v44 = vsub.f32 %v3414_v33, %v3667_v9  ;;  %2594 = vlog2.f32 %v1229_v7 }
 0x22a   :  { %v5045_v45 = vmax.f32 %v3778_v4, 1e-06  ;;  %v2589_v53 = vpop.eup %2588  ;;  %v3791_v28 = vmul.f32 %v3620_v35, %v1094_v6  ;;  %v3794_v3 = vmul.f32 %v3628_v18, %v1094_v6  ;;  %v1106_v13 = vmul.f32 %v3638_v11, %v1094_v6 }
 0x22b   :  { %v1032_v48 = vmul.f32 %v3763_v26, %v3751_v22  ;;  %v1017_v31 = vmul.f32 %v2585_v21, %v5154_v44  ;;  %v1095_v14 = vmul.f32 16.0, %v2587_v30  ;;  %v1222_v1 = vmul.f32 0.6931472, %v2589_v53 }
 0x22c   :  { %5155 = vst [vmem:[#allocation63_spill] sm:$0xff] %v3791_v28  ;;  %5156 = vst [vmem:[#allocation64_spill] sm:$0xff] %v3794_v3  ;;  %v1225_v29 = vmul.f32 %v3680_v59, %v1224_v20  ;;  %v1276_v33 = vmul.f32 %v3773_v34, %v3751_v22  ;;  %v1300_v9 = vmul.f32 2.0, %v3773_v34  ;;  %v3815_v53 = vmul.f32 %v2585_v21, %v5045_v45 }
 0x22d   :  { %v3802_v7 = vmul.f32 %v3653_v8, %v1095_v14  ;;  %v3805_v35 = vmul.f32 %v3661_v42, %v1095_v14  ;;  %v3808_v18 = vmul.f32 %v3673_v41, %v1095_v14  ;;  %v1021_v44 = vmax.f32 %v1017_v31, 0.0 }
 0x22e   :  { %v1228_v11 = vsel %vm3736_vm1, %v1225_v29, %v1222_v1  ;;  %v1280_v59 = vmul.f32 %v1276_v33, %v3751_v22  ;;  %v1340_v20 = vmul.f32 %v1300_v9, %v1032_v48  ;;  %v2591_v6 = vpop.eup %2590  ;;  %v5157_v8 = vmax.f32 %v3542_v43, 0.0 }
 0x22f   :  { %v3819_v42 = vmin.f32 %v1021_v44, 1.0  ;;  %v1233_v39 = vadd.f32 1.0, %v1232_v15  ;;  %vm3821_vm10 = vcmp.lt.f32.partialorder %v1235_v58, 0.0004427343  ;;  %v3826_v1 = vmul.f32 2.0, %v3815_v53 }
 0x230   :  { %v1256_v30 = vadd.f32 %v1228_v11, %v5157_v8  ;;  %v1018_v29 = vmul.f32 %v2591_v6, %v1014_v56  ;;  %v1118_v41 = vsel %vm3700_vm15, %v3794_v3, %v1106_v13  ;;  %v991_v43 = vsel %vm3780_vm9, %v3644_v57, %v3647_v47  ;;  %v3835_v16 = vpop.eup %2592 }
 0x231   :  { %v1029_v56 = vsub.f32 1.0, %v3819_v42  ;;  %v1234_v58 = vmul.f32 %v2581_v54, %v1233_v39  ;;  %v1277_v57 = vmul.f32 %v3815_v53, %v3819_v42  ;;  %vm953_vm1 = vcmp.ge.f32.partialorder %v3355_v23, -8.0 }
 0x232   :  { %v1260_v15 = vsel %vm3594_vm7, %v3578_v27, %v1256_v30  ;;  %v1268_v21 = vsel %vm3594_vm7, %v1256_v30, 1.0  ;;  %v1022_v47 = vmax.f32 %v1018_v29, 0.0  ;;  %vm957_vm5 = vcmp.le.f32.partialorder %v3355_v23, 8.0 }
 0x233   :  { %v1264_v13 = vsel %vm3570_vm3, 1.0, %v1260_v15  ;;  %v1272_v31 = vsel %vm3570_vm3, %v3578_v27, %v1268_v21  ;;  %v2595_v30 = vpop.eup %2594  ;;  %v1033_v39 = vmul.f32 %v1029_v56, %v3819_v42  ;;  %v1281_v54 = vmul.f32 %v1277_v57, %v3819_v42 }
 0x234   :  { %v1284_v33 = vmul.f32 %v1264_v13, %v1032_v48  ;;  %v1296_v44 = vadd.f32 %v1272_v31, %v1264_v13  ;;  %v1332_v11 = vmul.f32 %v1272_v31, %v3751_v22  ;;  %v1348_v8 = vmul.f32 %v1264_v13, %v3763_v26 }
 0x235   :  { %v3854_v15 = vmin.f32 %v1022_v47, 1.0  ;;  %v3859_v27 = vsel %vm3687_vm12, %v3791_v28, %v1118_v41  ;;  %v1231_v32 = vmul.f32 0.6931472, %v2595_v30  ;;  %v1341_v13 = vmul.f32 %v3826_v1, %v1033_v39 }
 0x236   :  { %v1288_v21 = vadd.f32 %v1284_v33, %v1280_v59  ;;  %v1304_v29 = vsub.f32 %v1296_v44, %v1300_v9  ;;  %v1336_v45 = vmul.f32 %v1332_v11, %v3751_v22  ;;  %v1352_v31 = vmul.f32 %v1348_v8, %v3763_v26 }
 0x237   :  { %v3865_v25 = vsub.f32 1.0, %v3854_v15  ;;  %v1126_v57 = vmax.f32 %v3859_v27, 1e-06  ;;  %v5160_v47 = vmax.f32 %v3734_v46, 1e-06  ;;  %v1238_v9 = vadd.f32 1.0, %v3835_v16 }
 0x238   :  { %v1308_v41 = vmul.f32 %v1304_v29, %v1032_v48  ;;  %v1344_v28 = vadd.f32 %v1340_v20, %v1336_v45  ;;  %v1328_v22 = vmul.f32 %v3773_v34, %v3773_v34  ;;  %v1237_v26 = vsel %vm3821_vm10, %v1234_v58, %v1231_v32 }
 0x239   :  { %v3870_v3 = vmul.f32 %v1288_v21, %v5160_v47  ;;  %v3879_v59 = vmul.f32 %v2591_v6, %v1126_v57  ;;  %v1241_v33 = vmul.f32 -0.5, %v3835_v16  ;;  %v5161_v48 = vmax.f32 %v3545_v51, 0.0 }
 0x23a   :  { %v1312_v46 = vadd.f32 %v1308_v41, %v3773_v34  ;;  %v1356_v44 = vadd.f32 %v1352_v31, %v1344_v28  ;;  %2596 = vlog2.f32 %v1238_v9  ;;  %v1180_v20 = vmul.f32 0.6931472, %v3550_v40 }
 0x23b   :  { %v1257_v45 = vadd.f32 %v1237_v26, %v5161_v48  ;;  %v1183_v11 = vmul.f32 %v3424_v62, %v3503_v12  ;;  %v3890_v32 = vmul.f32 %v3865_v25, %v3854_v15  ;;  %v1278_v6 = vmul.f32 %v3879_v59, %v3854_v15 }
 0x23c   :  { %v3894_v14 = vmul.f32 %v1356_v44, %v1328_v22  ;;  %v3903_v40 = vadd.f32 %v3492_v52, %v3407_v36  ;;  %v1242_v58 = vadd.f32 1.0, %v1241_v33  ;;  %v3911_v8 = vmul.f32 2.0, %v3879_v59 }
 0x23d   :  { %v1261_v51 = vsel %vm3649_vm11, %v3684_v19, %v1257_v45  ;;  %v1269_v34 = vsel %vm3649_vm11, %v1257_v45, 1.0  ;;  %2598 = vrcp.f32 %v1312_v46  ;;  %v1282_v52 = vmul.f32 %v1278_v6, %v3854_v15 }
 0x23e   :  { %v1265_v12 = vsel %vm3624_vm8, 1.0, %v1261_v51  ;;  %v1273_v28 = vsel %vm3624_vm8, %v3684_v19, %v1269_v34  ;;  %v3917_v47 = vmul.f32 %v3911_v8, %v3890_v32  ;;  %v995_v19 = vsel %vm3756_vm2, %v3641_v60, %v991_v43 }
 0x23f   :  { %v1285_v30 = vmul.f32 %v1265_v12, %v1033_v39  ;;  %v1297_v21 = vadd.f32 %v1273_v28, %v1265_v12  ;;  %v1333_v29 = vmul.f32 %v1273_v28, %v3819_v42  ;;  %v1349_v31 = vmul.f32 %v1265_v12, %v1029_v56 }
 0x240   :  { %v1244_v33 = vand.u32 2147483647, %v3835_v16  ;;  %v999_v44 = vmax.f32 %v995_v19, 1e-06  ;;  %v1003_v46 = vsel %vm3780_vm9, %v3706_v61, %v3742_v37  ;;  %v1119_v48 = vsel %vm3780_vm9, %v3805_v35, %v3808_v18 }
 0x241   :  { %v1289_v41 = vadd.f32 %v1285_v30, %v1281_v54  ;;  %v1305_v9 = vsub.f32 %v1297_v21, %v3826_v1  ;;  %v1337_v22 = vmul.f32 %v1333_v29, %v3819_v42  ;;  %v1353_v26 = vmul.f32 %v1349_v31, %v1029_v56 }
 0x242   :  { %v1007_v1 = vsel %vm3756_vm2, -8.0, %v1003_v46  ;;  %v3938_v42 = vsel %vm3756_vm2, %v3802_v7, %v1119_v48  ;;  %v5162_v56 = vand.u32 2147483647, %v3424_v62  ;;  %2600 = vrcp.f32 %v999_v44  ;;  %v5167_v48 = vld [vmem:[#allocation61_spill] sm:$0xff] }
 0x243   :  { %v1309_v60 = vmul.f32 %v1305_v9, %v1033_v39  ;;  %v1345_v43 = vadd.f32 %v1341_v13, %v1337_v22  ;;  %v1015_v61 = vsub.f32 %v3422_v24, %v1007_v1  ;;  %v1207_v37 = vand.u32 2147483647, %v3903_v40 }
 0x244   :  { %vm3942_vm13 = vcmp.lt.f32.partialorder %v5162_v56, 0.0004427343  ;;  %v2597_v18 = vpop.eup %2596  ;;  %v1202_v6 = vmax.f32 %v3671_v55, 0.0  ;;  %v1243_v62 = vmul.f32 %v3835_v16, %v1242_v58  ;;  %vm1245_vm14 = vcmp.lt.f32.partialorder %v1244_v33, 0.0004427343 }
 0x245   :  { %v1186_v39 = vsel %vm3942_vm13, %v1183_v11, %v1180_v20  ;;  %v1313_v13 = vadd.f32 %v1309_v60, %v3815_v53  ;;  %v1357_v45 = vadd.f32 %v1353_v26, %v1345_v43  ;;  %v1240_v51 = vmul.f32 0.6931472, %v2597_v18  ;;  %v5168_v43 = vld [vmem:[#allocation63_spill] sm:$0xff] }
 0x246   :  { %v1211_v34 = vsub.f32 0.0, %v1207_v37  ;;  %v1109_v12 = vadd.f32 -8.0, %v3745_v10  ;;  %v1111_v24 = vadd.f32 -8.0, %v3802_v7  ;;  %v5165_v28 = vmax.f32 %v3778_v4, 1e-06 }
 0x247   :  { %2602 = vrcp.f32 %v1313_v13  ;;  %v5166_v20 = vmax.f32 %v3317_v38, 0.0  ;;  %v1246_v21 = vsel %vm1245_vm14, %v1243_v62, %v1240_v51  ;;  %v1329_v55 = vmul.f32 %v3815_v53, %v3815_v53  ;;  %v2599_v19 = vpop.eup %2598  ;;  %v5170_v62 = vld [vmem:[#allocation64_spill] sm:$0xff] }
 0x248   :  { %v1293_v30 = vmul.f32 %v1289_v41, %v5165_v28  ;;  %v1218_v29 = vmul.f32 1.442695, %v1211_v34  ;;  %v1258_v31 = vadd.f32 %v1246_v21, %v1202_v6  ;;  %v1127_v16 = vmax.f32 %v3938_v42, 1e-06  ;;  %v5169_v6 = vld [vmem:[#allocation62_spill] sm:$0xff]  ;;  %v5171_v28 = vld [vmem:[#allocation49_spill] sm:$0xff] }
 0x249   :  { %v1198_v11 = vadd.f32 %v1186_v39, %v5166_v20  ;;  %v1113_v58 = vadd.f32 %v1109_v12, %v3748_v2  ;;  %v1115_v10 = vadd.f32 %v1111_v24, %v3805_v35  ;;  %v1361_v38 = vmul.f32 %v1357_v45, %v1329_v55 }
 0x24a   :  { %2604 = vpow2.f32 %v1218_v29  ;;  %v1270_v7 = vsel %vm3700_vm15, %v1258_v31, 1.0  ;;  %v1108_v60 = vadd.f32 -8.0, %v5167_v48  ;;  %v1110_v1 = vadd.f32 -8.0, %v5168_v43 }
 0x24b   :  { %v1262_v4 = vsel %vm3700_vm15, %v1198_v11, %v1258_v31  ;;  %v1129_v53 = vsel %vm3649_vm11, %v1109_v12, %v1113_v58  ;;  %v1131_v2 = vsel %vm3780_vm9, %v1111_v24, %v1115_v10  ;;  %v1274_v41 = vsel %vm3687_vm12, %v1198_v11, %v1270_v7  ;;  %vm4016_vm11 = vmand %vm953_vm1, %vm957_vm5  ;;  %v5177_v7 = vld [vmem:[#allocation57_spill] sm:$0xff] }
 0x24c   :  { %v1266_v35 = vsel %vm3687_vm12, 1.0, %v1262_v4  ;;  %v1133_v9 = vsel %vm3624_vm8, -8.0, %v1129_v53  ;;  %v3982_v22 = vsel %vm3756_vm2, -8.0, %v1131_v2  ;;  %v1334_v33 = vmul.f32 %v1274_v41, %v3854_v15  ;;  %v2601_v46 = vpop.eup %2600 }
 0x24d   :  { %v1286_v26 = vmul.f32 %v1266_v35, %v3890_v32  ;;  %v1298_v63 = vadd.f32 %v1274_v41, %v1266_v35  ;;  %v1350_v44 = vmul.f32 %v1266_v35, %v3865_v25  ;;  %v1320_v56 = vmul.f32 %v2599_v19, %v3870_v3 }
 0x24e   :  { %v1364_v5 = vmul.f32 %v2599_v19, %v2599_v19  ;;  %v1338_v18 = vmul.f32 %v1334_v33, %v3854_v15  ;;  %v1019_v13 = vmul.f32 %v2601_v46, %v1015_v61  ;;  %v3995_v45 = vmul.f32 %v2601_v46, %v1127_v16 }
 0x24f   :  { %v1290_v54 = vadd.f32 %v1286_v26, %v1282_v52  ;;  %v1306_v37 = vsub.f32 %v1298_v63, %v3911_v8  ;;  %v1354_v39 = vmul.f32 %v1350_v44, %v3865_v25  ;;  %v1112_v51 = vadd.f32 %v1108_v60, %v5169_v6 }
 0x250   :  { %v1114_v34 = vadd.f32 %v1110_v1, %v5170_v62  ;;  %v1346_v8 = vadd.f32 %v3917_v47, %v1338_v18  ;;  %v1368_v15 = vmul.f32 %v1364_v5, %v3894_v14  ;;  %v1330_v25 = vmul.f32 %v3879_v59, %v3879_v59  ;;  %v5184_v5 = vld [vmem:[#allocation50_spill] sm:$0xff] }
 0x251   :  { %v2603_v12 = vpop.eup %2602  ;;  %v1294_v3 = vmul.f32 %v1290_v54, %v1126_v57  ;;  %v1310_v52 = vmul.f32 %v1306_v37, %v3890_v32  ;;  %v1023_v61 = vmax.f32 %v1019_v13, 0.0  ;;  %vm952_vm8 = vcmp.ge.f32.partialorder %v5171_v28, -8.0 }
 0x252   :  { %v1321_v24 = vmul.f32 %v2603_v12, %v1293_v30  ;;  %v1358_v11 = vadd.f32 %v1354_v39, %v1346_v8  ;;  %v1365_v21 = vmul.f32 %v2603_v12, %v2603_v12  ;;  %v1128_v27 = vsel %vm3594_vm7, %v1108_v60, %v1112_v51  ;;  %v5183_v60 = vld [vmem:[#allocation58_spill] sm:$0xff] }
 0x253   :  { %v1314_v20 = vadd.f32 %v1310_v52, %v3879_v59  ;;  %v4010_v32 = vmin.f32 %v1023_v61, 1.0  ;;  %v5173_v14 = vmov 0  ;;  %v1130_v59 = vsel %vm3700_vm15, %v1110_v1, %v1114_v34 }
 0x254   :  { %v2605_v57 = vpop.eup %2604  ;;  %v5174_v14 = vsel %vm4016_vm11, 4294967295, %v5173_v14  ;;  %v1325_v47 = vadd.f32 %v1321_v24, %v1133_v9  ;;  %v1132_v55 = vsel %vm3570_vm3, -8.0, %v1128_v27  ;;  %v1362_v31 = vmul.f32 %v1358_v11, %v1330_v25 }
 0x255   :  { %5175 = vst [vmem:[#allocation61_spill] sm:$0xff] %v5174_v14  ;;  %2606 = vrcp.f32 %v1314_v20  ;;  %v1247_v58 = vadd.f32 1.0, %v2605_v57  ;;  %vm956_vm7 = vcmp.le.f32.partialorder %v5171_v28, 8.0  ;;  %v4026_v10 = vsub.f32 1.0, %v4010_v32 }
 0x256   :  { %v1279_v19 = vmul.f32 %v3995_v45, %v4010_v32  ;;  %v1369_v4 = vmul.f32 %v1365_v21, %v1361_v38  ;;  %v1190_v53 = vmul.f32 -0.5, %v5177_v7  ;;  %v4034_v0 = vsel %vm4016_vm11, %v1325_v47, %v3355_v23  ;;  %vm4044_vm3 = vmand %vm952_vm8, %vm956_vm7 }
 0x257   :  { %2608 = vlog2.f32 %v1247_v58  ;;  %5178 = vst [vmem:[#allocation63_spill] sm:$0xff] %v4034_v0  ;;  %v1134_v2 = vsel %vm3687_vm12, -8.0, %v1130_v59  ;;  %v1035_v35 = vmul.f32 %v4026_v10, %v4010_v32  ;;  %v1303_v9 = vmul.f32 2.0, %v3995_v45  ;;  %v5246_v59 = vld [vmem:[#allocation55_spill] sm:$0xff] }
 0x258   :  { %v1283_v41 = vmul.f32 %v1279_v19, %v4010_v32  ;;  %v1373_v26 = vmax.f32 %v1369_v4, 1e-12  ;;  %v5179_v38 = vmov 0  ;;  %v1324_v63 = vadd.f32 %v1320_v56, %v1132_v55 }
 0x259   :  { %v5180_v38 = vsel %vm4044_vm3, 4294967295, %v5179_v38  ;;  %v1372_v23 = vmax.f32 %v1368_v15, 1e-12  ;;  %v1250_v33 = vmul.f32 -0.5, %v2605_v57  ;;  %v1343_v44 = vmul.f32 %v1303_v9, %v1035_v35  ;;  %v5190_v15 = vld [vmem:[#allocation45_spill] sm:$0xff] }
 0x25a   :  { %5181 = vst [vmem:[#allocation62_spill] sm:$0xff] %v5180_v38  ;;  %2610 = vlog2.f32 %v1373_v26  ;;  %v1191_v49 = vadd.f32 1.0, %v1190_v53  ;;  %v4051_v46 = vsel %vm4044_vm3, %v1324_v63, %v5171_v28  ;;  %v1193_v48 = vand.u32 2147483647, %v5177_v7 }
 0x25b   :  { %2612 = vlog2.f32 %v1372_v23  ;;  %5182 = vst [vmem:[#allocation64_spill] sm:$0xff] %v4051_v46  ;;  %v1189_v43 = vmul.f32 0.6931472, %v5183_v60  ;;  %v1251_v1 = vadd.f32 1.0, %v1250_v33  ;;  %vm954_vm12 = vcmp.ge.f32.partialorder %v5184_v5, -8.0 }
 0x25c   :  { %vm958_vm15 = vcmp.le.f32.partialorder %v5184_v5, 8.0  ;;  %v1192_v54 = vmul.f32 %v5177_v7, %v1191_v49  ;;  %v1253_v37 = vand.u32 2147483647, %v2605_v57  ;;  %vm4058_vm6 = vcmp.lt.f32.partialorder %v1193_v48, 0.0004427343 }
 0x25d   :  { %vm4064_vm10 = vmand %vm954_vm12, %vm958_vm15  ;;  %v5187_v62 = vmov 0  ;;  %v1252_v12 = vmul.f32 %v2605_v57, %v1251_v1  ;;  %v1143_v25 = vmax.f32 %v5190_v15, 0.0  ;;  %v1203_v61 = vmax.f32 %v3903_v40, 0.0 }
 0x25e   :  { %v1195_v51 = vsel %vm4058_vm6, %v1192_v54, %v1189_v43  ;;  %v5188_v62 = vsel %vm4064_vm10, 4294967295, %v5187_v62  ;;  %vm1254_vm13 = vcmp.lt.f32.partialorder %v1253_v37, 0.0004427343  ;;  %v1331_v48 = vmul.f32 %v3995_v45, %v3995_v45  ;;  %v5200_v37 = vld [vmem:[#allocation12_spill] sm:$0xff] }
 0x25f   :  { %v2607_v56 = vpop.eup %2606  ;;  %5189 = vst [vmem:[#allocation49_spill] sm:$0xff] %v5188_v62  ;;  %v1199_v21 = vadd.f32 %v1195_v51, %v1143_v25  ;;  %v5201_v18 = vmov 0  }
 0x260   :  { %v1322_v39 = vmul.f32 %v2607_v56, %v1294_v3  ;;  %v1366_v13 = vmul.f32 %v2607_v56, %v2607_v56 }
 0x261   :  { %v2609_v6 = vpop.eup %2608 }
 0x262   :  { %v1249_v34 = vmul.f32 0.6931472, %v2609_v6  ;;  %v1326_v52 = vadd.f32 %v1322_v39, %v1134_v2  ;;  %v1370_v8 = vmul.f32 %v1366_v13, %v1362_v31  ;;  %v5203_v39 = vld [vmem:[#allocation13_spill] sm:$0xff] }
 0x263   :  { %v5204_v13 = vld [vmem:[#allocation17_spill] sm:$0xff] }
 0x264   :  { %v2611_v24 = vpop.eup %2610  ;;  %v1255_v3 = vsel %vm1254_vm13, %v1252_v12, %v1249_v34  ;;  %v1374_v28 = vmax.f32 %v1370_v8, 1e-12  ;;  %v4073_v20 = vsel %vm4064_vm10, %v1326_v52, %v5184_v5  ;;  %v5244_v34 = vld [vmem:[#allocation53_spill] sm:$0xff] }
 0x265   :  { %5191 = vst [vmem:[#allocation60_spill] sm:$0xff] %v4073_v20  ;;  %v2613_v11 = vpop.eup %2612  ;;  %v1259_v29 = vadd.f32 %v1255_v3, %v1203_v61  ;;  %v4075_v27 = vmul.f32 0.6931472, %v2611_v24  ;;  %v1392_v54 = vpack.c.bf16 %v4073_v20, %v4051_v46  ;;  %v2740_v61 = vld [vmem:[%s4960_s4] ss:$0 sm:$0xff] }
 0x266   :  { %v4077_v57 = vmul.f32 0.6931472, %v2613_v11  ;;  %2614 = vlog2.f32 %v1374_v28 }
 0x267   :  { %5192 = vst [vmem:[#allocation59_spill] sm:$0xff] %v4075_v27  ;;  %v1263_v40 = vsel %vm3780_vm9, %v1199_v21, %v1259_v29  ;;  %v1271_v47 = vsel %vm3780_vm9, %v1259_v29, 1.0 }
 0x268   :  { %5193 = vst [vmem:[#allocation57_spill] sm:$0xff] %v4077_v57  ;;  %v1267_v30 = vsel %vm3756_vm2, 1.0, %v1263_v40  ;;  %v1275_v55 = vsel %vm3756_vm2, %v1199_v21, %v1271_v47  ;;  %v5206_v40 = vld [vmem:[#allocation15_spill] sm:$0xff]  ;;  %v5207_v47 = vld [vmem:[#allocation16_spill] sm:$0xff] }
 0x269   :  { %v1287_v58 = vmul.f32 %v1267_v30, %v1035_v35  ;;  %v1299_v19 = vadd.f32 %v1275_v55, %v1267_v30  ;;  %v1335_v4 = vmul.f32 %v1275_v55, %v4010_v32  ;;  %v1351_v50 = vmul.f32 %v1267_v30, %v4026_v10  ;;  %v5208_v30 = vld [vmem:[#allocation18_spill] sm:$0xff]  ;;  %v5209_v55 = vld [vmem:[#allocation19_spill] sm:$0xff] }
 0x26b   :  { %v1291_v7 = vadd.f32 %v1287_v58, %v1283_v41  ;;  %v1307_v53 = vsub.f32 %v1299_v19, %v1303_v9  ;;  %v1339_v2 = vmul.f32 %v1335_v4, %v4010_v32  ;;  %v1355_v26 = vmul.f32 %v1351_v50, %v4026_v10  ;;  %v5195_v10 = vld [vmem:[#allocation51_spill] sm:$0xff]  ;;  %v5210_v58 = vld [vmem:[#allocation20_spill] sm:$0xff]  ;;  %v5211_v19 = vld [vmem:[#allocation21_spill] sm:$0xff] }
 0x26c   :  { %vm955_vm2 = vcmp.ge.f32.partialorder %v5195_v10, -8.0  ;;  %vm959_vm9 = vcmp.le.f32.partialorder %v5195_v10, 8.0  ;;  %v5196_v9 = vmov 0  ;;  %v5212_v4 = vld [vmem:[#allocation22_spill] sm:$0xff]  ;;  %v5213_v50 = vld [vmem:[#allocation23_spill] sm:$0xff] }
 0x26d   :  { %v1311_v63 = vmul.f32 %v1307_v53, %v1035_v35  ;;  %v1347_v23 = vadd.f32 %v1343_v44, %v1339_v2  ;;  %v1295_v17 = vmul.f32 %v1291_v7, %v1127_v16  ;;  %vm4109_vm14 = vmand %vm955_vm2, %vm959_vm9  ;;  %v5214_v7 = vld [vmem:[#allocation24_spill] sm:$0xff]  ;;  %v5215_v53 = vld [vmem:[#allocation25_spill] sm:$0xff] }
 0x26e   :  { %v5197_v9 = vsel %vm4109_vm14, 4294967295, %v5196_v9  ;;  %v5216_v2 = vld [vmem:[#allocation26_spill] sm:$0xff] }
 0x26f   :  { %v1315_v33 = vadd.f32 %v1311_v63, %v3995_v45  ;;  %v1359_v49 = vadd.f32 %v1355_v26, %v1347_v23  ;;  %5198 = vst [vmem:[#allocation50_spill] sm:$0xff] %v5197_v9  ;;  %v5217_v26 = vld [vmem:[#allocation27_spill] sm:$0xff]  ;;  %v5218_v63 = vld [vmem:[#allocation28_spill] sm:$0xff]  ;;  %v5219_v23 = vld [vmem:[#allocation29_spill] sm:$0xff] }
 0x270   :  { %v2615_v60 = vpop.eup %2614 }
 0x271   :  { %2616 = vrcp.f32 %v1315_v33  ;;  %v1363_v43 = vmul.f32 %v1359_v49, %v1331_v48  ;;  %v4102_v41 = vmul.f32 0.6931472, %v2615_v60  ;;  %v5221_v33 = vld [vmem:[#allocation31_spill] sm:$0xff]  ;;  %v5222_v49 = vld [vmem:[#allocation32_spill] sm:$0xff]  ;;  %v5223_v48 = vld [vmem:[#allocation33_spill] sm:$0xff] }
 0x272   :  { %v5224_v60 = vld [vmem:[#allocation34_spill] sm:$0xff] }
 0x273   :  { %5194 = vst [vmem:[#allocation58_spill] sm:$0xff] %v4102_v41 }
 0x27b   :  { %v2617_v42 = vpop.eup %2616 }
 0x27c   :  { %v1323_v16 = vmul.f32 %v2617_v42, %v1295_v17  ;;  %v1367_v35 = vmul.f32 %v2617_v42, %v2617_v42  ;;  %v5220_v17 = vld [vmem:[#allocation30_spill] sm:$0xff]  ;;  %v5227_v42 = vld [vmem:[#allocation37_spill] sm:$0xff] }
 0x27e   :  { %v1327_v45 = vadd.f32 %v1323_v16, %v3982_v22  ;;  %v1371_v44 = vmul.f32 %v1367_v35, %v1363_v43  ;;  %v5202_v22 = vld [vmem:[#allocation14_spill] sm:$0xff]  ;;  %v5225_v43 = vld [vmem:[#allocation35_spill] sm:$0xff] }
 0x280   :  { %v1375_v1 = vmax.f32 %v1371_v44, 1e-12  ;;  %v4117_v5 = vsel %vm4109_vm14, %v1327_v45, %v5195_v10  ;;  %v5226_v10 = vld [vmem:[#allocation36_spill] sm:$0xff] }
 0x281   :  { %5199 = vst [vmem:[#allocation45_spill] sm:$0xff] %v4117_v5  ;;  %v1393_v56 = vpack.c.bf16 %v4117_v5, %v4034_v0 }
 0x282   :  { %2618 = vlog2.f32 %v1375_v1 }
 0x283   :  { %1426 = vmatprep.mubr.bf16.mxu0 %v1393_v56 }
 0x284   :  { %1427 = vmatmul.mubr.bf16.vlgmr.msra.gmra.mrb[12].mxu0 %v1392_v54 }
 0x285   :  { %1614 = vmatpush1.bf16.msra.mxu0 %v5200_v37  ;;  %1645 = vmatprep.mubr.bf16.mxu0 %v5201_v18 }
 0x286   :  { %1615 = vmatprep.subr.bf16.mxu0 %v5202_v22 }
 0x289   :  { %1616 = vmatpush1.bf16.msra.mxu0 %v5203_v39  ;;  %v5228_v39 = vld [vmem:[#allocation38_spill] sm:$0xff] }
 0x28a   :  { %1699 = vmatprep.subr.bf16.mxu0 %v5204_v13 }
 0x28c   :  { %v2619_v6 = vpop.eup %2618 }
 0x28d   :  { %v4128_v51 = vmul.f32 0.6931472, %v2619_v6  ;;  %v5229_v6 = vld [vmem:[#allocation39_spill] sm:$0xff] }
 0x28f   :  { %5205 = vst [vmem:[#allocation51_spill] sm:$0xff] %v4128_v51 }
 0x357   :  { %v2472_v12 = vpop.f32.mrb[12].mxu0 }
 0x358   :  { %v2473_v52 = vpop.f32.mrb[13].mxu0 }
 0x359   :  { %v2474_v8 = vadd.f32 %v2473_v52, %v2472_v12  ;;  %v2475_v15 = vpop.f32.mrb[14].mxu0  ;;  %v5230_v52 = vld [vmem:[#allocation40_spill] sm:$0xff] }
 0x35a   :  { %v2476_v25 = vpop.f32.mrb[15].mxu0 }
 0x35b   :  { %v1429_v24 = vadd.f32 %v2740_v61, %v2474_v8  ;;  %v2477_v3 = vadd.f32 %v2476_v25, %v2475_v15 }
 0x35d   :  { %v1432_v28 = vadd.f32 %v2740_v61, %v2477_v3  ;;  %v1435_v11 = vmax.f32 %v1429_v24, 0.0  ;;  %v5231_v61 = vld [vmem:[#allocation41_spill] sm:$0xff]  ;;  %v5232_v3 = vld [vmem:[#allocation42_spill] sm:$0xff] }
 0x35f   :  { %v1436_v21 = vmax.f32 %v1432_v28, 0.0 }
 0x361   :  { %v1437_v29 = vpack.c.bf16 %v1436_v21, %v1435_v11  ;;  %v5233_v11 = vld [vmem:[#allocation43_spill] sm:$0xff] }
 0x363   :  { %2422 = vmatmul.mubr.msk.bf16.vlgmr.msra.gmra.mrb[24].mxu1 %vm524_vm0, %v1437_v29  ;;  %2426 = vmatmul.mubr.msk.bf16.vlgmr.msra.gmra.mrb[16].mxu0 %vm524_vm0, %v1437_v29 }
 0x364   :  { %1485 = vmatpush1.bf16.msra.mxu1 %v5206_v40  ;;  %1700 = vmatpush1.bf16.msra.mxu0 %v5207_v47 }
 0x365   :  { %1486 = vmatprep.subr.bf16.mxu1 %v5208_v30  ;;  %1701 = vmatprep.subr.bf16.mxu0 %v5209_v55 }
 0x366   :  { %1516 = vmatprep.mubr.bf16.mxu1 %v5201_v18  ;;  %1731 = vmatprep.mubr.bf16.mxu0 %v5201_v18 }
 0x368   :  { %1487 = vmatpush1.bf16.msra.mxu1 %v5210_v58  ;;  %1702 = vmatpush1.bf16.msra.mxu0 %v5211_v19 }
 0x369   :  { %1527 = vmatprep.subr.bf16.mxu1 %v5212_v4 }
 0x36b   :  { %2423 = vmatmul.mubr.msk.bf16.vlgmr.msra.gmra.mrb[28].mxu1 %vm524_vm0, %v1437_v29  ;;  %2428 = vmatmul.mubr.msk.bf16.vlgmr.msra.gmra.mrb[20].mxu0 %vm524_vm0, %v1437_v29 }
 0x36c   :  { %1528 = vmatpush1.bf16.msra.mxu1 %v5213_v50  ;;  %1559 = vmatprep.mubr.bf16.mxu1 %v5201_v18 }
 0x36d   :  { %1529 = vmatprep.subr.bf16.mxu1 %v5214_v7 }
 0x370   :  { %1530 = vmatpush1.bf16.msra.mxu1 %v5215_v53 }
 0x371   :  { %1570 = vmatprep.subr.bf16.mxu1 %v5216_v2 }
 0x373   :  { %2424 = vmatmul.mubr.msk.bf16.vlgmr.msra.gmra.mrb[32].mxu1 %vm524_vm0, %v1437_v29 }
 0x374   :  { %1571 = vmatpush1.bf16.msra.mxu1 %v5217_v26  ;;  %1602 = vmatprep.mubr.bf16.mxu1 %v5201_v18 }
 0x375   :  { %1572 = vmatprep.subr.bf16.mxu1 %v5218_v63 }
 0x378   :  { %1573 = vmatpush1.bf16.msra.mxu1 %v5219_v23 }
 0x379   :  { %1656 = vmatprep.subr.bf16.mxu1 %v5220_v17 }
 0x37b   :  { %2425 = vmatmul.mubr.msk.bf16.vlgmr.msra.gmra.mrb[36].mxu1 %vm524_vm0, %v1437_v29 }
 0x37c   :  { %1657 = vmatpush1.bf16.msra.mxu1 %v5221_v33  ;;  %1688 = vmatprep.mubr.bf16.mxu1 %v5201_v18 }
 0x37d   :  { %1658 = vmatprep.subr.bf16.mxu1 %v5222_v49 }
 0x380   :  { %1659 = vmatpush1.bf16.msra.mxu1 %v5223_v48 }
 0x381   :  { %1742 = vmatprep.subr.bf16.mxu1 %v5224_v60 }
 0x383   :  { %2427 = vmatmul.mubr.msk.bf16.vlgmr.msra.gmra.mrb[40].mxu1 %vm524_vm0, %v1437_v29 }
 0x384   :  { %1743 = vmatpush1.bf16.msra.mxu1 %v5225_v43  ;;  %1774 = vmatprep.mubr.bf16.mxu1 %v5201_v18 }
 0x385   :  { %1744 = vmatprep.subr.bf16.mxu1 %v5226_v10 }
 0x388   :  { %1745 = vmatpush1.bf16.msra.mxu1 %v5227_v42 }
 0x38b   :  { %2429 = vmatmul.mubr.msk.bf16.vlgmr.msra.gmra.mrb[44].mxu1 %vm524_vm0, %v1437_v29 }
 0x436   :  { %v1475_v16 = vpop.f32.mrb[24].mxu1  ;;  %v4172_v35 = vpop.f32.mrb[16].mxu0 }
 0x437   :  { %v1477_v45 = vpop.f32.mrb[25].mxu1  ;;  %v4174_v44 = vpop.f32.mrb[17].mxu0  ;;  %v1476_v13 = vadd.f32 %v1475_v16, %v5228_v39 }
 0x438   :  { %v1479_v1 = vpop.f32.mrb[26].mxu1  ;;  %v4176_v56 = vpop.f32.mrb[18].mxu0  ;;  %v1478_v24 = vadd.f32 %v1477_v45, %v5231_v61  ;;  %v5235_v45 = vld [vmem:[#allocation44_spill] sm:$0xff] }
 0x439   :  { %v1481_v54 = vpop.f32.mrb[27].mxu1  ;;  %v4178_v37 = vpop.f32.mrb[19].mxu0  ;;  %v4191_v47 = vadd.f32 %v1479_v1, %v5228_v39 }
 0x43a   :  { %v4198_v50 = vadd.f32 %v1481_v54, %v5231_v61 }
 0x43e   :  { %v1518_v22 = vpop.f32.mrb[28].mxu1  ;;  %v1733_v18 = vpop.f32.mrb[20].mxu0 }
 0x43f   :  { %v1519_v12 = vadd.f32 %v1518_v22, %v5229_v6  ;;  %v4183_v8 = vadd.f32 %v1733_v18, %v5230_v52  ;;  %v1520_v15 = vpop.f32.mrb[29].mxu1  ;;  %v1735_v25 = vpop.f32.mrb[21].mxu0  ;;  %v5236_v22 = vld [vmem:[#allocation46_spill] sm:$0xff] }
 0x440   :  { %v1521_v28 = vadd.f32 %v1520_v15, %v5232_v3  ;;  %v4188_v21 = vadd.f32 %v1735_v25, %v5233_v11  ;;  %v1522_v29 = vpop.f32.mrb[30].mxu1  ;;  %v1737_v40 = vpop.f32.mrb[22].mxu0 }
 0x441   :  { %v1785_v30 = vmax.f32 %v1476_v13, %v1519_v12  ;;  %v2057_v55 = vand.u32 2147483647, %v4183_v8  ;;  %v4195_v58 = vadd.f32 %v1522_v29, %v5229_v6  ;;  %v1524_v19 = vpop.f32.mrb[31].mxu1  ;;  %v1739_v4 = vpop.f32.mrb[23].mxu0  ;;  %v4202_v2 = vadd.f32 %v1737_v40, %v5230_v52 }
 0x442   :  { %v1786_v7 = vmax.f32 %v1478_v24, %v1521_v28  ;;  %v2058_v53 = vand.u32 2147483647, %v4188_v21  ;;  %v4207_v23 = vadd.f32 %v1524_v19, %v5232_v3  ;;  %v4210_v17 = vadd.f32 %v1739_v4, %v5233_v11 }
 0x443   :  { %v2061_v26 = vsub.f32 0.0, %v2057_v55  ;;  %v1787_v63 = vmax.f32 %v4191_v47, %v4195_v58  ;;  %v2059_v49 = vand.u32 2147483647, %v4202_v2 }
 0x444   :  { %5234 = vst [vmem:[#allocation12_spill] sm:$0xff] %v4210_v17  ;;  %v2062_v33 = vsub.f32 0.0, %v2058_v53  ;;  %v1788_v60 = vmax.f32 %v4198_v50, %v4207_v23  ;;  %v2060_v16 = vand.u32 2147483647, %v4210_v17 }
 0x445   :  { %v2065_v48 = vmul.f32 1.442695, %v2061_v26  ;;  %v2063_v10 = vsub.f32 0.0, %v2059_v49 }
 0x446   :  { %v2067_v43 = vmul.f32 1.442695, %v2062_v33  ;;  %v1561_v42 = vpop.f32.mrb[32].mxu1  ;;  %v2064_v11 = vsub.f32 0.0, %v2060_v16 }
 0x447   :  { %2620 = vpow2.f32 %v2065_v48  ;;  %v1562_v1 = vadd.f32 %v1561_v42, %v5235_v45  ;;  %v1563_v54 = vpop.f32.mrb[33].mxu1  ;;  %v2069_v25 = vmul.f32 1.442695, %v2063_v10 }
 0x448   :  { %2622 = vpow2.f32 %v2067_v43  ;;  %v1564_v18 = vadd.f32 %v1563_v54, %v5236_v22  ;;  %v1565_v39 = vpop.f32.mrb[34].mxu1 }
 0x449   :  { %v1789_v6 = vmax.f32 %v1785_v30, %v1562_v1  ;;  %v1566_v52 = vadd.f32 %v1565_v39, %v5235_v45  ;;  %v1567_v15 = vpop.f32.mrb[35].mxu1  ;;  %2624 = vpow2.f32 %v2069_v25 }
 0x44a   :  { %v1790_v61 = vmax.f32 %v1786_v7, %v1564_v18  ;;  %v4220_v3 = vadd.f32 %v1567_v15, %v5236_v22  ;;  %v5237_v22 = vld [vmem:[#allocation10_spill] sm:$0xff]  ;;  %v5240_v15 = vld [vmem:[#allocation47_spill] sm:$0xff] }
 0x44b   :  { %v1793_v29 = vsub.f32 %v1476_v13, %v1789_v6  ;;  %v1805_v40 = vsub.f32 %v1519_v12, %v1789_v6  ;;  %v1817_v55 = vsub.f32 %v1562_v1, %v1789_v6  ;;  %v1791_v26 = vmax.f32 %v1787_v63, %v1566_v52  ;;  %v5239_v6 = vld [vmem:[#allocation11_spill] sm:$0xff] }
 0x44c   :  { %v1794_v19 = vsub.f32 %v1478_v24, %v1790_v61  ;;  %v1806_v4 = vsub.f32 %v1521_v28, %v1790_v61  ;;  %v1818_v53 = vsub.f32 %v1564_v18, %v1790_v61  ;;  %v1792_v30 = vmax.f32 %v1788_v60, %v4220_v3 }
 0x44d   :  { %v1797_v33 = vmul.f32 1.442695, %v1793_v29  ;;  %v1809_v49 = vmul.f32 1.442695, %v1805_v40  ;;  %v1821_v48 = vmul.f32 1.442695, %v1817_v55  ;;  %v1795_v7 = vsub.f32 %v4191_v47, %v1791_v26 }
 0x44e   :  { %v1799_v43 = vmul.f32 1.442695, %v1794_v19  ;;  %v1811_v10 = vmul.f32 1.442695, %v1806_v4  ;;  %v1807_v42 = vsub.f32 %v4195_v58, %v1791_v26  ;;  %v1819_v13 = vsub.f32 %v1566_v52, %v1791_v26  ;;  %v1604_v24 = vpop.f32.mrb[36].mxu1  ;;  %v5242_v40 = vld [vmem:[#allocation48_spill] sm:$0xff] }
 0x44f   :  { %2626 = vpow2.f32 %v1797_v33  ;;  %v1796_v12 = vsub.f32 %v4198_v50, %v1792_v30  ;;  %v1808_v28 = vsub.f32 %v4207_v23, %v1792_v30  ;;  %v1820_v63 = vsub.f32 %v4220_v3, %v1792_v30  ;;  %v1606_v16 = vpop.f32.mrb[37].mxu1  ;;  %v5238_v23 = vld [vmem:[#allocation8_spill] sm:$0xff] }
 0x450   :  { %2628 = vpow2.f32 %v1809_v49  ;;  %v2071_v1 = vmul.f32 1.442695, %v2064_v11  ;;  %v1608_v47 = vpop.f32.mrb[38].mxu1  ;;  %v4235_v18 = vclamps-f32 %v5237_v22, 8.0  ;;  %v4238_v39 = vclamps-f32 %v5238_v23, 8.0  ;;  %v5241_v11 = vld [vmem:[#allocation9_spill] sm:$0xff] }
 0x451   :  { %v4228_v45 = vpop.eup %2620  ;;  %2630 = vpow2.f32 %v1821_v48  ;;  %v1610_v54 = vpop.f32.mrb[39].mxu1  ;;  %v4241_v52 = vclamps-f32 %v5239_v6, 8.0  ;;  %v4245_v25 = vadd.f32 %v4172_v35, %v5240_v15  ;;  %v1823_v3 = vmul.f32 1.442695, %v1818_v53 }
 0x452   :  { %v4230_v60 = vpop.eup %2622  ;;  %2632 = vpow2.f32 %v1799_v43  ;;  %v2073_v58 = vadd.f32 1.0, %v4228_v45  ;;  %v2076_v61 = vmul.f32 -0.5, %v4228_v45  ;;  %v4249_v29 = vclamps-f32 %v5241_v11, 8.0 }
 0x453   :  { %2634 = vpow2.f32 %v1811_v10  ;;  %v2082_v50 = vadd.f32 1.0, %v4230_v60  ;;  %v4253_v55 = vadd.f32 %v4174_v44, %v5242_v40  ;;  %v4257_v19 = vadd.f32 %v4176_v56, %v5240_v15  ;;  %v4264_v48 = vpop.eup %2624 }
 0x454   :  { %2636 = vpow2.f32 %v2071_v1  ;;  %v1801_v4 = vmul.f32 1.442695, %v1795_v7  ;;  %v4261_v35 = vadd.f32 %v4178_v37, %v5242_v40  ;;  %v1813_v33 = vmul.f32 1.442695, %v1807_v42  ;;  %v5243_v37 = vld [vmem:[#allocation52_spill] sm:$0xff] }
 0x455   :  { %2638 = vlog2.f32 %v2073_v58  ;;  %v1825_v30 = vmul.f32 1.442695, %v1819_v13  ;;  %v1803_v56 = vmul.f32 1.442695, %v1796_v12  ;;  %v2077_v7 = vadd.f32 1.0, %v2076_v61 }
 0x456   :  { %v1690_v26 = vpop.f32.mrb[40].mxu1  ;;  %2640 = vlog2.f32 %v2082_v50  ;;  %v2085_v1 = vmul.f32 -0.5, %v4230_v60  ;;  %v1605_v15 = vadd.f32 %v1604_v24, %v5243_v37  ;;  %v1815_v58 = vmul.f32 1.442695, %v1808_v28 }
 0x457   :  { %v1692_v49 = vpop.f32.mrb[41].mxu1  ;;  %2642 = vpow2.f32 %v1823_v3  ;;  %v1607_v32 = vadd.f32 %v1606_v16, %v5244_v34  ;;  %v4277_v13 = vadd.f32 %v1608_v47, %v5243_v37  ;;  %v1827_v61 = vmul.f32 1.442695, %v1820_v63 }
 0x458   :  { %v1694_v43 = vpop.f32.mrb[42].mxu1  ;;  %2644 = vpow2.f32 %v1801_v4  ;;  %v1949_v24 = vmax.f32 %v1605_v15, %v4245_v25  ;;  %v4290_v16 = vadd.f32 %v1610_v54, %v5244_v34  ;;  %v1693_v31 = vadd.f32 %v1692_v49, %v5246_v59 }
 0x459   :  { %v4267_v10 = vpop.eup %2626  ;;  %v4271_v40 = vpop.f32.mrb[43].mxu1  ;;  %2646 = vpow2.f32 %v1813_v33  ;;  %v1950_v4 = vmax.f32 %v1607_v32, %v4253_v55  ;;  %v1951_v28 = vmax.f32 %v4277_v13, %v4257_v19  ;;  %v5245_v33 = vld [vmem:[#allocation54_spill] sm:$0xff]  ;;  %v2086_v54 = vadd.f32 1.0, %v2085_v1 }
 0x45a   :  { %v4273_v42 = vpop.eup %2628  ;;  %2648 = vpow2.f32 %v1825_v30  ;;  %v1691_v63 = vadd.f32 %v1690_v26, %v5245_v33  ;;  %v4302_v53 = vadd.f32 %v1694_v43, %v5245_v33  ;;  %v2091_v9 = vadd.f32 1.0, %v4264_v48 }
 0x45b   :  { %v4279_v12 = vpop.eup %2630  ;;  %v1829_v50 = vadd.f32 %v4273_v42, %v4267_v10  ;;  %2650 = vpow2.f32 %v1803_v56  ;;  %v1954_v56 = vmax.f32 %v1950_v4, %v1693_v31  ;;  %v2079_v33 = vand.u32 2147483647, %v4228_v45 }
 0x45c   :  { %v4284_v3 = vpop.eup %2632  ;;  %2652 = vpow2.f32 %v1815_v58  ;;  %v1955_v58 = vmax.f32 %v1951_v28, %v4302_v53  ;;  %v4318_v11 = vmul.f32 %v4228_v45, %v2077_v7  ;;  %v2088_v49 = vand.u32 2147483647, %v4230_v60 }
 0x45d   :  { %v4292_v47 = vpop.eup %2634  ;;  %v1833_v37 = vadd.f32 %v4279_v12, %v1829_v50  ;;  %v1953_v50 = vmax.f32 %v1949_v24, %v1691_v63  ;;  %v1958_v28 = vsub.f32 %v1607_v32, %v1954_v56  ;;  %v4327_v62 = vmul.f32 %v4230_v60, %v2086_v54 }
 0x45e   :  { %v1830_v30 = vadd.f32 %v4292_v47, %v4284_v3  ;;  %v4304_v34 = vpop.f32.mrb[44].mxu1  ;;  %v4306_v26 = vpop.eup %2636  ;;  %vm4337_vm0 = vcmp.lt.f32.partialorder %v2079_v33, 0.0004427343  ;;  %vm4376_vm1 = vcmp.lt.f32.partialorder %v2088_v49, 0.0004427343 }
 0x45f   :  { %2654 = vrcp.f32 %v1833_v37  ;;  %v1778_v51 = vpop.f32.mrb[45].mxu1  ;;  %v2639_v43 = vpop.eup %2638  ;;  %v1957_v5 = vsub.f32 %v1605_v15, %v1953_v50  ;;  %v1969_v1 = vsub.f32 %v4245_v25, %v1953_v50  ;;  %v1981_v24 = vsub.f32 %v1691_v63, %v1953_v50 }
 0x460   :  { %2656 = vpow2.f32 %v1827_v61  ;;  %v4311_v44 = vpop.f32.mrb[46].mxu1  ;;  %v2641_v37 = vpop.eup %2640  ;;  %v4322_v61 = vmul.f32 -0.5, %v4264_v48  ;;  %v4332_v20 = vmul.f32 0.6931472, %v2639_v43  ;;  %v1963_v54 = vmul.f32 1.442695, %v1958_v28 }
 0x461   :  { %v4315_v4 = vpop.f32.mrb[47].mxu1  ;;  %v4324_v41 = vpop.eup %2642  ;;  %v1961_v15 = vmul.f32 1.442695, %v1957_v5  ;;  %v1973_v63 = vmul.f32 1.442695, %v1969_v1  ;;  %2658 = vlog2.f32 %v2091_v9  ;;  %v1970_v5 = vsub.f32 %v4253_v55, %v1954_v56 }
 0x462   :  { %v4330_v50 = vpop.eup %2644  ;;  %v1834_v45 = vadd.f32 %v4324_v41, %v1830_v30  ;;  %v1985_v7 = vmul.f32 1.442695, %v1981_v24  ;;  %v4341_v60 = vmul.f32 0.6931472, %v2641_v37  ;;  %v1982_v30 = vsub.f32 %v1693_v31, %v1954_v56 }
 0x463   :  { %v4335_v6 = vpop.eup %2646  ;;  %2660 = vpow2.f32 %v1961_v15  ;;  %v1697_v43 = vadd.f32 %v4271_v40, %v5246_v59  ;;  %v1975_v24 = vmul.f32 1.442695, %v1970_v5  ;;  %v1959_v37 = vsub.f32 %v4277_v13, %v1955_v58 }
 0x464   :  { %v4344_v1 = vpop.eup %2648  ;;  %2662 = vrcp.f32 %v1834_v45  ;;  %v1831_v9 = vadd.f32 %v4335_v6, %v4330_v50  ;;  %v1971_v28 = vsub.f32 %v4257_v19, %v1955_v58  ;;  %v1987_v45 = vmul.f32 1.442695, %v1982_v30 }
 0x465   :  { %v4350_v33 = vpop.eup %2650  ;;  %2664 = vpow2.f32 %v1973_v63  ;;  %v1983_v25 = vsub.f32 %v4302_v53, %v1955_v58  ;;  %v1965_v40 = vmul.f32 1.442695, %v1959_v37  ;;  %v5249_v5 = vmax.f32 %v4290_v16, %v4261_v35  ;;  %v5250_v53 = vld [vmem:[#allocation56_spill] sm:$0xff] }
 0x466   :  { %v4354_v15 = vpop.eup %2652  ;;  %v1835_v55 = vadd.f32 %v4344_v1, %v1831_v9  ;;  %2666 = vpow2.f32 %v1985_v7  ;;  %v1977_v56 = vmul.f32 1.442695, %v1971_v28  ;;  %v4368_v58 = vadd.f32 %v4304_v34, %v5250_v53 }
 0x467   :  { %v1832_v59 = vadd.f32 %v4354_v15, %v4350_v33  ;;  %2668 = vpow2.f32 %v1963_v54  ;;  %v1989_v19 = vmul.f32 1.442695, %v1983_v25  ;;  %v1956_v9 = vmax.f32 %v5249_v5, %v1697_v43 }
 0x468   :  { %2670 = vrcp.f32 %v1835_v55  ;;  %v4371_v54 = vadd.f32 %v1778_v51, %v3407_v36  ;;  %v2081_v51 = vsel %vm4337_vm0, %v4318_v11, %v4332_v20  ;;  %v5256_v11 = vmax.f32 %v4183_v8, 0.0 }
 0x469   :  { %v2655_v31 = vpop.eup %2654  ;;  %2672 = vpow2.f32 %v1975_v24  ;;  %v1960_v24 = vsub.f32 %v4290_v16, %v1956_v9  ;;  %v1972_v34 = vsub.f32 %v4261_v35, %v1956_v9  ;;  %v1984_v55 = vsub.f32 %v1697_v43, %v1956_v9 }
 0x46a   :  { %v4360_v63 = vpop.eup %2656  ;;  %v1841_v13 = vmul.f32 16.0, %v2655_v31  ;;  %2674 = vpow2.f32 %v1987_v45  ;;  %v5253_v43 = vmov 0 }
 0x46b   :  { %v1836_v7 = vadd.f32 %v4360_v63, %v1832_v59  ;;  %v4382_v31 = vpop.eup %2658  ;;  %v1967_v49 = vmul.f32 1.442695, %v1960_v24  ;;  %v1979_v45 = vmul.f32 1.442695, %v1972_v34  ;;  %v1991_v16 = vmul.f32 1.442695, %v1984_v55 }
 0x46c   :  { %v1845_v30 = vmul.f32 %v4267_v10, %v1841_v13  ;;  %v1849_v37 = vmul.f32 %v4273_v42, %v1841_v13  ;;  %v1853_v25 = vmul.f32 %v4279_v12, %v1841_v13  ;;  %v2117_v42 = vand.u32 2147483647, %v4368_v58 }
 0x46d   :  { %2676 = vrcp.f32 %v1836_v7  ;;  %v4389_v12 = vpop.eup %2660  ;;  %v5257_v55 = vmov 0 }
 0x46e   :  { %v1857_v10 = vadd.f32 -8.0, %v1845_v30  ;;  %2678 = vpow2.f32 %v1965_v40  ;;  %v2663_v59 = vpop.eup %2662  ;;  %v2121_v32 = vsub.f32 0.0, %v2117_v42  ;;  %v4400_v40 = vadd.f32 %v2081_v51, %v5256_v11 }
 0x46f   :  { %2680 = vpow2.f32 %v1977_v56  ;;  %v4396_v20 = vpop.eup %2664  ;;  %v1842_v13 = vmul.f32 16.0, %v2663_v59  ;;  %v2118_v56 = vand.u32 2147483647, %v4371_v54 }
 0x470   :  { %2682 = vpow2.f32 %v1989_v19  ;;  %v1861_v35 = vadd.f32 %v1857_v10, %v1849_v37  ;;  %vm4392_vm5 = vcmp.lt.f32.partialorder %v4235_v18, %v1857_v10  ;;  %v4406_v19 = vpop.eup %2666  ;;  %v1993_v5 = vadd.f32 %v4396_v20, %v4389_v12 }
 0x471   :  { %v5254_v43 = vsel %vm4392_vm5, 4294967295, %v5253_v43  ;;  %2684 = vpow2.f32 %v1967_v49  ;;  %vm1889_vm8 = vmxor %vm4392_vm5, %vm2790_vm4  ;;  %v2125_v9 = vmul.f32 1.442695, %v2121_v32  ;;  %v4411_v8 = vpop.eup %2668  ;;  %v1846_v7 = vmul.f32 %v4284_v3, %v1842_v13 }
 0x472   :  { %5255 = vst [vmem:[#allocation14_spill] sm:$0xff] %v5254_v43  ;;  %2686 = vpow2.f32 %v1979_v45  ;;  %vm1893_vm7 = vcmp.lt.f32.partialorder %v4235_v18, %v1861_v35  ;;  %v1850_v24 = vmul.f32 %v4292_v47, %v1842_v13  ;;  %v1854_v34 = vmul.f32 %v4324_v41, %v1842_v13  ;;  %v2671_v51 = vpop.eup %2670 }
 0x473   :  { %2688 = vpow2.f32 %v1991_v16  ;;  %vm4416_vm12 = vmand %vm1889_vm8, %vm1893_vm7  ;;  %v1997_v42 = vadd.f32 %v4406_v19, %v1993_v5  ;;  %v4425_v3 = vpop.eup %2672  ;;  %v1858_v47 = vadd.f32 -8.0, %v1846_v7  ;;  %v1843_v59 = vmul.f32 16.0, %v2671_v51 }
 0x474   :  { %v5258_v55 = vsel %vm4416_vm12, 4294967295, %v5257_v55  ;;  %v1901_v49 = vsel %vm4416_vm12, %v1849_v37, %v1853_v25  ;;  %v1913_v45 = vsel %vm4416_vm12, %v1857_v10, %v1861_v35  ;;  %2690 = vpow2.f32 %v2125_v9  ;;  %v4433_v32 = vpop.eup %2674 }
 0x475   :  { %5259 = vst [vmem:[#allocation13_spill] sm:$0xff] %v5258_v55  ;;  %v1905_v41 = vsel %vm4392_vm5, %v1845_v30, %v1901_v49  ;;  %v4431_v16 = vsel %vm4392_vm5, -8.0, %v1913_v45  ;;  %v2090_v37 = vsel %vm4376_vm1, %v4327_v62, %v4341_v60  ;;  %2692 = vrcp.f32 %v1997_v42  ;;  %v5307_v62 = vld [vmem:[#allocation8_spill] sm:$0xff] }
 0x476   :  { %v1994_v25 = vadd.f32 %v4425_v3, %v4411_v8  ;;  %v1909_v10 = vmax.f32 %v1905_v41, 1e-06  ;;  %v1847_v11 = vmul.f32 %v4330_v50, %v1843_v59  ;;  %v1851_v30 = vmul.f32 %v4335_v6, %v1843_v59 }
 0x477   :  { %v2677_v35 = vpop.eup %2676  ;;  %v1855_v13 = vmul.f32 %v4344_v1, %v1843_v59  ;;  %v1862_v5 = vadd.f32 %v1858_v47, %v1850_v24  ;;  %vm4448_vm15 = vcmp.lt.f32.partialorder %v4238_v39, %v1858_v47  ;;  %v5262_v50 = vmax.f32 %v4188_v21, 0.0 }
 0x478   :  { %v4444_v9 = vpop.eup %2678  ;;  %v1844_v51 = vmul.f32 16.0, %v2677_v35  ;;  %v1998_v49 = vadd.f32 %v4433_v32, %v1994_v25  ;;  %2694 = vrcp.f32 %v1909_v10  ;;  %v1859_v6 = vadd.f32 -8.0, %v1847_v11  ;;  %vm1890_vm6 = vmxor %vm4448_vm15, %vm2790_vm4 }
 0x479   :  { %v4452_v60 = vpop.eup %2680  ;;  %v4456_v28 = vadd.f32 %v2090_v37, %v5262_v50  ;;  %vm1894_vm13 = vcmp.lt.f32.partialorder %v4238_v39, %v1862_v5  ;;  %v2122_v1 = vsub.f32 0.0, %v2118_v56 }
 0x47a   :  { %v4462_v42 = vpop.eup %2682  ;;  %v4465_v45 = vmul.f32 %v4350_v33, %v1844_v51  ;;  %v4468_v59 = vmul.f32 %v4354_v15, %v1844_v51  ;;  %v4471_v21 = vmul.f32 %v4360_v63, %v1844_v51  ;;  %2696 = vrcp.f32 %v1998_v49  ;;  %vm4473_vm2 = vmand %vm1890_vm6, %vm1894_vm13 }
 0x47b   :  { %v4477_v37 = vpop.eup %2684  ;;  %v1995_v56 = vadd.f32 %v4452_v60, %v4444_v9  ;;  %v1902_v33 = vsel %vm4473_vm2, %v1850_v24, %v1854_v34  ;;  %v1914_v15 = vsel %vm4473_vm2, %v1858_v47, %v1862_v5  ;;  %v2127_v25 = vmul.f32 1.442695, %v2122_v1 }
 0x47c   :  { %v4485_v10 = vpop.eup %2686  ;;  %v1906_v63 = vsel %vm4448_vm15, %v1846_v7, %v1902_v33  ;;  %v4491_v35 = vsel %vm4448_vm15, -8.0, %v1914_v15  ;;  %v4495_v51 = vadd.f32 %v4311_v44, %v5250_v53  ;;  %v1863_v49 = vadd.f32 %v1859_v6, %v1851_v30  ;;  %v5308_v33 = vld [vmem:[#allocation64_spill] sm:$0xff] }
 0x47d   :  { %v4497_v50 = vpop.eup %2688  ;;  %v1999_v24 = vadd.f32 %v4462_v42, %v1995_v56  ;;  %v1996_v34 = vadd.f32 %v4485_v10, %v4477_v37  ;;  %v1910_v5 = vmax.f32 %v1906_v63, 1e-06  ;;  %2698 = vpow2.f32 %v2127_v25 }
 0x47e   :  { %v2691_v7 = vpop.eup %2690  ;;  %vm4505_vm9 = vcmp.lt.f32.partialorder %v4241_v52, %v1859_v6  ;;  %vm1895_vm0 = vcmp.lt.f32.partialorder %v4241_v52, %v1863_v49  ;;  %v4515_v63 = vadd.f32 -8.0, %v4465_v45  ;;  %v1925_v25 = vsub.f32 %v4235_v18, %v4431_v16 }
 0x47f   :  { %2700 = vrcp.f32 %v1999_v24  ;;  %v2000_v44 = vadd.f32 %v4497_v50, %v1996_v34  ;;  %v2133_v53 = vadd.f32 1.0, %v2691_v7  ;;  %v2136_v56 = vmul.f32 -0.5, %v2691_v7  ;;  %vm1891_vm1 = vmxor %vm4505_vm9, %vm2790_vm4  ;;  %v2693_v15 = vpop.eup %2692 }
 0x480   :  { %2702 = vrcp.f32 %v1910_v5  ;;  %vm4519_vm8 = vmand %vm1891_vm1, %vm1895_vm0  ;;  %v2119_v24 = vand.u32 2147483647, %v4495_v51  ;;  %v2005_v34 = vmul.f32 16.0, %v2693_v15  ;;  %v2139_v47 = vand.u32 2147483647, %v2691_v7 }
 0x481   :  { %2704 = vrcp.f32 %v2000_v44  ;;  %v1903_v17 = vsel %vm4519_vm8, %v1851_v30, %v1855_v13  ;;  %v2137_v14 = vadd.f32 1.0, %v2136_v56  ;;  %v1915_v18 = vsel %vm4519_vm8, %v1859_v6, %v1863_v49 }
 0x482   :  { %v2695_v27 = vpop.eup %2694  ;;  %2706 = vlog2.f32 %v2133_v53  ;;  %v1907_v0 = vsel %vm4505_vm9, %v1847_v11, %v1903_v17  ;;  %v2009_v16 = vmul.f32 %v4389_v12, %v2005_v34  ;;  %v2013_v5 = vmul.f32 %v4396_v20, %v2005_v34 }
 0x483   :  { %v2017_v15 = vmul.f32 %v4406_v19, %v2005_v34  ;;  %v1929_v44 = vmul.f32 %v2695_v27, %v1925_v25  ;;  %v1926_v30 = vsub.f32 %v4238_v39, %v4491_v35  ;;  %v1911_v13 = vmax.f32 %v1907_v0, 1e-06 }
 0x484   :  { %v2697_v57 = vpop.eup %2696  ;;  %v1919_v53 = vsel %vm4505_vm9, -8.0, %v1915_v18  ;;  %v2123_v56 = vsub.f32 0.0, %v2119_v24  ;;  %v4537_v17 = vadd.f32 -8.0, %v2009_v16  ;;  %v2138_v19 = vmul.f32 %v2691_v7, %v2137_v14 }
 0x485   :  { %v2006_v11 = vmul.f32 16.0, %v2697_v57  ;;  %v1933_v6 = vmax.f32 %v1929_v44, 0.0  ;;  %v2029_v12 = vsel %vm4416_vm12, %v2013_v5, %v2017_v15  ;;  %vm4545_vm7 = vcmp.lt.f32.partialorder %v2139_v47, 0.0004427343 }
 0x486   :  { %5269 = vst [vmem:[#allocation17_spill] sm:$0xff] %v4537_v17  ;;  %v4543_v20 = vsel %vm4392_vm5, %v2009_v16, %v2029_v12  ;;  %2708 = vrcp.f32 %v1911_v13  ;;  %v2129_v0 = vmul.f32 1.442695, %v2123_v56  ;;  %v4550_v39 = vadd.f32 %v4537_v17, %v2013_v5 }
 0x487   :  { %v2010_v57 = vmul.f32 %v4411_v8, %v2006_v11  ;;  %v2014_v35 = vmul.f32 %v4425_v3, %v2006_v11  ;;  %v2018_v25 = vmul.f32 %v4433_v32, %v2006_v11  ;;  %v2699_v24 = vpop.eup %2698  ;;  %v4555_v34 = vmin.f32 %v1933_v6, 1.0 }
 0x488   :  { %5272 = vst [vmem:[#allocation15_spill] sm:$0xff] %v4550_v39  ;;  %v5061_v14 = vmax.f32 %v4543_v20, 1e-06  ;;  %2710 = vpow2.f32 %v2129_v0  ;;  %v4560_v47 = vadd.f32 %v4515_v63, %v4468_v59  ;;  %v2142_v16 = vadd.f32 1.0, %v2699_v24 }
 0x489   :  { %v2701_v7 = vpop.eup %2700  ;;  %v4562_v18 = vadd.f32 -8.0, %v2010_v57  ;;  %v2030_v8 = vsel %vm4473_vm2, %v2014_v35, %v2018_v25  ;;  %v2145_v3 = vmul.f32 -0.5, %v2699_v24  ;;  %v1941_v15 = vsub.f32 1.0, %v4555_v34 }
 0x48a   :  { %v2703_v5 = vpop.eup %2702  ;;  %v2007_v32 = vmul.f32 16.0, %v2701_v7  ;;  %v4569_v44 = vmul.f32 %v2695_v27, %v5061_v14  ;;  %v4573_v13 = vsel %vm4448_vm15, %v2010_v57, %v2030_v8  ;;  %2712 = vlog2.f32 %v2142_v16 }
 0x48b   :  { %5273 = vst [vmem:[#allocation16_spill] sm:$0xff] %v4562_v18  ;;  %v2705_v56 = vpop.eup %2704  ;;  %v4576_v11 = vadd.f32 %v4562_v18, %v2014_v35  ;;  %v1930_v6 = vmul.f32 %v2703_v5, %v1926_v30  ;;  %v1945_v38 = vmul.f32 %v1941_v15, %v4555_v34  ;;  %vm4707_vm0 = vcmp.lt.f32.partialorder %v4249_v29, %v4515_v63 }
 0x48c   :  { %v2707_v0 = vpop.eup %2706  ;;  %v2011_v25 = vmul.f32 %v4444_v9, %v2007_v32  ;;  %v2015_v7 = vmul.f32 %v4452_v60, %v2007_v32  ;;  %v2019_v27 = vmul.f32 %v4462_v42, %v2007_v32  ;;  %v2008_v14 = vmul.f32 16.0, %v2705_v56  ;;  %vm1892_vm1 = vmxor %vm4707_vm0, %vm2790_vm4 }
 0x48d   :  { %5274 = vst [vmem:[#allocation18_spill] sm:$0xff] %v4576_v11  ;;  %v2135_v57 = vmul.f32 0.6931472, %v2707_v0  ;;  %v2189_v8 = vmul.f32 %v4569_v44, %v4555_v34  ;;  %v2213_v35 = vmul.f32 2.0, %v4569_v44  ;;  %v1927_v0 = vsub.f32 %v4241_v52, %v1919_v53 }
 0x48e   :  { %v4586_v30 = vadd.f32 -8.0, %v2011_v25  ;;  %v4589_v16 = vmul.f32 %v4477_v37, %v2008_v14  ;;  %v4592_v9 = vmul.f32 %v4485_v10, %v2008_v14  ;;  %v4595_v60 = vmul.f32 %v4497_v50, %v2008_v14 }
 0x48f   :  { %v2141_v42 = vsel %vm4545_vm7, %v2138_v19, %v2135_v57  ;;  %v2193_v32 = vmul.f32 %v2189_v8, %v4555_v34  ;;  %v2253_v56 = vmul.f32 %v2213_v35, %v1945_v38  ;;  %v5278_v10 = vmax.f32 %v4368_v58, 0.0 }
 0x490   :  { %5275 = vst [vmem:[#allocation19_spill] sm:$0xff] %v4586_v30  ;;  %v2709_v12 = vpop.eup %2708  ;;  %v4602_v46 = vadd.f32 %v4586_v30, %v2015_v7  ;;  %v4605_v37 = vadd.f32 -8.0, %v4589_v16  ;;  %v1934_v50 = vmax.f32 %v1930_v6, 0.0  ;;  %v5279_v14 = vmax.f32 %v4573_v13, 1e-06 }
 0x491   :  { %v2169_v23 = vadd.f32 %v2141_v42, %v5278_v10  ;;  %v2146_v19 = vadd.f32 1.0, %v2145_v3  ;;  %v2148_v57 = vand.u32 2147483647, %v2699_v24  ;;  %v1931_v8 = vmul.f32 %v2709_v12, %v1927_v0 }
 0x492   :  { %5276 = vst [vmem:[#allocation20_spill] sm:$0xff] %v4602_v46  ;;  %5277 = vst [vmem:[#allocation21_spill] sm:$0xff] %v4605_v37  ;;  %v4611_v49 = vmul.f32 %v2703_v5, %v5279_v14  ;;  %v4613_v18 = vpop.eup %2710  ;;  %v4617_v52 = vadd.f32 %v4605_v37, %v4592_v9  ;;  %v1938_v6 = vmin.f32 %v1934_v50, 1.0  ;;  %v2241_v42 = vmul.f32 %v4569_v44, %v4569_v44 }
 0x493   :  { %v2173_v53 = vsel %vm4416_vm12, %v4400_v40, %v2169_v23  ;;  %v2181_v58 = vsel %vm4416_vm12, %v2169_v23, 1.0  ;;  %v2147_v0 = vmul.f32 %v2699_v24, %v2146_v19  ;;  %vm4632_vm6 = vcmp.lt.f32.partialorder %v2148_v57, 0.0004427343 }
 0x494   :  { %5280 = vst [vmem:[#allocation22_spill] sm:$0xff] %v4617_v52  ;;  %v2177_v5 = vsel %vm4392_vm5, 1.0, %v2173_v53  ;;  %v2185_v3 = vsel %vm4392_vm5, %v4400_v40, %v2181_v58  ;;  %v2713_v30 = vpop.eup %2712  ;;  %v1942_v46 = vsub.f32 1.0, %v1938_v6  ;;  %v2190_v50 = vmul.f32 %v4611_v49, %v1938_v6 }
 0x495   :  { %v2197_v10 = vmul.f32 %v2177_v5, %v1945_v38  ;;  %v2209_v14 = vadd.f32 %v2185_v3, %v2177_v5  ;;  %v2245_v37 = vmul.f32 %v2185_v3, %v4555_v34  ;;  %v2261_v52 = vmul.f32 %v2177_v5, %v1941_v15 }
 0x496   :  { %v2214_v53 = vmul.f32 2.0, %v4611_v49  ;;  %v1946_v19 = vmul.f32 %v1942_v46, %v1938_v6  ;;  %v2144_v11 = vmul.f32 0.6931472, %v2713_v30  ;;  %v2194_v55 = vmul.f32 %v2190_v50, %v1938_v6 }
 0x497   :  { %v2201_v40 = vadd.f32 %v2197_v10, %v2193_v32  ;;  %v2217_v58 = vsub.f32 %v2209_v14, %v2213_v35  ;;  %v2249_v43 = vmul.f32 %v2245_v37, %v4555_v34  ;;  %v2265_v24 = vmul.f32 %v2261_v52, %v1941_v15 }
 0x498   :  { %v1935_v3 = vmax.f32 %v1931_v8, 0.0  ;;  %v5283_v5 = vmax.f32 %v4543_v20, 1e-06  ;;  %v2031_v22 = vsel %vm4519_vm8, %v2015_v7, %v2019_v27  ;;  %v2150_v32 = vsel %vm4632_vm6, %v2147_v0, %v2144_v11 }
 0x499   :  { %v2221_v57 = vmul.f32 %v2217_v58, %v1945_v38  ;;  %v2257_v39 = vadd.f32 %v2253_v56, %v2249_v43  ;;  %v2254_v35 = vmul.f32 %v2214_v53, %v1946_v19  ;;  %v4651_v34 = vsel %vm4505_vm9, %v2011_v25, %v2031_v22 }
 0x49a   :  { %v4641_v17 = vmul.f32 %v2201_v40, %v5283_v5  ;;  %v4647_v10 = vmin.f32 %v1935_v3, 1.0  ;;  %v5284_v30 = vmax.f32 %v4371_v54, 0.0  ;;  %v2039_v43 = vmax.f32 %v4651_v34, 1e-06  ;;  %v2313_v34 = vld [vmem:[%s4957_s1] sm:$0xff] }
 0x49b   :  { %v2225_v15 = vadd.f32 %v2221_v57, %v4569_v44  ;;  %v2269_v20 = vadd.f32 %v2265_v24, %v2257_v39  ;;  %v2093_v7 = vmul.f32 0.6931472, %v4382_v31  ;;  %v2095_v27 = vadd.f32 1.0, %v4322_v61  ;;  %v5302_v58 = vld [vmem:[#allocation22_spill] sm:$0xff] }
 0x49c   :  { %v2170_v38 = vadd.f32 %v2150_v32, %v5284_v30  ;;  %v4660_v11 = vsub.f32 1.0, %v4647_v10  ;;  %v2151_v56 = vadd.f32 1.0, %v4613_v18  ;;  %v4675_v31 = vmul.f32 %v2709_v12, %v2039_v43 }
 0x49d   :  { %2714 = vrcp.f32 %v2225_v15  ;;  %v2273_v22 = vmul.f32 %v2269_v20, %v2241_v42  ;;  %v4679_v25 = vadd.f32 %v4315_v4, %v3407_v36  ;;  %v2154_v14 = vmul.f32 -0.5, %v4613_v18 }
 0x49e   :  { %v2174_v39 = vsel %vm4473_vm2, %v4456_v28, %v2170_v38  ;;  %v2182_v54 = vsel %vm4473_vm2, %v2170_v38, 1.0  ;;  %v4683_v0 = vmul.f32 %v4660_v11, %v4647_v10  ;;  %2716 = vlog2.f32 %v2151_v56 }
 0x49f   :  { %v2178_v44 = vsel %vm4448_vm15, 1.0, %v2174_v39  ;;  %v2186_v61 = vsel %vm4448_vm15, %v4456_v28, %v2182_v54  ;;  %v2191_v28 = vmul.f32 %v4675_v31, %v4647_v10  ;;  %v2096_v36 = vmul.f32 %v4264_v48, %v2095_v27 }
 0x4a0   :  { %v2198_v37 = vmul.f32 %v2178_v44, %v1946_v19  ;;  %v2210_v8 = vadd.f32 %v2186_v61, %v2178_v44  ;;  %v2246_v52 = vmul.f32 %v2186_v61, %v1938_v6  ;;  %v2262_v42 = vmul.f32 %v2178_v44, %v1942_v46 }
 0x4a1   :  { %v5285_v4 = vand.u32 2147483647, %v4264_v48  ;;  %v4696_v24 = vmul.f32 %v2191_v28, %v4647_v10  ;;  %v4699_v3 = vmul.f32 2.0, %v4675_v31  ;;  %v5288_v5 = vmax.f32 %v4573_v13, 1e-06  ;;  %v5295_v28 = vld [vmem:[#allocation15_spill] sm:$0xff] }
 0x4a2   :  { %v2202_v12 = vadd.f32 %v2198_v37, %v2194_v55  ;;  %v2218_v23 = vsub.f32 %v2210_v8, %v2214_v53  ;;  %v2250_v50 = vmul.f32 %v2246_v52, %v1938_v6  ;;  %v2266_v40 = vmul.f32 %v2262_v42, %v1942_v46 }
 0x4a3   :  { %vm4691_vm13 = vcmp.lt.f32.partialorder %v5285_v4, 0.0004427343  ;;  %v4715_v57 = vmul.f32 %v4699_v3, %v4683_v0  ;;  %vm1896_vm7 = vcmp.lt.f32.partialorder %v4249_v29, %v4560_v47  ;;  %v2120_v13 = vand.u32 2147483647, %v4679_v25 }
 0x4a4   :  { %v4703_v55 = vmul.f32 %v2202_v12, %v5288_v5  ;;  %v2222_v6 = vmul.f32 %v2218_v23, %v1946_v19  ;;  %v2258_v46 = vadd.f32 %v2254_v35, %v2250_v50  ;;  %v2099_v53 = vsel %vm4691_vm13, %v2096_v36, %v2093_v7  ;;  %vm4726_vm6 = vmand %vm1892_vm1, %vm1896_vm7  ;;  %v5296_v12 = vld [vmem:[#allocation17_spill] sm:$0xff]  ;;  %v5298_v50 = vld [vmem:[#allocation18_spill] sm:$0xff] }
 0x4a5   :  { %v2242_v32 = vmul.f32 %v4611_v49, %v4611_v49  ;;  %v2155_v15 = vadd.f32 1.0, %v2154_v14  ;;  %v1904_v30 = vsel %vm4726_vm6, %v4468_v59, %v4471_v21  ;;  %v1916_v38 = vsel %vm4726_vm6, %v4515_v63, %v4560_v47  ;;  %v5294_v14 = vld [vmem:[#allocation10_spill] sm:$0xff]  ;;  %v5301_v36 = vld [vmem:[#allocation19_spill] sm:$0xff]  ;;  %v5303_v5 = vld [vmem:[#allocation21_spill] sm:$0xff] }
 0x4a6   :  { %v2226_v19 = vadd.f32 %v2222_v6, %v4611_v49  ;;  %v2270_v35 = vadd.f32 %v2266_v40, %v2258_v46  ;;  %v2032_v49 = vsel %vm4726_vm6, %v4592_v9, %v4595_v60  ;;  %v2124_v7 = vsub.f32 0.0, %v2120_v13  ;;  %v5300_v40 = vld [vmem:[#allocation20_spill] sm:$0xff] }
 0x4a7   :  { %v2715_v27 = vpop.eup %2714  ;;  %v1908_v39 = vsel %vm4707_vm0, %v4465_v45, %v1904_v30  ;;  %v1920_v59 = vsel %vm4707_vm0, -8.0, %v1916_v38  ;;  %v2157_v63 = vand.u32 2147483647, %v4613_v18  ;;  %v5293_v44 = vmax.f32 %v4202_v2, 0.0 }
 0x4a8   :  { %2718 = vrcp.f32 %v2226_v19  ;;  %v2274_v56 = vmul.f32 %v2270_v35, %v2242_v32  ;;  %v2233_v21 = vmul.f32 %v2715_v27, %v4641_v17  ;;  %v2277_v54 = vmul.f32 %v2715_v27, %v2715_v27  ;;  %v2717_v37 = vpop.eup %2716 }
 0x4a9   :  { %v1912_v47 = vmax.f32 %v1908_v39, 1e-06  ;;  %v2111_v9 = vadd.f32 %v2099_v53, %v5293_v44  ;;  %v2100_v60 = vadd.f32 1.0, %v4306_v26  ;;  %v4755_v61 = vsel %vm4707_vm0, %v4589_v16, %v2032_v49 }
 0x4aa   :  { %v2131_v45 = vmul.f32 1.442695, %v2124_v7  ;;  %v2281_v8 = vmul.f32 %v2277_v54, %v2273_v22  ;;  %v2115_v52 = vmax.f32 %v4495_v51, 0.0  ;;  %v2156_v17 = vmul.f32 %v4613_v18, %v2155_v15  ;;  %v5299_v22 = vld [vmem:[#allocation16_spill] sm:$0xff] }
 0x4ab   :  { %2720 = vrcp.f32 %v1912_v47  ;;  %v2153_v42 = vmul.f32 0.6931472, %v2717_v37  ;;  %vm1865_vm4 = vcmp.ge.f32.partialorder %v5294_v14, -8.0  ;;  %vm1869_vm13 = vcmp.le.f32.partialorder %v5294_v14, 8.0 }
 0x4ac   :  { %2722 = vpow2.f32 %v2131_v45  ;;  %v2285_v2 = vmax.f32 %v2281_v8, 1e-12  ;;  %vm2158_vm1 = vcmp.lt.f32.partialorder %v2157_v63, 0.0004427343  ;;  %v2041_v23 = vsel %vm4416_vm12, %v5296_v12, %v5295_v28  ;;  %vm4779_vm12 = vmand %vm1865_vm4, %vm1869_vm13 }
 0x4ad   :  { %v2042_v51 = vsel %vm4473_vm2, %v5299_v22, %v5298_v50  ;;  %v2159_v18 = vsel %vm2158_vm1, %v2156_v17, %v2153_v42  ;;  %v2043_v4 = vsel %vm4519_vm8, %v5301_v36, %v5300_v40  ;;  %v2044_v6 = vsel %vm4726_vm6, %v5303_v5, %v5302_v58  ;;  %v5312_v36 = vld [vmem:[#allocation57_spill] sm:$0xff] }
 0x4ae   :  { %v2045_v53 = vsel %vm4392_vm5, -8.0, %v2041_v23  ;;  %2724 = vlog2.f32 %v2285_v2  ;;  %v2171_v13 = vadd.f32 %v2159_v18, %v2115_v52  ;;  %v2046_v41 = vsel %vm4448_vm15, -8.0, %v2042_v51 }
 0x4af   :  { %v4787_v32 = vsel %vm4505_vm9, -8.0, %v2043_v4  ;;  %2726 = vlog2.f32 %v2100_v60  ;;  %v4791_v35 = vsel %vm4707_vm0, -8.0, %v2044_v6  ;;  %v2237_v15 = vadd.f32 %v2233_v21, %v2045_v53 }
 0x4b0   :  { %v2175_v30 = vsel %vm4519_vm8, %v2111_v9, %v2171_v13  ;;  %v2183_v38 = vsel %vm4519_vm8, %v2171_v13, 1.0  ;;  %v1928_v49 = vsub.f32 %v4249_v29, %v1920_v59  ;;  %vm1866_vm5 = vcmp.ge.f32.partialorder %v5307_v62, -8.0  ;;  %v5314_v13 = vld [vmem:[#allocation63_spill] sm:$0xff] }
 0x4b1   :  { %v2179_v27 = vsel %vm4505_vm9, 1.0, %v2175_v30  ;;  %v2187_v39 = vsel %vm4505_vm9, %v2111_v9, %v2183_v38  ;;  %v2040_v54 = vmax.f32 %v4755_v61, 1e-06  ;;  %v2297_v21 = vsel %vm4779_vm12, %v2237_v15, %v5294_v14  ;;  %v5326_v61 = vld [vmem:[#allocation58_spill] sm:$0xff] }
 0x4b2   :  { %v2719_v7 = vpop.eup %2718  ;;  %v2199_v29 = vmul.f32 %v2179_v27, %v4683_v0  ;;  %v2211_v59 = vadd.f32 %v2187_v39, %v2179_v27  ;;  %v2247_v47 = vmul.f32 %v2187_v39, %v4647_v10  ;;  %v2263_v44 = vmul.f32 %v2179_v27, %v4660_v11 }
 0x4b3   :  { %v2234_v1 = vmul.f32 %v2719_v7, %v4703_v55  ;;  %v2278_v63 = vmul.f32 %v2719_v7, %v2719_v7  ;;  %vm1870_vm15 = vcmp.le.f32.partialorder %v5307_v62, 8.0  ;;  %v2305_v9 = vadd.f32 %v2297_v21, %v5308_v33  ;;  %v2314_v7 = vld [vmem:[%s4957_s1 + $0x8] sm:$0xff]  ;;  %v5318_v33 = vld [vmem:[#allocation12_spill] sm:$0xff] }
 0x4b4   :  { %v2203_v37 = vadd.f32 %v2199_v29, %v4696_v24  ;;  %v2219_v8 = vsub.f32 %v2211_v59, %v4699_v3  ;;  %v2251_v17 = vmul.f32 %v2247_v47, %v4647_v10  ;;  %v2267_v42 = vmul.f32 %v2263_v44, %v4660_v11  ;;  %vm4829_vm2 = vmand %vm1866_vm5, %vm1870_vm15  ;;  %v5316_v59 = vld [vmem:[#allocation59_spill] sm:$0xff] }
 0x4b5   :  { %v2721_v60 = vpop.eup %2720  ;;  %v2282_v45 = vmul.f32 %v2278_v63, %v2274_v56  ;;  %v2238_v52 = vadd.f32 %v2234_v1, %v2046_v41  ;;  %2309 = vst [vmem:[#allocation2] sm:$0xff] %v2305_v9  ;;  %v2103_v22 = vmul.f32 -0.5, %v4306_v26  ;;  %v5313_v4 = vsel %vm4044_vm3, %v5312_v36, 0.0 }
 0x4b6   :  { %v2723_v55 = vpop.eup %2722  ;;  %v1932_v14 = vmul.f32 %v2721_v60, %v1928_v49  ;;  %v4819_v2 = vmul.f32 %v2721_v60, %v2040_v54  ;;  %v2207_v56 = vmul.f32 %v2203_v37, %v2039_v43  ;;  %v2223_v24 = vmul.f32 %v2219_v8, %v4683_v0  ;;  %v5321_v8 = vld [vmem:[#allocation11_spill] sm:$0xff] }
 0x4b7   :  { %v2286_v28 = vmax.f32 %v2282_v45, 1e-12  ;;  %v2160_v12 = vadd.f32 1.0, %v2723_v55  ;;  %v2259_v3 = vadd.f32 %v4715_v57, %v2251_v17  ;;  %v2243_v57 = vmul.f32 %v4675_v31, %v4675_v31 }
 0x4b8   :  { %v1936_v16 = vmax.f32 %v1932_v14, 0.0  ;;  %v2725_v11 = vpop.eup %2724  ;;  %v2227_v43 = vadd.f32 %v2223_v24, %v4675_v31  ;;  %v2298_v18 = vsel %vm4829_vm2, %v2238_v52, %v5307_v62  ;;  %v2317_v58 = vadd.f32 %v2313_v34, %v5313_v4 }
 0x4b9   :  { %2728 = vlog2.f32 %v2286_v28  ;;  %v2727_v0 = vpop.eup %2726  ;;  %v2271_v23 = vadd.f32 %v2267_v42, %v2259_v3  ;;  %v2290_v51 = vmul.f32 0.6931472, %v2725_v11  ;;  %v2163_v46 = vmul.f32 -0.5, %v2723_v55 }
 0x4ba   :  { %v4839_v50 = vmin.f32 %v1936_v16, 1.0  ;;  %2730 = vlog2.f32 %v2160_v12  ;;  %v2306_v41 = vadd.f32 %v2298_v18, %v5314_v13  ;;  %v2216_v38 = vmul.f32 2.0, %v4819_v2  ;;  %v5324_v18 = vld [vmem:[#allocation60_spill] sm:$0xff] }
 0x4bb   :  { %2732 = vrcp.f32 %v2227_v43  ;;  %v2275_v5 = vmul.f32 %v2271_v23, %v2243_v57  ;;  %v2301_v53 = vsel %vm4779_vm12, %v2290_v51, 0.0  ;;  %v2104_v62 = vadd.f32 1.0, %v2103_v22 }
 0x4bc   :  { %v1944_v31 = vsub.f32 1.0, %v4839_v50  ;;  %v2192_v6 = vmul.f32 %v4819_v2, %v4839_v50  ;;  %v2321_v49 = vadd.f32 %v2317_v58, %v2301_v53  ;;  %2310 = vst [vmem:[#allocation2 + $0x8] sm:$0xff] %v2306_v41  ;;  %v2106_v27 = vand.u32 2147483647, %v4306_v26 }
 0x4bd   :  { %v2102_v19 = vmul.f32 0.6931472, %v2727_v0  ;;  %v2164_v21 = vadd.f32 1.0, %v2163_v46  ;;  %v2166_v1 = vand.u32 2147483647, %v2723_v55  ;;  %v5317_v47 = vsel %vm4016_vm11, %v5316_v59, 0.0 }
 0x4be   :  { %v1948_v15 = vmul.f32 %v1944_v31, %v4839_v50  ;;  %v2196_v30 = vmul.f32 %v2192_v6, %v4839_v50  ;;  %2325 = vst [vmem:[#allocation4] sm:$0xff] %v2321_v49  ;;  %v2318_v44 = vadd.f32 %v2314_v7, %v5317_v47  ;;  %v2056_v9 = vmax.f32 %v5318_v33, 0.0  ;;  %v5331_v33 = vld [vmem:[#allocation45_spill] sm:$0xff] }
 0x4bf   :  { %v2105_v60 = vmul.f32 %v4306_v26, %v2104_v62  ;;  %vm4868_vm3 = vcmp.lt.f32.partialorder %v2106_v27, 0.0004427343  ;;  %vm1867_vm9 = vcmp.ge.f32.partialorder %v5321_v8, -8.0  ;;  %vm1871_vm8 = vcmp.le.f32.partialorder %v5321_v8, 8.0 }
 0x4c0   :  { %v2256_v39 = vmul.f32 %v2216_v38, %v1948_v15  ;;  %v2116_v14 = vmax.f32 %v4679_v25, 0.0  ;;  %v2165_v24 = vmul.f32 %v2723_v55, %v2164_v21  ;;  %vm2167_vm11 = vcmp.lt.f32.partialorder %v2166_v1, 0.0004427343  ;;  %vm4879_vm7 = vmand %vm1867_vm9, %vm1871_vm8 }
 0x4c1   :  { %v2108_v42 = vsel %vm4868_vm3, %v2105_v60, %v2102_v19  ;;  %v2244_v49 = vmul.f32 %v4819_v2, %v4819_v2 }
 0x4c2   :  { %v2112_v43 = vadd.f32 %v2108_v42, %v2056_v9 }
 0x4c3   :  { %v2729_v63 = vpop.eup %2728 }
 0x4c4   :  { %v2731_v45 = vpop.eup %2730  ;;  %v2292_v52 = vmul.f32 0.6931472, %v2729_v63 }
 0x4c5   :  { %v2733_v17 = vpop.eup %2732  ;;  %v2162_v28 = vmul.f32 0.6931472, %v2731_v45 }
 0x4c6   :  { %v2235_v12 = vmul.f32 %v2733_v17, %v2207_v56  ;;  %v2279_v26 = vmul.f32 %v2733_v17, %v2733_v17  ;;  %v2302_v3 = vsel %vm4829_vm2, %v2292_v52, 0.0 }
 0x4c7   :  { %v2168_v16 = vsel %vm2167_vm11, %v2165_v24, %v2162_v28  ;;  %v2322_v34 = vadd.f32 %v2318_v44, %v2302_v3 }
 0x4c8   :  { %v2283_v0 = vmul.f32 %v2279_v26, %v2275_v5  ;;  %v2172_v57 = vadd.f32 %v2168_v16, %v2116_v14  ;;  %v2239_v23 = vadd.f32 %v2235_v12, %v4787_v32 }
 0x4c9   :  { %2326 = vst [vmem:[#allocation4 + $0x8] sm:$0xff] %v2322_v34 }
 0x4ca   :  { %v2287_v25 = vmax.f32 %v2283_v0, 1e-12  ;;  %v2176_v55 = vsel %vm4726_vm6, %v2112_v43, %v2172_v57  ;;  %v2184_v56 = vsel %vm4726_vm6, %v2172_v57, 1.0  ;;  %v2299_v10 = vsel %vm4879_vm7, %v2239_v23, %v5321_v8 }
 0x4cb   :  { %v2180_v22 = vsel %vm4707_vm0, 1.0, %v2176_v55  ;;  %v2188_v51 = vsel %vm4707_vm0, %v2112_v43, %v2184_v56  ;;  %v2307_v32 = vadd.f32 %v2299_v10, %v5324_v18 }
 0x4cc   :  { %2734 = vlog2.f32 %v2287_v25  ;;  %v2200_v40 = vmul.f32 %v2180_v22, %v1948_v15  ;;  %v2212_v36 = vadd.f32 %v2188_v51, %v2180_v22  ;;  %v2248_v4 = vmul.f32 %v2188_v51, %v4839_v50 }
 0x4cd   :  { %v2264_v58 = vmul.f32 %v2180_v22, %v1944_v31  ;;  %2311 = vst [vmem:[#allocation2 + $0x10] sm:$0xff] %v2307_v32 }
 0x4ce   :  { %v2204_v20 = vadd.f32 %v2200_v40, %v2196_v30  ;;  %v2220_v5 = vsub.f32 %v2212_v36, %v2216_v38  ;;  %v2252_v6 = vmul.f32 %v2248_v4, %v4839_v50  ;;  %v2315_v30 = vld [vmem:[%s4957_s1 + $0x10] sm:$0xff] }
 0x4cf   :  { %v2268_v46 = vmul.f32 %v2264_v58, %v1944_v31 }
 0x4d0   :  { %v2208_v53 = vmul.f32 %v2204_v20, %v2040_v54  ;;  %v2224_v13 = vmul.f32 %v2220_v5, %v1948_v15  ;;  %v2260_v48 = vadd.f32 %v2256_v39, %v2252_v6  ;;  %v5327_v54 = vsel %vm4064_vm10, %v5326_v61, 0.0 }
 0x4d1   :  { %v2319_v15 = vadd.f32 %v2315_v30, %v5327_v54 }
 0x4d2   :  { %v2228_v41 = vadd.f32 %v2224_v13, %v4819_v2  ;;  %v2272_v62 = vadd.f32 %v2268_v46, %v2260_v48  ;;  %v5328_v2 = vld [vmem:[#allocation9_spill] sm:$0xff] }
 0x4d3   :  { %vm1868_vm0 = vcmp.ge.f32.partialorder %v5328_v2, -8.0  ;;  %vm1872_vm6 = vcmp.le.f32.partialorder %v5328_v2, 8.0 }
 0x4d4   :  { %2736 = vrcp.f32 %v2228_v41  ;;  %v2276_v7 = vmul.f32 %v2272_v62, %v2244_v49  ;;  %vm4914_vm4 = vmand %vm1868_vm0, %vm1872_vm6 }
 0x4d6   :  { %v2735_v38 = vpop.eup %2734 }
 0x4d7   :  { %v2294_v50 = vmul.f32 0.6931472, %v2735_v38 }
 0x4d9   :  { %v2303_v27 = vsel %vm4879_vm7, %v2294_v50, 0.0 }
 0x4da   :  { %v2323_v39 = vadd.f32 %v2319_v15, %v2303_v27 }
 0x4dc   :  { %2327 = vst [vmem:[#allocation4 + $0x10] sm:$0xff] %v2323_v39 }
 0x4de   :  { %v2737_v19 = vpop.eup %2736 }
 0x4df   :  { %v2236_v21 = vmul.f32 %v2737_v19, %v2208_v53  ;;  %v2280_v1 = vmul.f32 %v2737_v19, %v2737_v19 }
 0x4e1   :  { %v2284_v29 = vmul.f32 %v2280_v1, %v2276_v7  ;;  %v2240_v59 = vadd.f32 %v2236_v21, %v4791_v35 }
 0x4e3   :  { %v2288_v47 = vmax.f32 %v2284_v29, 1e-12  ;;  %v2300_v44 = vsel %vm4914_vm4, %v2240_v59, %v5328_v2 }
 0x4e4   :  { %v2308_v9 = vadd.f32 %v2300_v44, %v5331_v33 }
 0x4e5   :  { %2738 = vlog2.f32 %v2288_v47 }
 0x4e6   :  { %2312 = vst [vmem:[#allocation2 + $0x18] sm:$0xff] %v2308_v9 }
 0x4e7   :  { %2752 = shalt.err (!%p2749_p4)
}
 0x4e8   :  { %s2753_s28 = scalar_lea.hbm %s4963_s7, 512 }
 0x4e9   :  { %p2754_p5 = scmp.ne.s32.totalorder %s4963_s7, %s2753_s28  ;;  %p2757_p6 = scmp.lt.u32.totalorder %s2753_s28, %s4963_s7 }
 0x4eb   :  { %p2759_p7 = pnand %p2757_p6, %p2754_p5 }
 0x4ed   :  { %2762 = shalt.err (!%p2759_p7)
}
 0x4ee   :  { %s2792_s10 = smov 256   ;;  %s2793_s11 = smov 16   ;;  %v2316_v35 = vld [vmem:[%s4957_s1 + $0x18] sm:$0xff] }
 0x4ef   :  { %2340 = dma.vmem_to_hbm [thread:$0]  %s2335_s24, 512, %s4963_s7, [#allocation3], %s2792_s10, %s2792_s10, %s2793_s11   ;;  %v2739_v60 = vpop.eup %2738  ;;  %v5333_v8 = vld [vmem:[#allocation51_spill] sm:$0xff] }
 0x4f0   :  { %v2296_v45 = vmul.f32 0.6931472, %v2739_v60  ;;  %s2794_s5 = smov [#allocation4]   ;;  %v5334_v52 = vsel %vm4109_vm14, %v5333_v8, 0.0 }
 0x4f1   :  { %s2346_s15 = sshll.u32 %s2794_s5, 4  ;;  %v2320_v17 = vadd.f32 %v2316_v35, %v5334_v52  ;;  %s2347_s15 = int_to_ptr.vmem [resolvable:$true] %s2346_s15 }
 0x4f2   :  { %v2304_v42 = vsel %vm4914_vm4, %v2296_v45, 0.0  ;;  %s2763_s7 = scalar_lea.vmem %s2347_s15, 512  ;;  %p2768_p9 = scmp.lt.s32.totalorder %s2347_s15, %s2347_s15 }
 0x4f3   :  { %v2324_v14 = vadd.f32 %v2320_v17, %v2304_v42  ;;  %p2764_p8 = scmp.ne.s32.totalorder %s2347_s15, %s2763_s7  ;;  %p2769_p10 = scmp.lt.s32.totalorder %s2763_s7, %s2763_s7 }
 0x4f5   :  { %2328 = vst [vmem:[#allocation4 + $0x18] sm:$0xff] %v2324_v14  ;;  %p2770_p11 = por %p2769_p10, %p2768_p9 }
 0x4f7   :  { %p2771_p12 = pnand %p2770_p11, %p2764_p8 }
 0x4f9   :  { %2774 = shalt.err (!%p2771_p12)
}
 0x4fa   :  { %s2775_s17 = scalar_lea.hbm %s4964_s8, 512 }
 0x4fb   :  { %p2776_p13 = scmp.ne.s32.totalorder %s4964_s8, %s2775_s17  ;;  %p2779_p0 = scmp.lt.u32.totalorder %s2775_s17, %s4964_s8 }
 0x4fd   :  { %p2781_p1 = pnand %p2779_p0, %p2776_p13 }
 0x4ff   :  { %2784 = shalt.err (!%p2781_p1)
}
 0x500   :  { %2352 = dma.vmem_to_hbm [thread:$0]  %s2347_s15, 512, %s4964_s8, [#allocation5], %s2792_s10, %s2792_s10, %s2793_s11  }
 0x501   :  { %2785 = dma.done.wait [#allocation3], 512  }
 0x502   :  { %2786 = vsyncadd [#allocation3], 4294966784 }
 0x503   :  { %2787 = dma.done.wait [#allocation5], 512  }
 0x504   :  { %2788 = vsyncadd [#allocation5], 4294966784 }
 0x505   :  { %2359 = vsyncpa [#allocation3], 1 }
 0x506   :  { %2360 = vsyncpa [#allocation5], 1 }

</bundles_post_ra>
